<compile_context>
chip_gen: v6e
topology: v6e:2x2x1
jax: 0.10.0
libtpu: 0.0.40
codegen_flags: <defaults>
</compile_context>

<pallas_src>
import functools

import jax
import jax.numpy as jnp
import numpy as np
from jax.experimental import pallas as pl
from jax.experimental.pallas import tpu as pltpu


def _fused_patchnet_kernel(H, W, x_ref, w1_ref, b1_ref, w2_ref, b2_ref,
                           w3_ref, b3_ref, o_ref, y1_ref, y2_ref):
    """Fused conv1->relu->conv2->relu->conv3->relu->flatten for one image.

    x_ref : (1, Cin, H*W)      NCHW image with spatial flattened onto lanes
    w*_ref: (3, 3, Cout, Cin)  per-tap weight matrices (already transposed)
    b*_ref: (Cout, 1)
    o_ref : (1, Cout, H3*W3)   final activation in torch NCHW flatten order
    y1_ref: (Cout, m1) VMEM    layer-1 activation ("wide" flat layout)
    y2_ref: (Cout, m2) VMEM    layer-2 activation
    """
    step = 2 * W + 2                      # flat-column shrink per VALID 3x3 conv
    m1 = H * W - step
    m2 = m1 - step
    m3 = m2 - step
    H3, W3 = H - 6, W - 6

    def conv3x3_relu(load, m_out, w_ref, b_ref):
        # VALID 3x3 conv as 9 whole-image matmuls over contiguous lane windows:
        #   (Cout, Cin) @ (Cin, m_out),  m_out ~ O(H*W)  -> MXU actually fed.
        cout = w_ref.shape[2]
        acc = jnp.zeros((cout, m_out), jnp.float32)
        for kh in range(3):
            for kw in range(3):
                acc = acc + jnp.dot(w_ref[kh, kw], load(kh * W + kw, m_out),
                                    preferred_element_type=jnp.float32)
        # bias + ReLU hoisted: applied once per layer over the whole slab.
        return jnp.maximum(acc + b_ref[...], 0.0)

    # Layer 1 reads the input block; layers 2/3 read VMEM-resident scratch.
    y1_ref[...] = conv3x3_relu(lambda o, m: x_ref[0, :, o:o + m],
                               m1, w1_ref, b1_ref)
    y2_ref[...] = conv3x3_relu(lambda o, m: y1_ref[:, o:o + m],
                               m2, w2_ref, b2_ref)
    y3 = conv3x3_relu(lambda o, m: y2_ref[:, o:o + m], m3, w3_ref, b3_ref)

    # The wide flat layout keeps W columns per spatial row; only the first W3
    # of each row are valid conv outputs.  Scatter the valid windows into the
    # output block, which is already in torch's (C, H, W) flatten order.
    for h in range(H3):
        o_ref[0, :, h * W3:(h + 1) * W3] = (
            y3[:, h * W:h * W + W3].astype(o_ref.dtype))


@jax.jit
def simple_patch_net_forward(x_nchw, params_oihw):
    """Pallas implementation of SimplePatchNet.forward (needles=0).

    x_nchw: (N, 3, H, W) float32; params_oihw: list of (w_oihw, b).
    Returns (N, 32 * (H-6) * (W-6)) in torch's NCHW flatten order.
    """
    N, Cin, H, W = x_nchw.shape
    H3, W3 = H - 6, W - 6

    # NCHW already has channels leading: flattening spatial dims is free and
    # puts the large spatial axis on TPU lanes (no transpose of the input).
    x_flat = x_nchw.reshape(N, Cin, H * W)
    # Weights OIHW -> (KH, KW, O, I) once, outside the kernel; bias -> column.
    packed = [(jnp.transpose(w, (2, 3, 0, 1)), b.reshape(-1, 1))
              for w, b in params_oihw]
    (w1, b1), (w2, b2), (w3, b3) = packed
    Cout = w3.shape[2]

    step = 2 * W + 2
    m1 = H * W - step
    m2 = m1 - step

    kernel = functools.partial(_fused_patchnet_kernel, H, W)
    out = pl.pallas_call(
        kernel,
        out_shape=jax.ShapeDtypeStruct((N, Cout, H3 * W3), jnp.float32),
        grid=(N,),
        in_specs=[
            pl.BlockSpec((1, Cin, H * W), lambda n: (n, 0, 0)),
            pl.BlockSpec(w1.shape, lambda n: (0, 0, 0, 0)),
            pl.BlockSpec(b1.shape, lambda n: (0, 0)),
            pl.BlockSpec(w2.shape, lambda n: (0, 0, 0, 0)),
            pl.BlockSpec(b2.shape, lambda n: (0, 0)),
            pl.BlockSpec(w3.shape, lambda n: (0, 0, 0, 0)),
            pl.BlockSpec(b3.shape, lambda n: (0, 0)),
        ],
        out_specs=pl.BlockSpec((1, Cout, H3 * W3), lambda n: (n, 0, 0)),
        scratch_shapes=[
            pltpu.VMEM((w1.shape[2], m1), jnp.float32),  # layer-1 act in VMEM
            pltpu.VMEM((w2.shape[2], m2), jnp.float32),  # layer-2 act in VMEM
        ],
        compiler_params=pltpu.CompilerParams(
            dimension_semantics=("parallel",),   # batch -> both v7x TCs
            vmem_limit_bytes=32 * 1024 * 1024,
        ),
    )(x_flat, w1, b1, w2, b2, w3, b3)

    # (N, Cout, H3*W3) is already torch's x.view(N, -1) order -> free reshape.
    return out.reshape(N, Cout * H3 * W3)


def reference_forward(x_nchw, params_oihw):
    """Plain-JAX reference (lax conv) for correctness checking."""
    x = x_nchw
    for w, b in params_oihw:
        x = jax.lax.conv_general_dilated(
            x, w, window_strides=(1, 1), padding="VALID",
            dimension_numbers=("NCHW", "OIHW", "NCHW"))
        x = jax.nn.relu(x + b[None, :, None, None])
    return x.reshape(x.shape[0], -1)


if __name__ == "__main__":
    key = jax.random.PRNGKey(0)
    k1, k2, k3, k4, k5, k6, kx = jax.random.split(key, 7)

    # SimplePatchNet(needles=0): conv1 (32,3,3,3), conv2/conv3 (32,32,3,3)
    params = [
        (jax.random.normal(k1, (32, 3, 3, 3), jnp.float32) * 0.1,
         jax.random.normal(k2, (32,), jnp.float32) * 0.05),
        (jax.random.normal(k3, (32, 32, 3, 3), jnp.float32) * 0.05,
         jax.random.normal(k4, (32,), jnp.float32) * 0.05),
        (jax.random.normal(k5, (32, 32, 3, 3), jnp.float32) * 0.05,
         jax.random.normal(k6, (32,), jnp.float32) * 0.05),
    ]

    # NCHW input, small patch: batch=2, channels=3, spatial=16x16
    x = jax.random.normal(kx, (2, 3, 16, 16), jnp.float32)

    out = jax.block_until_ready(simple_patch_net_forward(x, params))
    ref = jax.block_until_ready(reference_forward(x, params))

    assert out.shape == (2, 32 * 10 * 10), out.shape
    np.testing.assert_allclose(np.asarray(out), np.asarray(ref),
                               rtol=1e-4, atol=1e-4)

    print("KERNEL_OK")
</pallas_src>

<mosaic_0001>
module attributes {stable_mosaic.version = 11 : i64} {
  func.func @_fused_patchnet_kernel(%arg0: i32, %arg1: memref<1x3x256xf32, #tpu.memory_space<vmem>>, %arg2: memref<3x3x32x3xf32, #tpu.memory_space<vmem>>, %arg3: memref<32x1xf32, #tpu.memory_space<vmem>>, %arg4: memref<3x3x32x32xf32, #tpu.memory_space<vmem>>, %arg5: memref<32x1xf32, #tpu.memory_space<vmem>>, %arg6: memref<3x3x32x32xf32, #tpu.memory_space<vmem>>, %arg7: memref<32x1xf32, #tpu.memory_space<vmem>>, %arg8: memref<1x32x100xf32, #tpu.memory_space<vmem>>, %arg9: memref<32x222xf32, #tpu.memory_space<vmem>>, %arg10: memref<32x188xf32, #tpu.memory_space<vmem>>) attributes {dimension_semantics = [#tpu.dimension_semantics<parallel>], iteration_bounds = array<i64: 2>, scalar_prefetch = 0 : i64, scratch_operands = 2 : i64, tpu.core_type = #tpu.core_type<tc>, window_params = [{transform_indices = @transform_0, window_bounds = array<i64: 1, 3, 256>}, {pipeline_mode = #tpu.pipeline_mode<synchronous>, transform_indices = @transform_1, window_bounds = array<i64: 3, 3, 32, 3>}, {pipeline_mode = #tpu.pipeline_mode<synchronous>, transform_indices = @transform_2, window_bounds = array<i64: 32, 1>}, {pipeline_mode = #tpu.pipeline_mode<synchronous>, transform_indices = @transform_3, window_bounds = array<i64: 3, 3, 32, 32>}, {pipeline_mode = #tpu.pipeline_mode<synchronous>, transform_indices = @transform_4, window_bounds = array<i64: 32, 1>}, {pipeline_mode = #tpu.pipeline_mode<synchronous>, transform_indices = @transform_5, window_bounds = array<i64: 3, 3, 32, 32>}, {pipeline_mode = #tpu.pipeline_mode<synchronous>, transform_indices = @transform_6, window_bounds = array<i64: 32, 1>}, {transform_indices = @transform_7, window_bounds = array<i64: 1, 32, 100>}]} {
    %cst = arith.constant 0.000000e+00 : f32
    %0 = vector.broadcast %cst : f32 to vector<32x222xf32>
    %c0 = arith.constant 0 : index
    %c0_0 = arith.constant 0 : index
    %c0_1 = arith.constant 0 : index
    %c0_2 = arith.constant 0 : index
    %1 = vector.load %arg2[%c0, %c0_0, %c0_1, %c0_2] : memref<3x3x32x3xf32, #tpu.memory_space<vmem>>, vector<1x1x32x3xf32>
    %2 = vector.shape_cast %1 : vector<1x1x32x3xf32> to vector<32x3xf32>
    %c0_3 = arith.constant 0 : index
    %c0_4 = arith.constant 0 : index
    %c0_5 = arith.constant 0 : index
    %3 = vector.load %arg1[%c0_3, %c0_4, %c0_5] : memref<1x3x256xf32, #tpu.memory_space<vmem>>, vector<1x3x222xf32>
    %4 = vector.shape_cast %3 : vector<1x3x222xf32> to vector<3x222xf32>
    %cst_6 = arith.constant dense<0.000000e+00> : vector<32x222xf32>
    %5 = tpu.matmul %2, %4, %cst_6 {dimension_numbers = #tpu.dot_dimension_numbers<[1], [0], [0], [1], [0, 0, 1, 1], [], []>} : vector<32x3xf32>, vector<3x222xf32>, vector<32x222xf32> -> vector<32x222xf32>
    %6 = arith.addf %0, %5 : vector<32x222xf32>
    %c0_7 = arith.constant 0 : index
    %c1 = arith.constant 1 : index
    %c0_8 = arith.constant 0 : index
    %c0_9 = arith.constant 0 : index
    %7 = vector.load %arg2[%c0_7, %c1, %c0_8, %c0_9] : memref<3x3x32x3xf32, #tpu.memory_space<vmem>>, vector<1x1x32x3xf32>
    %8 = vector.shape_cast %7 : vector<1x1x32x3xf32> to vector<32x3xf32>
    %c0_10 = arith.constant 0 : index
    %c0_11 = arith.constant 0 : index
    %c1_12 = arith.constant 1 : index
    %9 = vector.load %arg1[%c0_10, %c0_11, %c1_12] : memref<1x3x256xf32, #tpu.memory_space<vmem>>, vector<1x3x222xf32>
    %10 = vector.shape_cast %9 : vector<1x3x222xf32> to vector<3x222xf32>
    %cst_13 = arith.constant dense<0.000000e+00> : vector<32x222xf32>
    %11 = tpu.matmul %8, %10, %cst_13 {dimension_numbers = #tpu.dot_dimension_numbers<[1], [0], [0], [1], [0, 0, 1, 1], [], []>} : vector<32x3xf32>, vector<3x222xf32>, vector<32x222xf32> -> vector<32x222xf32>
    %12 = arith.addf %6, %11 : vector<32x222xf32>
    %c0_14 = arith.constant 0 : index
    %c2 = arith.constant 2 : index
    %c0_15 = arith.constant 0 : index
    %c0_16 = arith.constant 0 : index
    %13 = vector.load %arg2[%c0_14, %c2, %c0_15, %c0_16] : memref<3x3x32x3xf32, #tpu.memory_space<vmem>>, vector<1x1x32x3xf32>
    %14 = vector.shape_cast %13 : vector<1x1x32x3xf32> to vector<32x3xf32>
    %c0_17 = arith.constant 0 : index
    %c0_18 = arith.constant 0 : index
    %c2_19 = arith.constant 2 : index
    %15 = vector.load %arg1[%c0_17, %c0_18, %c2_19] : memref<1x3x256xf32, #tpu.memory_space<vmem>>, vector<1x3x222xf32>
    %16 = vector.shape_cast %15 : vector<1x3x222xf32> to vector<3x222xf32>
    %cst_20 = arith.constant dense<0.000000e+00> : vector<32x222xf32>
    %17 = tpu.matmul %14, %16, %cst_20 {dimension_numbers = #tpu.dot_dimension_numbers<[1], [0], [0], [1], [0, 0, 1, 1], [], []>} : vector<32x3xf32>, vector<3x222xf32>, vector<32x222xf32> -> vector<32x222xf32>
    %18 = arith.addf %12, %17 : vector<32x222xf32>
    %c1_21 = arith.constant 1 : index
    %c0_22 = arith.constant 0 : index
    %c0_23 = arith.constant 0 : index
    %c0_24 = arith.constant 0 : index
    %19 = vector.load %arg2[%c1_21, %c0_22, %c0_23, %c0_24] : memref<3x3x32x3xf32, #tpu.memory_space<vmem>>, vector<1x1x32x3xf32>
    %20 = vector.shape_cast %19 : vector<1x1x32x3xf32> to vector<32x3xf32>
    %c0_25 = arith.constant 0 : index
    %c0_26 = arith.constant 0 : index
    %c16 = arith.constant 16 : index
    %21 = vector.load %arg1[%c0_25, %c0_26, %c16] : memref<1x3x256xf32, #tpu.memory_space<vmem>>, vector<1x3x222xf32>
    %22 = vector.shape_cast %21 : vector<1x3x222xf32> to vector<3x222xf32>
    %cst_27 = arith.constant dense<0.000000e+00> : vector<32x222xf32>
    %23 = tpu.matmul %20, %22, %cst_27 {dimension_numbers = #tpu.dot_dimension_numbers<[1], [0], [0], [1], [0, 0, 1, 1], [], []>} : vector<32x3xf32>, vector<3x222xf32>, vector<32x222xf32> -> vector<32x222xf32>
    %24 = arith.addf %18, %23 : vector<32x222xf32>
    %c1_28 = arith.constant 1 : index
    %c1_29 = arith.constant 1 : index
    %c0_30 = arith.constant 0 : index
    %c0_31 = arith.constant 0 : index
    %25 = vector.load %arg2[%c1_28, %c1_29, %c0_30, %c0_31] : memref<3x3x32x3xf32, #tpu.memory_space<vmem>>, vector<1x1x32x3xf32>
    %26 = vector.shape_cast %25 : vector<1x1x32x3xf32> to vector<32x3xf32>
    %c0_32 = arith.constant 0 : index
    %c0_33 = arith.constant 0 : index
    %c17 = arith.constant 17 : index
    %27 = vector.load %arg1[%c0_32, %c0_33, %c17] : memref<1x3x256xf32, #tpu.memory_space<vmem>>, vector<1x3x222xf32>
    %28 = vector.shape_cast %27 : vector<1x3x222xf32> to vector<3x222xf32>
    %cst_34 = arith.constant dense<0.000000e+00> : vector<32x222xf32>
    %29 = tpu.matmul %26, %28, %cst_34 {dimension_numbers = #tpu.dot_dimension_numbers<[1], [0], [0], [1], [0, 0, 1, 1], [], []>} : vector<32x3xf32>, vector<3x222xf32>, vector<32x222xf32> -> vector<32x222xf32>
    %30 = arith.addf %24, %29 : vector<32x222xf32>
    %c1_35 = arith.constant 1 : index
    %c2_36 = arith.constant 2 : index
    %c0_37 = arith.constant 0 : index
    %c0_38 = arith.constant 0 : index
    %31 = vector.load %arg2[%c1_35, %c2_36, %c0_37, %c0_38] : memref<3x3x32x3xf32, #tpu.memory_space<vmem>>, vector<1x1x32x3xf32>
    %32 = vector.shape_cast %31 : vector<1x1x32x3xf32> to vector<32x3xf32>
    %c0_39 = arith.constant 0 : index
    %c0_40 = arith.constant 0 : index
    %c18 = arith.constant 18 : index
    %33 = vector.load %arg1[%c0_39, %c0_40, %c18] : memref<1x3x256xf32, #tpu.memory_space<vmem>>, vector<1x3x222xf32>
    %34 = vector.shape_cast %33 : vector<1x3x222xf32> to vector<3x222xf32>
    %cst_41 = arith.constant dense<0.000000e+00> : vector<32x222xf32>
    %35 = tpu.matmul %32, %34, %cst_41 {dimension_numbers = #tpu.dot_dimension_numbers<[1], [0], [0], [1], [0, 0, 1, 1], [], []>} : vector<32x3xf32>, vector<3x222xf32>, vector<32x222xf32> -> vector<32x222xf32>
    %36 = arith.addf %30, %35 : vector<32x222xf32>
    %c2_42 = arith.constant 2 : index
    %c0_43 = arith.constant 0 : index
    %c0_44 = arith.constant 0 : index
    %c0_45 = arith.constant 0 : index
    %37 = vector.load %arg2[%c2_42, %c0_43, %c0_44, %c0_45] : memref<3x3x32x3xf32, #tpu.memory_space<vmem>>, vector<1x1x32x3xf32>
    %38 = vector.shape_cast %37 : vector<1x1x32x3xf32> to vector<32x3xf32>
    %c0_46 = arith.constant 0 : index
    %c0_47 = arith.constant 0 : index
    %c32 = arith.constant 32 : index
    %39 = vector.load %arg1[%c0_46, %c0_47, %c32] : memref<1x3x256xf32, #tpu.memory_space<vmem>>, vector<1x3x222xf32>
    %40 = vector.shape_cast %39 : vector<1x3x222xf32> to vector<3x222xf32>
    %cst_48 = arith.constant dense<0.000000e+00> : vector<32x222xf32>
    %41 = tpu.matmul %38, %40, %cst_48 {dimension_numbers = #tpu.dot_dimension_numbers<[1], [0], [0], [1], [0, 0, 1, 1], [], []>} : vector<32x3xf32>, vector<3x222xf32>, vector<32x222xf32> -> vector<32x222xf32>
    %42 = arith.addf %36, %41 : vector<32x222xf32>
    %c2_49 = arith.constant 2 : index
    %c1_50 = arith.constant 1 : index
    %c0_51 = arith.constant 0 : index
    %c0_52 = arith.constant 0 : index
    %43 = vector.load %arg2[%c2_49, %c1_50, %c0_51, %c0_52] : memref<3x3x32x3xf32, #tpu.memory_space<vmem>>, vector<1x1x32x3xf32>
    %44 = vector.shape_cast %43 : vector<1x1x32x3xf32> to vector<32x3xf32>
    %c0_53 = arith.constant 0 : index
    %c0_54 = arith.constant 0 : index
    %c33 = arith.constant 33 : index
    %45 = vector.load %arg1[%c0_53, %c0_54, %c33] : memref<1x3x256xf32, #tpu.memory_space<vmem>>, vector<1x3x222xf32>
    %46 = vector.shape_cast %45 : vector<1x3x222xf32> to vector<3x222xf32>
    %cst_55 = arith.constant dense<0.000000e+00> : vector<32x222xf32>
    %47 = tpu.matmul %44, %46, %cst_55 {dimension_numbers = #tpu.dot_dimension_numbers<[1], [0], [0], [1], [0, 0, 1, 1], [], []>} : vector<32x3xf32>, vector<3x222xf32>, vector<32x222xf32> -> vector<32x222xf32>
    %48 = arith.addf %42, %47 : vector<32x222xf32>
    %c2_56 = arith.constant 2 : index
    %c2_57 = arith.constant 2 : index
    %c0_58 = arith.constant 0 : index
    %c0_59 = arith.constant 0 : index
    %49 = vector.load %arg2[%c2_56, %c2_57, %c0_58, %c0_59] : memref<3x3x32x3xf32, #tpu.memory_space<vmem>>, vector<1x1x32x3xf32>
    %50 = vector.shape_cast %49 : vector<1x1x32x3xf32> to vector<32x3xf32>
    %c0_60 = arith.constant 0 : index
    %c0_61 = arith.constant 0 : index
    %c34 = arith.constant 34 : index
    %51 = vector.load %arg1[%c0_60, %c0_61, %c34] : memref<1x3x256xf32, #tpu.memory_space<vmem>>, vector<1x3x222xf32>
    %52 = vector.shape_cast %51 : vector<1x3x222xf32> to vector<3x222xf32>
    %cst_62 = arith.constant dense<0.000000e+00> : vector<32x222xf32>
    %53 = tpu.matmul %50, %52, %cst_62 {dimension_numbers = #tpu.dot_dimension_numbers<[1], [0], [0], [1], [0, 0, 1, 1], [], []>} : vector<32x3xf32>, vector<3x222xf32>, vector<32x222xf32> -> vector<32x222xf32>
    %54 = arith.addf %48, %53 : vector<32x222xf32>
    %c0_63 = arith.constant 0 : index
    %c0_64 = arith.constant 0 : index
    %55 = vector.load %arg3[%c0_63, %c0_64] : memref<32x1xf32, #tpu.memory_space<vmem>>, vector<32x1xf32>
    %56 = vector.broadcast %55 : vector<32x1xf32> to vector<32x222xf32>
    %57 = arith.addf %54, %56 : vector<32x222xf32>
    %cst_65 = arith.constant 0.000000e+00 : f32
    %58 = vector.broadcast %cst_65 : f32 to vector<32x222xf32>
    %59 = arith.maximumf %57, %58 : vector<32x222xf32>
    %c0_66 = arith.constant 0 : index
    %c0_67 = arith.constant 0 : index
    %60 = vector.load %arg9[%c0_66, %c0_67] : memref<32x222xf32, #tpu.memory_space<vmem>>, vector<32x222xf32>
    tpu.vector_store %arg9[%c0_66, %c0_67], %59 {strides = array<i32>} : memref<32x222xf32, #tpu.memory_space<vmem>>, vector<32x222xf32>,
    %cst_68 = arith.constant 0.000000e+00 : f32
    %61 = vector.broadcast %cst_68 : f32 to vector<32x188xf32>
    %c0_69 = arith.constant 0 : index
    %c0_70 = arith.constant 0 : index
    %c0_71 = arith.constant 0 : index
    %c0_72 = arith.constant 0 : index
    %62 = vector.load %arg4[%c0_69, %c0_70, %c0_71, %c0_72] : memref<3x3x32x32xf32, #tpu.memory_space<vmem>>, vector<1x1x32x32xf32>
    %63 = vector.shape_cast %62 : vector<1x1x32x32xf32> to vector<32x32xf32>
    %c0_73 = arith.constant 0 : index
    %c0_74 = arith.constant 0 : index
    %64 = vector.load %arg9[%c0_73, %c0_74] : memref<32x222xf32, #tpu.memory_space<vmem>>, vector<32x188xf32>
    %cst_75 = arith.constant dense<0.000000e+00> : vector<32x188xf32>
    %65 = tpu.matmul %63, %64, %cst_75 {dimension_numbers = #tpu.dot_dimension_numbers<[1], [0], [0], [1], [0, 0, 1, 1], [], []>} : vector<32x32xf32>, vector<32x188xf32>, vector<32x188xf32> -> vector<32x188xf32>
    %66 = arith.addf %61, %65 : vector<32x188xf32>
    %c0_76 = arith.constant 0 : index
    %c1_77 = arith.constant 1 : index
    %c0_78 = arith.constant 0 : index
    %c0_79 = arith.constant 0 : index
    %67 = vector.load %arg4[%c0_76, %c1_77, %c0_78, %c0_79] : memref<3x3x32x32xf32, #tpu.memory_space<vmem>>, vector<1x1x32x32xf32>
    %68 = vector.shape_cast %67 : vector<1x1x32x32xf32> to vector<32x32xf32>
    %c0_80 = arith.constant 0 : index
    %c1_81 = arith.constant 1 : index
    %69 = vector.load %arg9[%c0_80, %c1_81] : memref<32x222xf32, #tpu.memory_space<vmem>>, vector<32x188xf32>
    %cst_82 = arith.constant dense<0.000000e+00> : vector<32x188xf32>
    %70 = tpu.matmul %68, %69, %cst_82 {dimension_numbers = #tpu.dot_dimension_numbers<[1], [0], [0], [1], [0, 0, 1, 1], [], []>} : vector<32x32xf32>, vector<32x188xf32>, vector<32x188xf32> -> vector<32x188xf32>
    %71 = arith.addf %66, %70 : vector<32x188xf32>
    %c0_83 = arith.constant 0 : index
    %c2_84 = arith.constant 2 : index
    %c0_85 = arith.constant 0 : index
    %c0_86 = arith.constant 0 : index
    %72 = vector.load %arg4[%c0_83, %c2_84, %c0_85, %c0_86] : memref<3x3x32x32xf32, #tpu.memory_space<vmem>>, vector<1x1x32x32xf32>
    %73 = vector.shape_cast %72 : vector<1x1x32x32xf32> to vector<32x32xf32>
    %c0_87 = arith.constant 0 : index
    %c2_88 = arith.constant 2 : index
    %74 = vector.load %arg9[%c0_87, %c2_88] : memref<32x222xf32, #tpu.memory_space<vmem>>, vector<32x188xf32>
    %cst_89 = arith.constant dense<0.000000e+00> : vector<32x188xf32>
    %75 = tpu.matmul %73, %74, %cst_89 {dimension_numbers = #tpu.dot_dimension_numbers<[1], [0], [0], [1], [0, 0, 1, 1], [], []>} : vector<32x32xf32>, vector<32x188xf32>, vector<32x188xf32> -> vector<32x188xf32>
    %76 = arith.addf %71, %75 : vector<32x188xf32>
    %c1_90 = arith.constant 1 : index
    %c0_91 = arith.constant 0 : index
    %c0_92 = arith.constant 0 : index
    %c0_93 = arith.constant 0 : index
    %77 = vector.load %arg4[%c1_90, %c0_91, %c0_92, %c0_93] : memref<3x3x32x32xf32, #tpu.memory_space<vmem>>, vector<1x1x32x32xf32>
    %78 = vector.shape_cast %77 : vector<1x1x32x32xf32> to vector<32x32xf32>
    %c0_94 = arith.constant 0 : index
    %c16_95 = arith.constant 16 : index
    %79 = vector.load %arg9[%c0_94, %c16_95] : memref<32x222xf32, #tpu.memory_space<vmem>>, vector<32x188xf32>
    %cst_96 = arith.constant dense<0.000000e+00> : vector<32x188xf32>
    %80 = tpu.matmul %78, %79, %cst_96 {dimension_numbers = #tpu.dot_dimension_numbers<[1], [0], [0], [1], [0, 0, 1, 1], [], []>} : vector<32x32xf32>, vector<32x188xf32>, vector<32x188xf32> -> vector<32x188xf32>
    %81 = arith.addf %76, %80 : vector<32x188xf32>
    %c1_97 = arith.constant 1 : index
    %c1_98 = arith.constant 1 : index
    %c0_99 = arith.constant 0 : index
    %c0_100 = arith.constant 0 : index
    %82 = vector.load %arg4[%c1_97, %c1_98, %c0_99, %c0_100] : memref<3x3x32x32xf32, #tpu.memory_space<vmem>>, vector<1x1x32x32xf32>
    %83 = vector.shape_cast %82 : vector<1x1x32x32xf32> to vector<32x32xf32>
    %c0_101 = arith.constant 0 : index
    %c17_102 = arith.constant 17 : index
    %84 = vector.load %arg9[%c0_101, %c17_102] : memref<32x222xf32, #tpu.memory_space<vmem>>, vector<32x188xf32>
    %cst_103 = arith.constant dense<0.000000e+00> : vector<32x188xf32>
    %85 = tpu.matmul %83, %84, %cst_103 {dimension_numbers = #tpu.dot_dimension_numbers<[1], [0], [0], [1], [0, 0, 1, 1], [], []>} : vector<32x32xf32>, vector<32x188xf32>, vector<32x188xf32> -> vector<32x188xf32>
    %86 = arith.addf %81, %85 : vector<32x188xf32>
    %c1_104 = arith.constant 1 : index
    %c2_105 = arith.constant 2 : index
    %c0_106 = arith.constant 0 : index
    %c0_107 = arith.constant 0 : index
    %87 = vector.load %arg4[%c1_104, %c2_105, %c0_106, %c0_107] : memref<3x3x32x32xf32, #tpu.memory_space<vmem>>, vector<1x1x32x32xf32>
    %88 = vector.shape_cast %87 : vector<1x1x32x32xf32> to vector<32x32xf32>
    %c0_108 = arith.constant 0 : index
    %c18_109 = arith.constant 18 : index
    %89 = vector.load %arg9[%c0_108, %c18_109] : memref<32x222xf32, #tpu.memory_space<vmem>>, vector<32x188xf32>
    %cst_110 = arith.constant dense<0.000000e+00> : vector<32x188xf32>
    %90 = tpu.matmul %88, %89, %cst_110 {dimension_numbers = #tpu.dot_dimension_numbers<[1], [0], [0], [1], [0, 0, 1, 1], [], []>} : vector<32x32xf32>, vector<32x188xf32>, vector<32x188xf32> -> vector<32x188xf32>
    %91 = arith.addf %86, %90 : vector<32x188xf32>
    %c2_111 = arith.constant 2 : index
    %c0_112 = arith.constant 0 : index
    %c0_113 = arith.constant 0 : index
    %c0_114 = arith.constant 0 : index
    %92 = vector.load %arg4[%c2_111, %c0_112, %c0_113, %c0_114] : memref<3x3x32x32xf32, #tpu.memory_space<vmem>>, vector<1x1x32x32xf32>
    %93 = vector.shape_cast %92 : vector<1x1x32x32xf32> to vector<32x32xf32>
    %c0_115 = arith.constant 0 : index
    %c32_116 = arith.constant 32 : index
    %94 = vector.load %arg9[%c0_115, %c32_116] : memref<32x222xf32, #tpu.memory_space<vmem>>, vector<32x188xf32>
    %cst_117 = arith.constant dense<0.000000e+00> : vector<32x188xf32>
    %95 = tpu.matmul %93, %94, %cst_117 {dimension_numbers = #tpu.dot_dimension_numbers<[1], [0], [0], [1], [0, 0, 1, 1], [], []>} : vector<32x32xf32>, vector<32x188xf32>, vector<32x188xf32> -> vector<32x188xf32>
    %96 = arith.addf %91, %95 : vector<32x188xf32>
    %c2_118 = arith.constant 2 : index
    %c1_119 = arith.constant 1 : index
    %c0_120 = arith.constant 0 : index
    %c0_121 = arith.constant 0 : index
    %97 = vector.load %arg4[%c2_118, %c1_119, %c0_120, %c0_121] : memref<3x3x32x32xf32, #tpu.memory_space<vmem>>, vector<1x1x32x32xf32>
    %98 = vector.shape_cast %97 : vector<1x1x32x32xf32> to vector<32x32xf32>
    %c0_122 = arith.constant 0 : index
    %c33_123 = arith.constant 33 : index
    %99 = vector.load %arg9[%c0_122, %c33_123] : memref<32x222xf32, #tpu.memory_space<vmem>>, vector<32x188xf32>
    %cst_124 = arith.constant dense<0.000000e+00> : vector<32x188xf32>
    %100 = tpu.matmul %98, %99, %cst_124 {dimension_numbers = #tpu.dot_dimension_numbers<[1], [0], [0], [1], [0, 0, 1, 1], [], []>} : vector<32x32xf32>, vector<32x188xf32>, vector<32x188xf32> -> vector<32x188xf32>
    %101 = arith.addf %96, %100 : vector<32x188xf32>
    %c2_125 = arith.constant 2 : index
    %c2_126 = arith.constant 2 : index
    %c0_127 = arith.constant 0 : index
    %c0_128 = arith.constant 0 : index
    %102 = vector.load %arg4[%c2_125, %c2_126, %c0_127, %c0_128] : memref<3x3x32x32xf32, #tpu.memory_space<vmem>>, vector<1x1x32x32xf32>
    %103 = vector.shape_cast %102 : vector<1x1x32x32xf32> to vector<32x32xf32>
    %c0_129 = arith.constant 0 : index
    %c34_130 = arith.constant 34 : index
    %104 = vector.load %arg9[%c0_129, %c34_130] : memref<32x222xf32, #tpu.memory_space<vmem>>, vector<32x188xf32>
    %cst_131 = arith.constant dense<0.000000e+00> : vector<32x188xf32>
    %105 = tpu.matmul %103, %104, %cst_131 {dimension_numbers = #tpu.dot_dimension_numbers<[1], [0], [0], [1], [0, 0, 1, 1], [], []>} : vector<32x32xf32>, vector<32x188xf32>, vector<32x188xf32> -> vector<32x188xf32>
    %106 = arith.addf %101, %105 : vector<32x188xf32>
    %c0_132 = arith.constant 0 : index
    %c0_133 = arith.constant 0 : index
    %107 = vector.load %arg5[%c0_132, %c0_133] : memref<32x1xf32, #tpu.memory_space<vmem>>, vector<32x1xf32>
    %108 = vector.broadcast %107 : vector<32x1xf32> to vector<32x188xf32>
    %109 = arith.addf %106, %108 : vector<32x188xf32>
    %cst_134 = arith.constant 0.000000e+00 : f32
    %110 = vector.broadcast %cst_134 : f32 to vector<32x188xf32>
    %111 = arith.maximumf %109, %110 : vector<32x188xf32>
    %c0_135 = arith.constant 0 : index
    %c0_136 = arith.constant 0 : index
    %112 = vector.load %arg10[%c0_135, %c0_136] : memref<32x188xf32, #tpu.memory_space<vmem>>, vector<32x188xf32>
    tpu.vector_store %arg10[%c0_135, %c0_136], %111 {strides = array<i32>} : memref<32x188xf32, #tpu.memory_space<vmem>>, vector<32x188xf32>,
    %cst_137 = arith.constant 0.000000e+00 : f32
    %113 = vector.broadcast %cst_137 : f32 to vector<32x154xf32>
    %c0_138 = arith.constant 0 : index
    %c0_139 = arith.constant 0 : index
    %c0_140 = arith.constant 0 : index
    %c0_141 = arith.constant 0 : index
    %114 = vector.load %arg6[%c0_138, %c0_139, %c0_140, %c0_141] : memref<3x3x32x32xf32, #tpu.memory_space<vmem>>, vector<1x1x32x32xf32>
    %115 = vector.shape_cast %114 : vector<1x1x32x32xf32> to vector<32x32xf32>
    %c0_142 = arith.constant 0 : index
    %c0_143 = arith.constant 0 : index
    %116 = vector.load %arg10[%c0_142, %c0_143] : memref<32x188xf32, #tpu.memory_space<vmem>>, vector<32x154xf32>
    %cst_144 = arith.constant dense<0.000000e+00> : vector<32x154xf32>
    %117 = tpu.matmul %115, %116, %cst_144 {dimension_numbers = #tpu.dot_dimension_numbers<[1], [0], [0], [1], [0, 0, 1, 1], [], []>} : vector<32x32xf32>, vector<32x154xf32>, vector<32x154xf32> -> vector<32x154xf32>
    %118 = arith.addf %113, %117 : vector<32x154xf32>
    %c0_145 = arith.constant 0 : index
    %c1_146 = arith.constant 1 : index
    %c0_147 = arith.constant 0 : index
    %c0_148 = arith.constant 0 : index
    %119 = vector.load %arg6[%c0_145, %c1_146, %c0_147, %c0_148] : memref<3x3x32x32xf32, #tpu.memory_space<vmem>>, vector<1x1x32x32xf32>
    %120 = vector.shape_cast %119 : vector<1x1x32x32xf32> to vector<32x32xf32>
    %c0_149 = arith.constant 0 : index
    %c1_150 = arith.constant 1 : index
    %121 = vector.load %arg10[%c0_149, %c1_150] : memref<32x188xf32, #tpu.memory_space<vmem>>, vector<32x154xf32>
    %cst_151 = arith.constant dense<0.000000e+00> : vector<32x154xf32>
    %122 = tpu.matmul %120, %121, %cst_151 {dimension_numbers = #tpu.dot_dimension_numbers<[1], [0], [0], [1], [0, 0, 1, 1], [], []>} : vector<32x32xf32>, vector<32x154xf32>, vector<32x154xf32> -> vector<32x154xf32>
    %123 = arith.addf %118, %122 : vector<32x154xf32>
    %c0_152 = arith.constant 0 : index
    %c2_153 = arith.constant 2 : index
    %c0_154 = arith.constant 0 : index
    %c0_155 = arith.constant 0 : index
    %124 = vector.load %arg6[%c0_152, %c2_153, %c0_154, %c0_155] : memref<3x3x32x32xf32, #tpu.memory_space<vmem>>, vector<1x1x32x32xf32>
    %125 = vector.shape_cast %124 : vector<1x1x32x32xf32> to vector<32x32xf32>
    %c0_156 = arith.constant 0 : index
    %c2_157 = arith.constant 2 : index
    %126 = vector.load %arg10[%c0_156, %c2_157] : memref<32x188xf32, #tpu.memory_space<vmem>>, vector<32x154xf32>
    %cst_158 = arith.constant dense<0.000000e+00> : vector<32x154xf32>
    %127 = tpu.matmul %125, %126, %cst_158 {dimension_numbers = #tpu.dot_dimension_numbers<[1], [0], [0], [1], [0, 0, 1, 1], [], []>} : vector<32x32xf32>, vector<32x154xf32>, vector<32x154xf32> -> vector<32x154xf32>
    %128 = arith.addf %123, %127 : vector<32x154xf32>
    %c1_159 = arith.constant 1 : index
    %c0_160 = arith.constant 0 : index
    %c0_161 = arith.constant 0 : index
    %c0_162 = arith.constant 0 : index
    %129 = vector.load %arg6[%c1_159, %c0_160, %c0_161, %c0_162] : memref<3x3x32x32xf32, #tpu.memory_space<vmem>>, vector<1x1x32x32xf32>
    %130 = vector.shape_cast %129 : vector<1x1x32x32xf32> to vector<32x32xf32>
    %c0_163 = arith.constant 0 : index
    %c16_164 = arith.constant 16 : index
    %131 = vector.load %arg10[%c0_163, %c16_164] : memref<32x188xf32, #tpu.memory_space<vmem>>, vector<32x154xf32>
    %cst_165 = arith.constant dense<0.000000e+00> : vector<32x154xf32>
    %132 = tpu.matmul %130, %131, %cst_165 {dimension_numbers = #tpu.dot_dimension_numbers<[1], [0], [0], [1], [0, 0, 1, 1], [], []>} : vector<32x32xf32>, vector<32x154xf32>, vector<32x154xf32> -> vector<32x154xf32>
    %133 = arith.addf %128, %132 : vector<32x154xf32>
    %c1_166 = arith.constant 1 : index
    %c1_167 = arith.constant 1 : index
    %c0_168 = arith.constant 0 : index
    %c0_169 = arith.constant 0 : index
    %134 = vector.load %arg6[%c1_166, %c1_167, %c0_168, %c0_169] : memref<3x3x32x32xf32, #tpu.memory_space<vmem>>, vector<1x1x32x32xf32>
    %135 = vector.shape_cast %134 : vector<1x1x32x32xf32> to vector<32x32xf32>
    %c0_170 = arith.constant 0 : index
    %c17_171 = arith.constant 17 : index
    %136 = vector.load %arg10[%c0_170, %c17_171] : memref<32x188xf32, #tpu.memory_space<vmem>>, vector<32x154xf32>
    %cst_172 = arith.constant dense<0.000000e+00> : vector<32x154xf32>
    %137 = tpu.matmul %135, %136, %cst_172 {dimension_numbers = #tpu.dot_dimension_numbers<[1], [0], [0], [1], [0, 0, 1, 1], [], []>} : vector<32x32xf32>, vector<32x154xf32>, vector<32x154xf32> -> vector<32x154xf32>
    %138 = arith.addf %133, %137 : vector<32x154xf32>
    %c1_173 = arith.constant 1 : index
    %c2_174 = arith.constant 2 : index
    %c0_175 = arith.constant 0 : index
    %c0_176 = arith.constant 0 : index
    %139 = vector.load %arg6[%c1_173, %c2_174, %c0_175, %c0_176] : memref<3x3x32x32xf32, #tpu.memory_space<vmem>>, vector<1x1x32x32xf32>
    %140 = vector.shape_cast %139 : vector<1x1x32x32xf32> to vector<32x32xf32>
    %c0_177 = arith.constant 0 : index
    %c18_178 = arith.constant 18 : index
    %141 = vector.load %arg10[%c0_177, %c18_178] : memref<32x188xf32, #tpu.memory_space<vmem>>, vector<32x154xf32>
    %cst_179 = arith.constant dense<0.000000e+00> : vector<32x154xf32>
    %142 = tpu.matmul %140, %141, %cst_179 {dimension_numbers = #tpu.dot_dimension_numbers<[1], [0], [0], [1], [0, 0, 1, 1], [], []>} : vector<32x32xf32>, vector<32x154xf32>, vector<32x154xf32> -> vector<32x154xf32>
    %143 = arith.addf %138, %142 : vector<32x154xf32>
    %c2_180 = arith.constant 2 : index
    %c0_181 = arith.constant 0 : index
    %c0_182 = arith.constant 0 : index
    %c0_183 = arith.constant 0 : index
    %144 = vector.load %arg6[%c2_180, %c0_181, %c0_182, %c0_183] : memref<3x3x32x32xf32, #tpu.memory_space<vmem>>, vector<1x1x32x32xf32>
    %145 = vector.shape_cast %144 : vector<1x1x32x32xf32> to vector<32x32xf32>
    %c0_184 = arith.constant 0 : index
    %c32_185 = arith.constant 32 : index
    %146 = vector.load %arg10[%c0_184, %c32_185] : memref<32x188xf32, #tpu.memory_space<vmem>>, vector<32x154xf32>
    %cst_186 = arith.constant dense<0.000000e+00> : vector<32x154xf32>
    %147 = tpu.matmul %145, %146, %cst_186 {dimension_numbers = #tpu.dot_dimension_numbers<[1], [0], [0], [1], [0, 0, 1, 1], [], []>} : vector<32x32xf32>, vector<32x154xf32>, vector<32x154xf32> -> vector<32x154xf32>
    %148 = arith.addf %143, %147 : vector<32x154xf32>
    %c2_187 = arith.constant 2 : index
    %c1_188 = arith.constant 1 : index
    %c0_189 = arith.constant 0 : index
    %c0_190 = arith.constant 0 : index
    %149 = vector.load %arg6[%c2_187, %c1_188, %c0_189, %c0_190] : memref<3x3x32x32xf32, #tpu.memory_space<vmem>>, vector<1x1x32x32xf32>
    %150 = vector.shape_cast %149 : vector<1x1x32x32xf32> to vector<32x32xf32>
    %c0_191 = arith.constant 0 : index
    %c33_192 = arith.constant 33 : index
    %151 = vector.load %arg10[%c0_191, %c33_192] : memref<32x188xf32, #tpu.memory_space<vmem>>, vector<32x154xf32>
    %cst_193 = arith.constant dense<0.000000e+00> : vector<32x154xf32>
    %152 = tpu.matmul %150, %151, %cst_193 {dimension_numbers = #tpu.dot_dimension_numbers<[1], [0], [0], [1], [0, 0, 1, 1], [], []>} : vector<32x32xf32>, vector<32x154xf32>, vector<32x154xf32> -> vector<32x154xf32>
    %153 = arith.addf %148, %152 : vector<32x154xf32>
    %c2_194 = arith.constant 2 : index
    %c2_195 = arith.constant 2 : index
    %c0_196 = arith.constant 0 : index
    %c0_197 = arith.constant 0 : index
    %154 = vector.load %arg6[%c2_194, %c2_195, %c0_196, %c0_197] : memref<3x3x32x32xf32, #tpu.memory_space<vmem>>, vector<1x1x32x32xf32>
    %155 = vector.shape_cast %154 : vector<1x1x32x32xf32> to vector<32x32xf32>
    %c0_198 = arith.constant 0 : index
    %c34_199 = arith.constant 34 : index
    %156 = vector.load %arg10[%c0_198, %c34_199] : memref<32x188xf32, #tpu.memory_space<vmem>>, vector<32x154xf32>
    %cst_200 = arith.constant dense<0.000000e+00> : vector<32x154xf32>
    %157 = tpu.matmul %155, %156, %cst_200 {dimension_numbers = #tpu.dot_dimension_numbers<[1], [0], [0], [1], [0, 0, 1, 1], [], []>} : vector<32x32xf32>, vector<32x154xf32>, vector<32x154xf32> -> vector<32x154xf32>
    %158 = arith.addf %153, %157 : vector<32x154xf32>
    %c0_201 = arith.constant 0 : index
    %c0_202 = arith.constant 0 : index
    %159 = vector.load %arg7[%c0_201, %c0_202] : memref<32x1xf32, #tpu.memory_space<vmem>>, vector<32x1xf32>
    %160 = vector.broadcast %159 : vector<32x1xf32> to vector<32x154xf32>
    %161 = arith.addf %158, %160 : vector<32x154xf32>
    %cst_203 = arith.constant 0.000000e+00 : f32
    %162 = vector.broadcast %cst_203 : f32 to vector<32x154xf32>
    %163 = arith.maximumf %161, %162 : vector<32x154xf32>
    %164 = vector.extract_strided_slice %163 {offsets = [0, 0], sizes = [32, 10], strides = [1, 1]} : vector<32x154xf32> to vector<32x10xf32>
    %c0_204 = arith.constant 0 : index
    %c0_205 = arith.constant 0 : index
    %c0_206 = arith.constant 0 : index
    %165 = vector.load %arg8[%c0_204, %c0_205, %c0_206] : memref<1x32x100xf32, #tpu.memory_space<vmem>>, vector<1x32x10xf32>
    %166 = vector.shape_cast %165 : vector<1x32x10xf32> to vector<32x10xf32>
    %167 = vector.shape_cast %164 : vector<32x10xf32> to vector<1x32x10xf32>
    tpu.vector_store %arg8[%c0_204, %c0_205, %c0_206], %167 {strides = array<i32>} : memref<1x32x100xf32, #tpu.memory_space<vmem>>, vector<1x32x10xf32>,
    %168 = vector.extract_strided_slice %163 {offsets = [0, 16], sizes = [32, 10], strides = [1, 1]} : vector<32x154xf32> to vector<32x10xf32>
    %c0_207 = arith.constant 0 : index
    %c0_208 = arith.constant 0 : index
    %c10 = arith.constant 10 : index
    %169 = vector.load %arg8[%c0_207, %c0_208, %c10] : memref<1x32x100xf32, #tpu.memory_space<vmem>>, vector<1x32x10xf32>
    %170 = vector.shape_cast %169 : vector<1x32x10xf32> to vector<32x10xf32>
    %171 = vector.shape_cast %168 : vector<32x10xf32> to vector<1x32x10xf32>
    tpu.vector_store %arg8[%c0_207, %c0_208, %c10], %171 {strides = array<i32>} : memref<1x32x100xf32, #tpu.memory_space<vmem>>, vector<1x32x10xf32>,
    %172 = vector.extract_strided_slice %163 {offsets = [0, 32], sizes = [32, 10], strides = [1, 1]} : vector<32x154xf32> to vector<32x10xf32>
    %c0_209 = arith.constant 0 : index
    %c0_210 = arith.constant 0 : index
    %c20 = arith.constant 20 : index
    %173 = vector.load %arg8[%c0_209, %c0_210, %c20] : memref<1x32x100xf32, #tpu.memory_space<vmem>>, vector<1x32x10xf32>
    %174 = vector.shape_cast %173 : vector<1x32x10xf32> to vector<32x10xf32>
    %175 = vector.shape_cast %172 : vector<32x10xf32> to vector<1x32x10xf32>
    tpu.vector_store %arg8[%c0_209, %c0_210, %c20], %175 {strides = array<i32>} : memref<1x32x100xf32, #tpu.memory_space<vmem>>, vector<1x32x10xf32>,
    %176 = vector.extract_strided_slice %163 {offsets = [0, 48], sizes = [32, 10], strides = [1, 1]} : vector<32x154xf32> to vector<32x10xf32>
    %c0_211 = arith.constant 0 : index
    %c0_212 = arith.constant 0 : index
    %c30 = arith.constant 30 : index
    %177 = vector.load %arg8[%c0_211, %c0_212, %c30] : memref<1x32x100xf32, #tpu.memory_space<vmem>>, vector<1x32x10xf32>
    %178 = vector.shape_cast %177 : vector<1x32x10xf32> to vector<32x10xf32>
    %179 = vector.shape_cast %176 : vector<32x10xf32> to vector<1x32x10xf32>
    tpu.vector_store %arg8[%c0_211, %c0_212, %c30], %179 {strides = array<i32>} : memref<1x32x100xf32, #tpu.memory_space<vmem>>, vector<1x32x10xf32>,
    %180 = vector.extract_strided_slice %163 {offsets = [0, 64], sizes = [32, 10], strides = [1, 1]} : vector<32x154xf32> to vector<32x10xf32>
    %c0_213 = arith.constant 0 : index
    %c0_214 = arith.constant 0 : index
    %c40 = arith.constant 40 : index
    %181 = vector.load %arg8[%c0_213, %c0_214, %c40] : memref<1x32x100xf32, #tpu.memory_space<vmem>>, vector<1x32x10xf32>
    %182 = vector.shape_cast %181 : vector<1x32x10xf32> to vector<32x10xf32>
    %183 = vector.shape_cast %180 : vector<32x10xf32> to vector<1x32x10xf32>
    tpu.vector_store %arg8[%c0_213, %c0_214, %c40], %183 {strides = array<i32>} : memref<1x32x100xf32, #tpu.memory_space<vmem>>, vector<1x32x10xf32>,
    %184 = vector.extract_strided_slice %163 {offsets = [0, 80], sizes = [32, 10], strides = [1, 1]} : vector<32x154xf32> to vector<32x10xf32>
    %c0_215 = arith.constant 0 : index
    %c0_216 = arith.constant 0 : index
    %c50 = arith.constant 50 : index
    %185 = vector.load %arg8[%c0_215, %c0_216, %c50] : memref<1x32x100xf32, #tpu.memory_space<vmem>>, vector<1x32x10xf32>
    %186 = vector.shape_cast %185 : vector<1x32x10xf32> to vector<32x10xf32>
    %187 = vector.shape_cast %184 : vector<32x10xf32> to vector<1x32x10xf32>
    tpu.vector_store %arg8[%c0_215, %c0_216, %c50], %187 {strides = array<i32>} : memref<1x32x100xf32, #tpu.memory_space<vmem>>, vector<1x32x10xf32>,
    %188 = vector.extract_strided_slice %163 {offsets = [0, 96], sizes = [32, 10], strides = [1, 1]} : vector<32x154xf32> to vector<32x10xf32>
    %c0_217 = arith.constant 0 : index
    %c0_218 = arith.constant 0 : index
    %c60 = arith.constant 60 : index
    %189 = vector.load %arg8[%c0_217, %c0_218, %c60] : memref<1x32x100xf32, #tpu.memory_space<vmem>>, vector<1x32x10xf32>
    %190 = vector.shape_cast %189 : vector<1x32x10xf32> to vector<32x10xf32>
    %191 = vector.shape_cast %188 : vector<32x10xf32> to vector<1x32x10xf32>
    tpu.vector_store %arg8[%c0_217, %c0_218, %c60], %191 {strides = array<i32>} : memref<1x32x100xf32, #tpu.memory_space<vmem>>, vector<1x32x10xf32>,
    %192 = vector.extract_strided_slice %163 {offsets = [0, 112], sizes = [32, 10], strides = [1, 1]} : vector<32x154xf32> to vector<32x10xf32>
    %c0_219 = arith.constant 0 : index
    %c0_220 = arith.constant 0 : index
    %c70 = arith.constant 70 : index
    %193 = vector.load %arg8[%c0_219, %c0_220, %c70] : memref<1x32x100xf32, #tpu.memory_space<vmem>>, vector<1x32x10xf32>
    %194 = vector.shape_cast %193 : vector<1x32x10xf32> to vector<32x10xf32>
    %195 = vector.shape_cast %192 : vector<32x10xf32> to vector<1x32x10xf32>
    tpu.vector_store %arg8[%c0_219, %c0_220, %c70], %195 {strides = array<i32>} : memref<1x32x100xf32, #tpu.memory_space<vmem>>, vector<1x32x10xf32>,
    %196 = vector.extract_strided_slice %163 {offsets = [0, 128], sizes = [32, 10], strides = [1, 1]} : vector<32x154xf32> to vector<32x10xf32>
    %c0_221 = arith.constant 0 : index
    %c0_222 = arith.constant 0 : index
    %c80 = arith.constant 80 : index
    %197 = vector.load %arg8[%c0_221, %c0_222, %c80] : memref<1x32x100xf32, #tpu.memory_space<vmem>>, vector<1x32x10xf32>
    %198 = vector.shape_cast %197 : vector<1x32x10xf32> to vector<32x10xf32>
    %199 = vector.shape_cast %196 : vector<32x10xf32> to vector<1x32x10xf32>
    tpu.vector_store %arg8[%c0_221, %c0_222, %c80], %199 {strides = array<i32>} : memref<1x32x100xf32, #tpu.memory_space<vmem>>, vector<1x32x10xf32>,
    %200 = vector.extract_strided_slice %163 {offsets = [0, 144], sizes = [32, 10], strides = [1, 1]} : vector<32x154xf32> to vector<32x10xf32>
    %c0_223 = arith.constant 0 : index
    %c0_224 = arith.constant 0 : index
    %c90 = arith.constant 90 : index
    %201 = vector.load %arg8[%c0_223, %c0_224, %c90] : memref<1x32x100xf32, #tpu.memory_space<vmem>>, vector<1x32x10xf32>
    %202 = vector.shape_cast %201 : vector<1x32x10xf32> to vector<32x10xf32>
    %203 = vector.shape_cast %200 : vector<32x10xf32> to vector<1x32x10xf32>
    tpu.vector_store %arg8[%c0_223, %c0_224, %c90], %203 {strides = array<i32>} : memref<1x32x100xf32, #tpu.memory_space<vmem>>, vector<1x32x10xf32>,
    return
  }
  func.func @transform_0(%arg0: i32) -> (i32, i32, i32) {
    %c0_i32 = arith.constant 0 : i32
    %c0_i32_0 = arith.constant 0 : i32
    %c0_i32_1 = arith.constant 0 : i32
    return %arg0, %c0_i32, %c0_i32_0 : i32, i32, i32
  }
  func.func @transform_1(%arg0: i32) -> (i32, i32, i32, i32) {
    %c0_i32 = arith.constant 0 : i32
    %c0_i32_0 = arith.constant 0 : i32
    %c0_i32_1 = arith.constant 0 : i32
    %c0_i32_2 = arith.constant 0 : i32
    %c0_i32_3 = arith.constant 0 : i32
    return %c0_i32, %c0_i32_0, %c0_i32_1, %c0_i32_2 : i32, i32, i32, i32
  }
  func.func @transform_2(%arg0: i32) -> (i32, i32) {
    %c0_i32 = arith.constant 0 : i32
    %c0_i32_0 = arith.constant 0 : i32
    %c0_i32_1 = arith.constant 0 : i32
    return %c0_i32, %c0_i32_0 : i32, i32
  }
  func.func @transform_3(%arg0: i32) -> (i32, i32, i32, i32) {
    %c0_i32 = arith.constant 0 : i32
    %c0_i32_0 = arith.constant 0 : i32
    %c0_i32_1 = arith.constant 0 : i32
    %c0_i32_2 = arith.constant 0 : i32
    %c0_i32_3 = arith.constant 0 : i32
    return %c0_i32, %c0_i32_0, %c0_i32_1, %c0_i32_2 : i32, i32, i32, i32
  }
  func.func @transform_4(%arg0: i32) -> (i32, i32) {
    %c0_i32 = arith.constant 0 : i32
    %c0_i32_0 = arith.constant 0 : i32
    %c0_i32_1 = arith.constant 0 : i32
    return %c0_i32, %c0_i32_0 : i32, i32
  }
  func.func @transform_5(%arg0: i32) -> (i32, i32, i32, i32) {
    %c0_i32 = arith.constant 0 : i32
    %c0_i32_0 = arith.constant 0 : i32
    %c0_i32_1 = arith.constant 0 : i32
    %c0_i32_2 = arith.constant 0 : i32
    %c0_i32_3 = arith.constant 0 : i32
    return %c0_i32, %c0_i32_0, %c0_i32_1, %c0_i32_2 : i32, i32, i32, i32
  }
  func.func @transform_6(%arg0: i32) -> (i32, i32) {
    %c0_i32 = arith.constant 0 : i32
    %c0_i32_0 = arith.constant 0 : i32
    %c0_i32_1 = arith.constant 0 : i32
    return %c0_i32, %c0_i32_0 : i32, i32
  }
  func.func @transform_7(%arg0: i32) -> (i32, i32, i32) {
    %c0_i32 = arith.constant 0 : i32
    %c0_i32_0 = arith.constant 0 : i32
    %c0_i32_1 = arith.constant 0 : i32
    return %arg0, %c0_i32, %c0_i32_0 : i32, i32, i32
  }
}

</mosaic_0001>

<bundles_post_ra>
// kernel: simple_patch_net_forward.1
= control target key start
LH: loop header
LB: loop body
LE: loop exit
PB: predicated region body
PF: predicated region fallthrough
CT: control target
= control target key end

     0   :  { %12 = vsyncpa [#allocation5], 0  ;;  %s4637_s24 = smov 0   ;;  %s6106_s0 = inlined_call_operand.vmem [shape: f32[2,3,256], index: 0, kind: input, shape index: {}]   ;;  %s6107_s1 = inlined_call_operand.vmem [shape: f32[3,3,32,3], index: 1, kind: input, shape index: {}]   ;;  %s6108_s2 = inlined_call_operand.vmem [shape: f32[32,1], index: 2, kind: input, shape index: {}]   ;;  %s6109_s3 = inlined_call_operand.vmem [shape: f32[3,3,32,32], index: 3, kind: input, shape index: {}]   ;;  %s6110_s4 = inlined_call_operand.vmem [shape: f32[32,1], index: 4, kind: input, shape index: {}]   ;;  %s6111_s5 = inlined_call_operand.hbm [shape: f32[3,3,32,32], index: 5, kind: input, shape index: {}]   ;;  %s6112_s6 = inlined_call_operand.vmem [shape: f32[32,1], index: 6, kind: input, shape index: {}]   ;;  %s6113_s7 = inlined_call_operand.vmem [shape: f32[2,32,100], index: 7, kind: output, shape index: {}]  }
   0x1 LB: > { %s4643_s25 = sadd.s32 4294967295, %s4574_s24   ;;  %p4284_p0 = scmp.ge.s32.totalorder %s4574_s24, 1  ;;  %s4574_s24 = sphi %s4637_s24, %s18_s24  }
   0x2   : > { %p201_p1 = scmp.lt.s32.totalorder %s4574_s24, 3  ;;  %s4576_s26 = smov [#allocation4]  }
   0x3   : > { %s225_s27 = sshll.u32 %s4576_s26, 4  ;;  %p4497_p3 = scmp.eq.s32.totalorder %s4643_s25, 0  ;;  %s226_s27 = int_to_ptr.vmem [resolvable:$true] %s225_s27 }
   0x4   : > { %p4647_p2 = pnand %p4284_p0, %p201_p1  ;;  %s4549_s29 = scalar_lea.vmem %s226_s27, 4608 }
   0x5   : > { %p4550_p7 = scmp.ne.s32.totalorder %s226_s27, %s4549_s29  ;;  %p4557_p10 = scmp.lt.s32.totalorder %s226_s27, %s226_s27 }
   0x6   : > { %p4493_p4 = pneg %p4647_p2  ;;  %p4558_p11 = scmp.lt.s32.totalorder %s4549_s29, %s4549_s29 }
   0x8   : > { %p4494_p5 = pnand %p4497_p3, %p4493_p4  ;;  %p4559_p12 = por %p4558_p11, %p4557_p10 }
   0xa   : > { %p4540_p6 = pneg %p4494_p5 }
   0xc   : > { %p4552_p8 = pnand %p4550_p7, %p4540_p6 }
   0xe   : > { %p4553_p9 = pneg %p4552_p8 }
  0x10   : > { %p4560_p13 = pnand %p4559_p12, %p4553_p9 }
  0x12   : > { %4563 = shalt.err (!%p4560_p13)
}
  0x13   : > { %s4577_s30 = smov 128   ;;  %s4578_s8 = smov 8  }
  0x14   : > { %4496 = dma.hbm_to_vmem [thread:$0]  (!%p4494_p5), %s6111_s5, 4608, %s226_s27, [#allocation5], %s4577_s30, %s4577_s30, %s4578_s8  }
  0x15   : > { %252 = sbr.rel (%p4647_p2) target bundleno = 1505 (0x5e1), region = 48 }
  0x1a   : > { %4569 = dma.done.wait (%p4497_p3), [#allocation5], 4608  }
  0x1b   : > { %4571 = vsyncadd (%p4497_p3), [#allocation5], 4294962688  ;;  %p284_p0 = scmp.lt.s32.totalorder %s4643_s25, 1  ;;  %v6114_v0 = vmov 0.0   ;;  %s4580_s15 = smov 127   ;;  %v1416_v17 = vld [vmem:[%s6108_s2 + $0x18] sm:$0xff] }
  0x1c   : > { %394 = vmatprep.mubr.f32.mxu0 %v6114_v0  ;;  %406 = vmatprep.mubr.f32.mxu1 %v6114_v0  ;;  %s4581_s16 = smov 126   ;;  %s4582_s17 = smov 112   ;;  %v4588_v18 = vmov 0   ;;  %v1415_v19 = vld [vmem:[%s6108_s2 + $0x10] sm:$0xff]  ;;  %v1413_v20 = vld [vmem:[%s6108_s2] sm:$0xff]  ;;  %v1414_v21 = vld [vmem:[%s6108_s2 + $0x8] sm:$0xff] }
  0x1d   : > { %s6123_s25 = smov (!%p284_p0, %s4643_s25), 1  ;;  %s4583_s18 = smov 111   ;;  %4528 = vset.pattern.permute.xlu0 %v4588_v18  ;;  %4529 = vset.pattern.permute.xlu1 %v4588_v18  ;;  %vm325_vm0 = vcmask 1042432   ;;  %vm310_vm1 = vcmask 1039360   ;;  %v4293_v25 = vld [vmem:[%s6107_s1 + $0x20] sm:$0xff]  ;;  %vm312_vm2 = vcmask 23552  }
  0x1e   : > { %s4485_s11 = sshll.u32 %s6123_s25, 3  ;;  %s4584_s19 = smov 110   ;;  %v4295_v26 = vld [vmem:[%s6107_s1 + $0x30] sm:$0xff]  ;;  %vm536_vm3 = vcmask 1031168   ;;  %v4294_v30 = vld [vmem:[%s6107_s1 + $0x28] sm:$0xff]  ;;  %v4296_v31 = vld [vmem:[%s6107_s1 + $0x38] sm:$0xff] }
  0x1f   : > { %s4675_s14 = scalar_lea.vmem %s6106_s0, %s4485_s11  ;;  %s4585_s20 = smov 96   ;;  %vm663_vm4 = vcmask 916480   ;;  %vm790_vm5 = vcmask 908288   ;;  %v294_v34 = vld [vmem:[%s6107_s1] sm:$0xff]  ;;  %v295_v40 = vld [vmem:[%s6107_s1 + $0x8] sm:$0xff]  ;;  %v296_v43 = vld [vmem:[%s6107_s1 + $0x10] sm:$0xff] }
  0x20   : > { %v4678_v1 = vld [vmem:[%s4675_s14] sm:$0x77]  ;;  %s4586_s21 = smov 95   ;;  %s4587_s22 = smov 94   ;;  %v4310_v41 = vld [vmem:[%s6107_s1 + $0x48] sm:$0xff]  ;;  %v4311_v44 = vld [vmem:[%s6107_s1 + $0x50] sm:$0xff] }
  0x21   : > { %v529_v2 = vld [vmem:[%s4675_s14] sm:$0x77]  ;;  %306 = vrot.lane.b32.xlu0 %v4678_v1, %s4580_s15  ;;  %v4685_v3 = vcombine.high %v4678_v1, %v4678_v1  ;;  %v297_v47 = vld [vmem:[%s6107_s1 + $0x18] sm:$0xff]  ;;  %vm917_vm6 = vcmask 900096   ;;  %vm1044_vm7 = vcmask 785408   ;;  %v4320_v56 = vld [vmem:[%s6107_s1 + $0x68] sm:$0xff] }
  0x22   : > { %532 = vrot.lane.b32.xlu1 %v529_v2, %s4581_s16  ;;  %v531_v4 = vcombine.high %v529_v2, %v529_v2  ;;  %v656_v5 = vld [vmem:[%s4675_s14] sm:$0x77]  ;;  %v4312_v48 = vld [vmem:[%s6107_s1 + $0x58] sm:$0xff]  ;;  %v4330_v57 = vld [vmem:[%s6107_s1 + $0x88] sm:$0xff]  ;;  %vm1171_vm8 = vcmask 777216   ;;  %vm1298_vm9 = vcmask 769024  }
  0x23   : > { %v658_v6 = vcombine.high %v656_v5, %v656_v5  ;;  %v783_v7 = vld [vmem:[%s4675_s14] sm:$0x77]  ;;  %v4321_v58 = vld [vmem:[%s6107_s1 + $0x70] sm:$0xff]  ;;  %v4322_v61 = vld [vmem:[%s6107_s1 + $0x78] sm:$0xff]  ;;  %vm1514_vm10 = vcmask 261120   ;;  %vm2752_vm11 = vcmask 490496  }
  0x24   : > { %v785_v8 = vcombine.high %v783_v7, %v783_v7  ;;  %v910_v9 = vld [vmem:[%s4675_s14] sm:$0x77]  ;;  %v4331_v59 = vld [vmem:[%s6107_s1 + $0x90] sm:$0xff]  ;;  %v4332_v62 = vld [vmem:[%s6107_s1 + $0x98] sm:$0xff]  ;;  %vm4049_vm12 = vcmask 80896   ;;  %s4589_s10 = smov 122  }
  0x25   : > { %308 = vrot.lane.b32.xlu0 %v4685_v3, %s4580_s15  ;;  %v912_v10 = vcombine.high %v910_v9, %v910_v9  ;;  %v1037_v11 = vld [vmem:[%s4675_s14] sm:$0x77]  ;;  %v4372_v18 = vld [vmem:[%s6107_s1 + $0x118] sm:$0xff]  ;;  %s4590_s11 = smov 116   ;;  %s4591_s12 = smov 104   ;;  %vm4070_vm13 = vcmask 162896  }
  0x26   : > { %534 = vrot.lane.b32.xlu1 %v531_v4, %s4581_s16  ;;  %v1039_v12 = vcombine.high %v1037_v11, %v1037_v11  ;;  %v1164_v13 = vld [vmem:[%s4675_s14] sm:$0x77]  ;;  %s4592_s13 = smov 98   ;;  %s4594_s23 = smov 86   ;;  %vm4087_vm14 = vcmask 244896   ;;  %vm4104_vm15 = vcmask 326896  }
  0x27   : > { %v1166_v14 = vcombine.high %v1164_v13, %v1164_v13  ;;  %v1291_v15 = vld [vmem:[%s4675_s14] sm:$0x77]  ;;  %s4593_s14 = smov 92   ;;  %s4595_s26 = smov 80  }
  0x28   : > { %v1293_v16 = vcombine.high %v1291_v15, %v1291_v15  ;;  %v4309_v35 = vld [vmem:[%s6107_s1 + $0x40] sm:$0xff]  ;;  %s4596_s27 = smov 74  }
  0x29   : > { %659 = vrot.lane.b32.xlu0 %v656_v5, %s4582_s17  ;;  %v4319_v51 = vld [vmem:[%s6107_s1 + $0x60] sm:$0xff]  ;;  %v4340_v5 = vld [vmem:[%s6107_s1 + $0xa8] sm:$0xff] }
  0x2a   : > { %661 = vrot.lane.b32.xlu1 %v658_v6, %s4582_s17  ;;  %v4329_v52 = vld [vmem:[%s6107_s1 + $0x80] sm:$0xff]  ;;  %v4350_v6 = vld [vmem:[%s6107_s1 + $0xc8] sm:$0xff] }
  0x2b   : > { %v4349_v2 = vld [vmem:[%s6107_s1 + $0xc0] sm:$0xff] }
  0x2d   : > { %786 = vrot.lane.b32.xlu0 %v783_v7, %s4583_s18  ;;  %v4341_v7 = vld [vmem:[%s6107_s1 + $0xb0] sm:$0xff] }
  0x2e   : > { %788 = vrot.lane.b32.xlu1 %v785_v8, %s4583_s18  ;;  %v4351_v8 = vld [vmem:[%s6107_s1 + $0xd0] sm:$0xff] }
  0x31   : > { %913 = vrot.lane.b32.xlu0 %v910_v9, %s4584_s19  ;;  %v4342_v9 = vld [vmem:[%s6107_s1 + $0xb8] sm:$0xff] }
  0x32   : > { %915 = vrot.lane.b32.xlu1 %v912_v10, %s4584_s19  ;;  %v4352_v10 = vld [vmem:[%s6107_s1 + $0xd8] sm:$0xff] }
  0x35   : > { %1040 = vrot.lane.b32.xlu0 %v1037_v11, %s4585_s20  ;;  %v4359_v11 = vld [vmem:[%s6107_s1 + $0xe0] sm:$0xff] }
  0x36   : > { %1042 = vrot.lane.b32.xlu1 %v1039_v12, %s4585_s20  ;;  %v4369_v12 = vld [vmem:[%s6107_s1 + $0x100] sm:$0xff] }
  0x39   : > { %1167 = vrot.lane.b32.xlu0 %v1164_v13, %s4586_s21  ;;  %v4360_v13 = vld [vmem:[%s6107_s1 + $0xe8] sm:$0xff] }
  0x3a   : > { %1169 = vrot.lane.b32.xlu1 %v1166_v14, %s4586_s21  ;;  %v4370_v14 = vld [vmem:[%s6107_s1 + $0x108] sm:$0xff] }
  0x3d   : > { %1294 = vrot.lane.b32.xlu0 %v1291_v15, %s4587_s22  ;;  %v4361_v15 = vld [vmem:[%s6107_s1 + $0xf0] sm:$0xff] }
  0x3e   : > { %1296 = vrot.lane.b32.xlu1 %v1293_v16, %s4587_s22  ;;  %v4371_v16 = vld [vmem:[%s6107_s1 + $0x110] sm:$0xff] }
  0x41   : > { %1434 = vperm.xlu0 %4528, %v1416_v17   ;;  %v4362_v17 = vld [vmem:[%s6107_s1 + $0xf8] sm:$0xff] }
  0x42   : > { %1429 = vperm.xlu1 %4529, %v1415_v19  }
  0x45   : > { %1419 = vperm.xlu0 %4528, %v1413_v20  }
  0x46   : > { %1424 = vperm.xlu1 %4529, %v1414_v21  }
  0x93   : > { %v307_v22 = vpop.permute.xlu0 %306 }
  0x94   : > { %v533_v23 = vpop.permute.xlu1 %532 }
  0x97   : > { %v309_v24 = vpop.permute.xlu0 %308 }
  0x98   : > { %v535_v27 = vpop.permute.xlu1 %534  ;;  %4297 = vmatprep.subr.msk.mxu0 %vm325_vm0, %v309_v24  ;;  %4487 = vmatprep.subr.msk.mxu1 %vm325_vm0, %v309_v24  ;;  %v311_v28 = vsel %vm310_vm1, %v307_v22, %v309_v24 }
  0x99   : > { %4298 = vmatpush1.msk.msra.mxu0 %vm325_vm0, %v311_v28  ;;  %4488 = vmatpush1.msk.msra.mxu1 %vm325_vm0, %v311_v28  ;;  %v537_v29 = vsel %vm536_vm3, %v533_v23, %v535_v27 }
  0x9a   : > { %4299 = vmatmul.mubr.msk.f32.vlgmr.msra.gmra.mxu0 %vm312_vm2, %v4293_v25  ;;  %4301 = vmatmul.mubr.msk.f32.vlgmr.msra.gmra.mxu1 %vm312_vm2, %v4295_v26 }
  0x9b   : > { %400 = vmatprep.mubr.f32.mxu0 %v6114_v0  ;;  %412 = vmatprep.mubr.f32.mxu1 %v6114_v0  ;;  %v660_v33 = vpop.permute.xlu0 %659 }
  0x9c   : > { %v662_v32 = vpop.permute.xlu1 %661  ;;  %4313 = vmatprep.subr.msk.mxu0 %vm325_vm0, %v535_v27  ;;  %4303 = vmatprep.subr.msk.mxu1 %vm325_vm0, %v4685_v3 }
  0x9d   : > { %4314 = vmatpush1.msk.msra.mxu0 %vm325_vm0, %v537_v29  ;;  %4304 = vmatpush1.msk.msra.mxu1 %vm325_vm0, %v4678_v1  ;;  %v664_v38 = vsel %vm663_vm4, %v660_v33, %v662_v32  ;;  %v4339_v1 = vld [vmem:[%s6107_s1 + $0xa0] sm:$0xff] }
  0x9e   : > { %4300 = vmatmul.mubr.msk.f32.gmra.mxu0 %vm312_vm2, %v4294_v30  ;;  %4302 = vmatmul.mubr.msk.f32.gmra.mxu1 %vm312_vm2, %v4296_v31 }
  0x9f   : > { %499 = vmatprep.mubr.f32.mxu1 %v6114_v0  ;;  %618 = vmatprep.mubr.f32.mxu0 %v6114_v0  ;;  %v787_v37 = vpop.permute.xlu0 %786 }
  0xa0   : > { %v789_v36 = vpop.permute.xlu1 %788  ;;  %4323 = vmatprep.subr.msk.mxu1 %vm325_vm0, %v662_v32 }
  0xa1   : > { %4333 = vmatprep.subr.msk.mxu0 %vm325_vm0, %v789_v36  ;;  %v791_v39 = vsel %vm790_vm5, %v787_v37, %v789_v36 }
  0xa2   : > { %4305 = vmatmul.mubr.msk.f32.vlgmr.msra.gmra.mxu1 %vm312_vm2, %v294_v34  ;;  %4315 = vmatmul.mubr.msk.f32.vlgmr.msra.gmra.mxu0 %vm312_vm2, %v4309_v35 }
  0xa3   : > { %624 = vmatprep.mubr.f32.mxu0 %v6114_v0  ;;  %505 = vmatprep.mubr.f32.mxu1 %v6114_v0  ;;  %v914_v46 = vpop.permute.xlu0 %913 }
  0xa4   : > { %v916_v42 = vpop.permute.xlu1 %915  ;;  %4324 = vmatpush1.msk.msra.mxu1 %vm325_vm0, %v664_v38  ;;  %4334 = vmatpush1.msk.msra.mxu0 %vm325_vm0, %v791_v39 }
  0xa5   : > { %4343 = vmatprep.subr.msk.mxu1 %vm325_vm0, %v916_v42  ;;  %v918_v53 = vsel %vm917_vm6, %v914_v46, %v916_v42 }
  0xa6   : > { %4306 = vmatmul.mubr.msk.f32.gmra.mxu1 %vm312_vm2, %v295_v40  ;;  %4316 = vmatmul.mubr.msk.f32.gmra.mxu0 %vm312_vm2, %v4310_v41 }
  0xa7   : > { %630 = vmatprep.mubr.f32.mxu0 %v6114_v0  ;;  %511 = vmatprep.mubr.f32.mxu1 %v6114_v0  ;;  %v1041_v50 = vpop.permute.xlu0 %1040 }
  0xa8   : > { %v1043_v45 = vpop.permute.xlu1 %1042 }
  0xa9   : > { %4353 = vmatprep.subr.msk.mxu0 %vm325_vm0, %v1043_v45  ;;  %v1045_v54 = vsel %vm1044_vm7, %v1041_v50, %v1043_v45 }
  0xaa   : > { %4307 = vmatmul.mubr.msk.f32.gmra.mxu1 %vm312_vm2, %v296_v43  ;;  %4317 = vmatmul.mubr.msk.f32.gmra.mxu0 %vm312_vm2, %v4311_v44 }
  0xab   : > { %517 = vmatprep.mubr.f32.mxu1 %v6114_v0  ;;  %636 = vmatprep.mubr.f32.mxu0 %v6114_v0  ;;  %v1168_v60 = vpop.permute.xlu0 %1167 }
  0xac   : > { %v1170_v49 = vpop.permute.xlu1 %1169 }
  0xad   : > { %v1172_v3 = vsel %vm1171_vm8, %v1168_v60, %v1170_v49 }
  0xae   : > { %4308 = vmatmul.mubr.msk.f32.gmra.mxu1 %vm312_vm2, %v297_v47  ;;  %4318 = vmatmul.mubr.msk.f32.gmra.mxu0 %vm312_vm2, %v4312_v48 }
  0xaf   : > { %745 = vmatprep.mubr.f32.mxu1 %v6114_v0  ;;  %872 = vmatprep.mubr.f32.mxu0 %v6114_v0  ;;  %v1295_v63 = vpop.permute.xlu0 %1294 }
  0xb0   : > { %v1297_v55 = vpop.permute.xlu1 %1296 }
  0xb1   : > { %v1299_v4 = vsel %vm1298_vm9, %v1295_v63, %v1297_v55 }
  0xb2   : > { %4325 = vmatmul.mubr.msk.f32.vlgmr.msra.gmra.mxu1 %vm312_vm2, %v4319_v51  ;;  %4335 = vmatmul.mubr.msk.f32.vlgmr.msra.gmra.mxu0 %vm312_vm2, %v4329_v52 }
  0xb3   : > { %878 = vmatprep.mubr.f32.mxu0 %v6114_v0  ;;  %751 = vmatprep.mubr.f32.mxu1 %v6114_v0 }
  0xb4   : > { %4344 = vmatpush1.msk.msra.mxu1 %vm325_vm0, %v918_v53  ;;  %4354 = vmatpush1.msk.msra.mxu0 %vm325_vm0, %v1045_v54 }
  0xb5   : > { %4363 = vmatprep.subr.msk.mxu1 %vm325_vm0, %v1170_v49  ;;  %4373 = vmatprep.subr.msk.mxu0 %vm325_vm0, %v1297_v55 }
  0xb6   : > { %4326 = vmatmul.mubr.msk.f32.gmra.mxu1 %vm312_vm2, %v4320_v56  ;;  %4336 = vmatmul.mubr.msk.f32.gmra.mxu0 %vm312_vm2, %v4330_v57 }
  0xb7   : > { %884 = vmatprep.mubr.f32.mxu0 %v6114_v0  ;;  %757 = vmatprep.mubr.f32.mxu1 %v6114_v0 }
  0xba   : > { %4327 = vmatmul.mubr.msk.f32.gmra.mxu1 %vm312_vm2, %v4321_v58  ;;  %4337 = vmatmul.mubr.msk.f32.gmra.mxu0 %vm312_vm2, %v4331_v59 }
  0xbb   : > { %763 = vmatprep.mubr.f32.mxu1 %v6114_v0  ;;  %890 = vmatprep.mubr.f32.mxu0 %v6114_v0 }
  0xbe   : > { %4328 = vmatmul.mubr.msk.f32.gmra.mxu1 %vm312_vm2, %v4322_v61  ;;  %4338 = vmatmul.mubr.msk.f32.gmra.mxu0 %vm312_vm2, %v4332_v62 }
  0xbf   : > { %999 = vmatprep.mubr.f32.mxu1 %v6114_v0  ;;  %1126 = vmatprep.mubr.f32.mxu0 %v6114_v0 }
  0xc2   : > { %4345 = vmatmul.mubr.msk.f32.vlgmr.msra.gmra.mxu1 %vm312_vm2, %v4339_v1  ;;  %4355 = vmatmul.mubr.msk.f32.vlgmr.msra.gmra.mxu0 %vm312_vm2, %v4349_v2 }
  0xc3   : > { %1132 = vmatprep.mubr.f32.mxu0 %v6114_v0  ;;  %1005 = vmatprep.mubr.f32.mxu1 %v6114_v0 }
  0xc4   : > { %4364 = vmatpush1.msk.msra.mxu1 %vm325_vm0, %v1172_v3  ;;  %4374 = vmatpush1.msk.msra.mxu0 %vm325_vm0, %v1299_v4  ;;  %vm4121_vm0 = vcmask 408896  }
  0xc6   : > { %4346 = vmatmul.mubr.msk.f32.gmra.mxu1 %vm312_vm2, %v4340_v5  ;;  %4356 = vmatmul.mubr.msk.f32.gmra.mxu0 %vm312_vm2, %v4350_v6 }
  0xc7   : > { %1138 = vmatprep.mubr.f32.mxu0 %v6114_v0  ;;  %1011 = vmatprep.mubr.f32.mxu1 %v6114_v0 }
  0xca   : > { %4347 = vmatmul.mubr.msk.f32.gmra.mxu1 %vm312_vm2, %v4341_v7  ;;  %4357 = vmatmul.mubr.msk.f32.gmra.mxu0 %vm312_vm2, %v4351_v8 }
  0xcb   : > { %1017 = vmatprep.mubr.f32.mxu1 %v6114_v0  ;;  %1144 = vmatprep.mubr.f32.mxu0 %v6114_v0 }
  0xce   : > { %4348 = vmatmul.mubr.msk.f32.gmra.mxu1 %vm312_vm2, %v4342_v9  ;;  %4358 = vmatmul.mubr.msk.f32.gmra.mxu0 %vm312_vm2, %v4352_v10 }
  0xcf   : > { %1253 = vmatprep.mubr.f32.mxu1 %v6114_v0  ;;  %1380 = vmatprep.mubr.f32.mxu0 %v6114_v0 }
  0xd2   : > { %4365 = vmatmul.mubr.msk.f32.vlgmr.msra.gmra.mxu1 %vm312_vm2, %v4359_v11  ;;  %4375 = vmatmul.mubr.msk.f32.vlgmr.msra.gmra.mxu0 %vm312_vm2, %v4369_v12 }
  0xd3   : > { %1259 = vmatprep.mubr.f32.mxu1 %v6114_v0  ;;  %1386 = vmatprep.mubr.f32.mxu0 %v6114_v0 }
  0xd6   : > { %4366 = vmatmul.mubr.msk.f32.gmra.mxu1 %vm312_vm2, %v4360_v13  ;;  %4376 = vmatmul.mubr.msk.f32.gmra.mxu0 %vm312_vm2, %v4370_v14 }
  0xd7   : > { %1265 = vmatprep.mubr.f32.mxu1 %v6114_v0  ;;  %1392 = vmatprep.mubr.f32.mxu0 %v6114_v0 }
  0xda   : > { %4367 = vmatmul.mubr.msk.f32.gmra.mxu1 %vm312_vm2, %v4361_v15  ;;  %4377 = vmatmul.mubr.msk.f32.gmra.mxu0 %vm312_vm2, %v4371_v16 }
  0xdb   : > { %1271 = vmatprep.mubr.f32.mxu1 %v6114_v0  ;;  %1398 = vmatprep.mubr.f32.mxu0 %v6114_v0 }
  0xde   : > { %4368 = vmatmul.mubr.msk.f32.gmra.mxu1 %vm312_vm2, %v4362_v17  ;;  %4378 = vmatmul.mubr.msk.f32.gmra.mxu0 %vm312_vm2, %v4372_v18  ;;  %vm4155_vm2 = vcmask 572896  }
  0xdf   : > { %1591 = vmatprep.mubr.f32.mxu1 %v6114_v0  ;;  %1692 = vmatprep.mubr.f32.mxu0 %v6114_v0 }
 0x15a   : > { %v396_v19 = vpop.f32.mrf.mxu0  ;;  %v408_v20 = vpop.f32.mrf.mxu1 }
 0x15c   : > { %v398_v21 = vpop.f32.mrf.mxu0  ;;  %v410_v22 = vpop.f32.mrf.mxu1 }
 0x15e   : > { %v402_v23 = vpop.f32.mrf.mxu0  ;;  %v414_v24 = vpop.f32.mrf.mxu1 }
 0x160   : > { %v404_v25 = vpop.f32.mrf.mxu0  ;;  %v4931_v26 = vpop.f32.mrf.mxu1 }
 0x162   : > { %v501_v27 = vpop.f32.mrf.mxu1  ;;  %v620_v28 = vpop.f32.mrf.mxu0 }
 0x163   : > { %v502_v59 = vadd.f32 %v501_v27, %v396_v19 }
 0x164   : > { %v503_v29 = vpop.f32.mrf.mxu1  ;;  %v622_v30 = vpop.f32.mrf.mxu0 }
 0x165   : > { %v504_v62 = vadd.f32 %v503_v29, %v398_v21  ;;  %v643_v2 = vadd.f32 %v620_v28, %v502_v59 }
 0x166   : > { %v507_v31 = vpop.f32.mrf.mxu1  ;;  %v626_v32 = vpop.f32.mrf.mxu0 }
 0x167   : > { %v508_v3 = vadd.f32 %v507_v31, %v402_v23  ;;  %v644_v6 = vadd.f32 %v622_v30, %v504_v62 }
 0x168   : > { %v509_v33 = vpop.f32.mrf.mxu1  ;;  %v628_v34 = vpop.f32.mrf.mxu0 }
 0x169   : > { %v510_v7 = vadd.f32 %v509_v33, %v404_v25  ;;  %v645_v12 = vadd.f32 %v626_v32, %v508_v3 }
 0x16a   : > { %v513_v35 = vpop.f32.mrf.mxu1  ;;  %v632_v36 = vpop.f32.mrf.mxu0 }
 0x16b   : > { %v514_v9 = vadd.f32 %v513_v35, %v408_v20  ;;  %v646_v17 = vadd.f32 %v628_v34, %v510_v7 }
 0x16c   : > { %v515_v37 = vpop.f32.mrf.mxu1  ;;  %v634_v38 = vpop.f32.mrf.mxu0 }
 0x16d   : > { %v516_v14 = vadd.f32 %v515_v37, %v410_v22  ;;  %v647_v21 = vadd.f32 %v632_v36, %v514_v9  ;;  %v4940_v37 = vpop.permute.xlu0 %1434 }
 0x16e   : > { %v519_v39 = vpop.f32.mrf.mxu1  ;;  %v638_v40 = vpop.f32.mrf.mxu0 }
 0x16f   : > { %v520_v27 = vadd.f32 %v519_v39, %v414_v24  ;;  %v648_v25 = vadd.f32 %v634_v38, %v516_v14 }
 0x170   : > { %v521_v41 = vpop.f32.mrf.mxu1  ;;  %v4933_v42 = vpop.f32.mrf.mxu0 }
 0x171   : > { %v522_v20 = vadd.f32 %v521_v41, %v4931_v26  ;;  %v649_v34 = vadd.f32 %v638_v40, %v520_v27 }
 0x172   : > { %v747_v43 = vpop.f32.mrf.mxu1  ;;  %v874_v44 = vpop.f32.mrf.mxu0 }
 0x173   : > { %v770_v8 = vadd.f32 %v747_v43, %v643_v2  ;;  %v650_v38 = vadd.f32 %v4933_v42, %v522_v20 }
 0x174   : > { %v749_v45 = vpop.f32.mrf.mxu1  ;;  %v876_v46 = vpop.f32.mrf.mxu0 }
 0x175   : > { %v771_v13 = vadd.f32 %v749_v45, %v644_v6  ;;  %v897_v18 = vadd.f32 %v874_v44, %v770_v8 }
 0x176   : > { %v753_v47 = vpop.f32.mrf.mxu1  ;;  %v880_v48 = vpop.f32.mrf.mxu0 }
 0x177   : > { %v772_v19 = vadd.f32 %v753_v47, %v645_v12  ;;  %v898_v29 = vadd.f32 %v876_v46, %v771_v13  ;;  %v4942_v46 = vpop.permute.xlu1 %1429 }
 0x178   : > { %v755_v49 = vpop.f32.mrf.mxu1  ;;  %v882_v50 = vpop.f32.mrf.mxu0 }
 0x179   : > { %v773_v31 = vadd.f32 %v755_v49, %v646_v17  ;;  %v899_v43 = vadd.f32 %v880_v48, %v772_v19 }
 0x17a   : > { %v759_v51 = vpop.f32.mrf.mxu1  ;;  %v886_v52 = vpop.f32.mrf.mxu0 }
 0x17b   : > { %v774_v33 = vadd.f32 %v759_v51, %v647_v21  ;;  %v900_v24 = vadd.f32 %v882_v50, %v773_v31 }
 0x17c   : > { %v761_v53 = vpop.f32.mrf.mxu1  ;;  %v888_v54 = vpop.f32.mrf.mxu0 }
 0x17d   : > { %v775_v44 = vadd.f32 %v761_v53, %v648_v25  ;;  %v901_v49 = vadd.f32 %v886_v52, %v774_v33 }
 0x17e   : > { %v765_v55 = vpop.f32.mrf.mxu1  ;;  %v4935_v56 = vpop.f32.mrf.mxu0 }
 0x17f   : > { %v776_v26 = vadd.f32 %v765_v55, %v649_v34  ;;  %v902_v62 = vadd.f32 %v888_v54, %v775_v44 }
 0x180   : > { %v767_v57 = vpop.f32.mrf.mxu1  ;;  %v4937_v58 = vpop.f32.mrf.mxu0 }
 0x181   : > { %v903_v6 = vadd.f32 %v4935_v56, %v776_v26 }
 0x182   : > { %v1001_v60 = vpop.f32.mrf.mxu1  ;;  %v1128_v61 = vpop.f32.mrf.mxu0 }
 0x183   : > { %v1024_v30 = vadd.f32 %v1001_v60, %v897_v18 }
 0x184   : > { %v1003_v63 = vpop.f32.mrf.mxu1  ;;  %v1130_v1 = vpop.f32.mrf.mxu0 }
 0x185   : > { %v1025_v22 = vadd.f32 %v1003_v63, %v898_v29  ;;  %v1151_v39 = vadd.f32 %v1128_v61, %v1024_v30  ;;  %v777_v63 = vadd.f32 %v767_v57, %v650_v38  ;;  %v1420_v61 = vpop.permute.xlu0 %1419 }
 0x186   : > { %v1007_v4 = vpop.f32.mrf.mxu1  ;;  %v1134_v5 = vpop.f32.mrf.mxu0 }
 0x187   : > { %v1026_v47 = vadd.f32 %v1007_v4, %v899_v43  ;;  %v1152_v59 = vadd.f32 %v1130_v1, %v1025_v22  ;;  %v904_v54 = vadd.f32 %v4937_v58, %v777_v63 }
 0x188   : > { %v1009_v10 = vpop.f32.mrf.mxu1  ;;  %v1136_v11 = vpop.f32.mrf.mxu0 }
 0x189   : > { %v1027_v48 = vadd.f32 %v1009_v10, %v900_v24  ;;  %v1153_v3 = vadd.f32 %v1134_v5, %v1026_v47  ;;  %v1425_v10 = vpop.permute.xlu1 %1424 }
 0x18a   : > { %v1013_v15 = vpop.f32.mrf.mxu1  ;;  %v1140_v16 = vpop.f32.mrf.mxu0 }
 0x18b   : > { %v1028_v40 = vadd.f32 %v1013_v15, %v901_v49  ;;  %v1154_v55 = vadd.f32 %v1136_v11, %v1027_v48 }
 0x18c   : > { %v1015_v28 = vpop.f32.mrf.mxu1  ;;  %v1142_v23 = vpop.f32.mrf.mxu0 }
 0x18d   : > { %v1029_v7 = vadd.f32 %v1015_v28, %v902_v62  ;;  %v1155_v57 = vadd.f32 %v1140_v16, %v1028_v40  ;;  %v1461_v40 = vld [vmem:[%s6109_s3] sm:$0xff] }
 0x18e   : > { %v1019_v35 = vpop.f32.mrf.mxu1  ;;  %v1146_v32 = vpop.f32.mrf.mxu0 }
 0x18f   : > { %v1030_v12 = vadd.f32 %v1019_v35, %v903_v6  ;;  %v1156_v56 = vadd.f32 %v1142_v23, %v1029_v7  ;;  %v2714_v7 = vld [vmem:[%s6110_s4 + $0x18] sm:$0xff] }
 0x190   : > { %v1148_v45 = vpop.f32.mrf.mxu0  ;;  %v1021_v36 = vpop.f32.mrf.mxu1 }
 0x191   : > { %v1031_v19 = vadd.f32 %v1021_v36, %v904_v54  ;;  %v1157_v58 = vadd.f32 %v1146_v32, %v1030_v12  ;;  %v2711_v12 = vld [vmem:[%s6110_s4] sm:$0xff] }
 0x192   : > { %v1255_v41 = vpop.f32.mrf.mxu1  ;;  %v1382_v51 = vpop.f32.mrf.mxu0 }
 0x193   : > { %v1278_v60 = vadd.f32 %v1255_v41, %v1151_v39  ;;  %v1158_v43 = vadd.f32 %v1148_v45, %v1031_v19 }
 0x194   : > { %v1384_v53 = vpop.f32.mrf.mxu0  ;;  %v1257_v2 = vpop.f32.mrf.mxu1 }
 0x195   : > { %v1405_v50 = vadd.f32 %v1382_v51, %v1278_v60  ;;  %v1279_v4 = vadd.f32 %v1257_v2, %v1152_v59  ;;  %v1463_v2 = vld [vmem:[%s6109_s3 + $0x10] sm:$0xff] }
 0x196   : > { %v1261_v42 = vpop.f32.mrf.mxu1  ;;  %v1388_v52 = vpop.f32.mrf.mxu0 }
 0x197   : > { %v1437_v8 = vadd.f32 %v1420_v61, %v1405_v50  ;;  %v1406_v9 = vadd.f32 %v1384_v53, %v1279_v4  ;;  %v1280_v1 = vadd.f32 %v1261_v42, %v1153_v3  ;;  %v1462_v53 = vld [vmem:[%s6109_s3 + $0x8] sm:$0xff]  ;;  %v1464_v3 = vld [vmem:[%s6109_s3 + $0x18] sm:$0xff] }
 0x198   : > { %v1263_v13 = vpop.f32.mrf.mxu1  ;;  %v1390_v14 = vpop.f32.mrf.mxu0 }
 0x199   : > { %v4947_v5 = vmax.f32 %v1437_v8, 0.0  ;;  %v1438_v15 = vadd.f32 %v1420_v61, %v1406_v9  ;;  %v1281_v17 = vadd.f32 %v1263_v13, %v1154_v55  ;;  %v1407_v18 = vadd.f32 %v1388_v52, %v1280_v1  ;;  %v2712_v55 = vld [vmem:[%s6110_s4 + $0x8] sm:$0xff] }
 0x19a   : > { %v1267_v21 = vpop.f32.mrf.mxu1  ;;  %v1394_v27 = vpop.f32.mrf.mxu0 }
 0x19b   : > { %v1446_v11 = vmax.f32 %v1438_v15, 0.0  ;;  %v1439_v28 = vadd.f32 %v1425_v10, %v1407_v18  ;;  %v1282_v29 = vadd.f32 %v1267_v21, %v1155_v57  ;;  %v1408_v31 = vadd.f32 %v1390_v14, %v1281_v17  ;;  %1486 = vrot.lane.b32.xlu1 %v4947_v5, %s4580_s15 }
 0x19c   : > { %v1269_v16 = vpop.f32.mrf.mxu1  ;;  %v1396_v30 = vpop.f32.mrf.mxu0 }
 0x19d   : > { %1454 = vst.msk [vmem:[#allocation2 + $0x8] sm:$0xff] %vm1298_vm9, %v1446_v11  ;;  %v4952_v25 = vmax.f32 %v1439_v28, 0.0  ;;  %v1440_v20 = vadd.f32 %v1425_v10, %v1408_v31  ;;  %v1283_v33 = vadd.f32 %v1269_v16, %v1156_v56  ;;  %v1409_v23 = vadd.f32 %v1394_v27, %v1282_v29  ;;  %v2713_v10 = vld [vmem:[%s6110_s4 + $0x10] sm:$0xff] }
 0x19e   : > { %v1273_v35 = vpop.f32.mrf.mxu1  ;;  %v1400_v22 = vpop.f32.mrf.mxu0 }
 0x19f   : > { %v1448_v34 = vmax.f32 %v1440_v20, 0.0  ;;  %v1441_v44 = vadd.f32 %v4942_v46, %v1409_v23  ;;  %v1284_v36 = vadd.f32 %v1273_v35, %v1157_v58  ;;  %v1410_v24 = vadd.f32 %v1396_v30, %v1283_v33  ;;  %1722 = vrot.lane.b32.xlu1 %v4947_v5, %s4581_s16 }
 0x1a0   : > { %v1275_v32 = vpop.f32.mrf.mxu1  ;;  %v1402_v39 = vpop.f32.mrf.mxu0 }
 0x1a1   : > { %1456 = vst.msk [vmem:[#allocation2 + $0x18] sm:$0xff] %vm1298_vm9, %v1448_v34  ;;  %v4958_v47 = vmax.f32 %v1441_v44, 0.0  ;;  %v1442_v38 = vadd.f32 %v4942_v46, %v1410_v24  ;;  %v1285_v49 = vadd.f32 %v1275_v32, %v1158_v43  ;;  %v1411_v26 = vadd.f32 %v1400_v22, %v1284_v36  ;;  %v4379_v34 = vld [vmem:[%s6109_s3 + $0x20] sm:$0xff]  ;;  %v4380_v32 = vld [vmem:[%s6109_s3 + $0x28] sm:$0xff] }
 0x1a3   : > { %v1450_v45 = vmax.f32 %v1442_v38, 0.0  ;;  %v1443_v41 = vadd.f32 %v4940_v37, %v1411_v26  ;;  %v1412_v51 = vadd.f32 %v1402_v39, %v1285_v49  ;;  %1864 = vrot.lane.b32.xlu1 %v4947_v5, %s4582_s17  ;;  %v4381_v38 = vld [vmem:[%s6109_s3 + $0x30] sm:$0xff] }
 0x1a4   : > { %v4964_v59 = vld [vmem:[#allocation2 + $0x8] sm:$0xff] }
 0x1a5   : > { %1458 = vst.msk [vmem:[#allocation2 + $0x28] sm:$0xff] %vm1298_vm9, %v1450_v45  ;;  %v4967_v48 = vmax.f32 %v1443_v41, 0.0  ;;  %v1444_v60 = vadd.f32 %v4940_v37, %v1412_v51  ;;  %1488 = vrot.lane.b32.xlu0 %v4964_v59, %s4580_s15  ;;  %v4382_v41 = vld [vmem:[%s6109_s3 + $0x38] sm:$0xff] }
 0x1a7   : > { %v1452_v46 = vmax.f32 %v1444_v60, 0.0  ;;  %2006 = vrot.lane.b32.xlu1 %v4947_v5, %s4583_s18 }
 0x1a8   : > { %v4995_v63 = vld [vmem:[#allocation2 + $0x18] sm:$0xff] }
 0x1a9   : > { %1460 = vst.msk [vmem:[#allocation2 + $0x38] sm:$0xff] %vm1298_vm9, %v1452_v46  ;;  %1724 = vrot.lane.b32.xlu0 %v4964_v59, %s4581_s16  ;;  %v4391_v46 = vld [vmem:[%s6109_s3 + $0x40] sm:$0xff] }
 0x1ab   : > { %1490 = vrot.lane.b32.xlu1 %v4952_v25, %s4580_s15 }
 0x1ac   : > { %v4989_v62 = vld [vmem:[#allocation2 + $0x28] sm:$0xff] }
 0x1ad   : > { %1866 = vrot.lane.b32.xlu0 %v4964_v59, %s4582_s17 }
 0x1af   : > { %1726 = vrot.lane.b32.xlu1 %v4952_v25, %s4581_s16 }
 0x1b0   : > { %v4983_v37 = vld [vmem:[#allocation2 + $0x38] sm:$0xff] }
 0x1b1   : > { %1652 = vmatprep.subr.mxu0 %v4983_v37  ;;  %2008 = vrot.lane.b32.xlu0 %v4964_v59, %s4583_s18 }
 0x1b2   : > { %1653 = vmatpush1.msra.mxu0 %v4967_v48 }
 0x1b3   : > { %1654 = vmatprep.subr.mxu0 %v4989_v62  ;;  %1868 = vrot.lane.b32.xlu1 %v4952_v25, %s4582_s17 }
 0x1b4   : > { %1655 = vmatpush1.msra.mxu0 %v4958_v47 }
 0x1b5   : > { %1656 = vmatprep.subr.mxu0 %v4995_v63  ;;  %1492 = vrot.lane.b32.xlu0 %v4995_v63, %s4580_s15 }
 0x1b6   : > { %1657 = vmatpush1.msra.mxu0 %v4952_v25 }
 0x1b7   : > { %1658 = vmatprep.subr.mxu0 %v4964_v59  ;;  %2010 = vrot.lane.b32.xlu1 %v4952_v25, %s4583_s18 }
 0x1b8   : > { %1659 = vmatpush1.msra.mxu0 %v4947_v5 }
 0x1b9   : > { %1728 = vrot.lane.b32.xlu0 %v4995_v63, %s4581_s16  ;;  %4387 = vmatmul.mubr.msk.f32.vlgmr.msra.gmra.mxu0 %vm1514_vm10, %v1461_v40  ;;  %v4392_v40 = vld [vmem:[%s6109_s3 + $0x48] sm:$0xff] }
 0x1ba   : > { %1698 = vmatprep.mubr.f32.mxu0 %v6114_v0 }
 0x1bb   : > { %1494 = vrot.lane.b32.xlu1 %v4958_v47, %s4580_s15 }
 0x1bd   : > { %1870 = vrot.lane.b32.xlu0 %v4995_v63, %s4582_s17  ;;  %4388 = vmatmul.mubr.msk.f32.gmra.mxu0 %vm1514_vm10, %v1462_v53 }
 0x1be   : > { %1704 = vmatprep.mubr.f32.mxu0 %v6114_v0 }
 0x1bf   : > { %1730 = vrot.lane.b32.xlu1 %v4958_v47, %s4581_s16 }
 0x1c1   : > { %2012 = vrot.lane.b32.xlu0 %v4995_v63, %s4583_s18  ;;  %4389 = vmatmul.mubr.msk.f32.gmra.mxu0 %vm1514_vm10, %v1463_v2 }
 0x1c2   : > { %1710 = vmatprep.mubr.f32.mxu0 %v6114_v0 }
 0x1c3   : > { %1872 = vrot.lane.b32.xlu1 %v4958_v47, %s4582_s17 }
 0x1c5   : > { %1496 = vrot.lane.b32.xlu0 %v4989_v62, %s4580_s15  ;;  %4390 = vmatmul.mubr.msk.f32.gmra.mxu0 %vm1514_vm10, %v1464_v3 }
 0x1c6   : > { %1968 = vmatprep.mubr.f32.mxu0 %v6114_v0 }
 0x1c7   : > { %2014 = vrot.lane.b32.xlu1 %v4958_v47, %s4583_s18 }
 0x1c9   : > { %1732 = vrot.lane.b32.xlu0 %v4989_v62, %s4581_s16 }
 0x1cb   : > { %2156 = vrot.lane.b32.xlu1 %v4958_v47, %s4584_s19 }
 0x1cd   : > { %1874 = vrot.lane.b32.xlu0 %v4989_v62, %s4582_s17 }
 0x1cf   : > { %1498 = vrot.lane.b32.xlu1 %v4967_v48, %s4580_s15 }
 0x1d1   : > { %2016 = vrot.lane.b32.xlu0 %v4989_v62, %s4583_s18 }
 0x1d3   : > { %2152 = vrot.lane.b32.xlu1 %v4952_v25, %s4584_s19 }
 0x1d5   : > { %2158 = vrot.lane.b32.xlu0 %v4989_v62, %s4584_s19 }
 0x1d7   : > { %1734 = vrot.lane.b32.xlu1 %v4967_v48, %s4581_s16 }
 0x1d9   : > { %1500 = vrot.lane.b32.xlu0 %v4983_v37, %s4580_s15 }
 0x1db   : > { %1876 = vrot.lane.b32.xlu1 %v4967_v48, %s4582_s17 }
 0x1dd   : > { %2154 = vrot.lane.b32.xlu0 %v4995_v63, %s4584_s19 }
 0x1df   : > { %2018 = vrot.lane.b32.xlu1 %v4967_v48, %s4583_s18 }
 0x1e1   : > { %2300 = vrot.lane.b32.xlu0 %v4989_v62, %s4585_s20 }
 0x1e3   : > { %2160 = vrot.lane.b32.xlu1 %v4967_v48, %s4584_s19 }
 0x1e5   : > { %2150 = vrot.lane.b32.xlu0 %v4964_v59, %s4584_s19 }
 0x1e7   : > { %2302 = vrot.lane.b32.xlu1 %v4967_v48, %s4585_s20 }
 0x1e9   : > { %1736 = vrot.lane.b32.xlu0 %v4983_v37, %s4581_s16 }
 0x1eb   : > { %2298 = vrot.lane.b32.xlu1 %v4958_v47, %s4585_s20 }
 0x1ed   : > { %2296 = vrot.lane.b32.xlu0 %v4995_v63, %s4585_s20 }
 0x1ef   : > { %2148 = vrot.lane.b32.xlu1 %v4947_v5, %s4584_s19 }
 0x1f1   : > { %2292 = vrot.lane.b32.xlu0 %v4964_v59, %s4585_s20 }
 0x1f3   : > { %2294 = vrot.lane.b32.xlu1 %v4952_v25, %s4585_s20 }
 0x1f5   : > { %1878 = vrot.lane.b32.xlu0 %v4983_v37, %s4582_s17 }
 0x1f7   : > { %2290 = vrot.lane.b32.xlu1 %v4947_v5, %s4585_s20 }
 0x1f9   : > { %2020 = vrot.lane.b32.xlu0 %v4983_v37, %s4583_s18 }
 0x1fb   : > { %2444 = vrot.lane.b32.xlu1 %v4967_v48, %s4586_s21 }
 0x1fd   : > { %2442 = vrot.lane.b32.xlu0 %v4989_v62, %s4586_s21 }
 0x1ff   : > { %2440 = vrot.lane.b32.xlu1 %v4958_v47, %s4586_s21 }
 0x201   : > { %2438 = vrot.lane.b32.xlu0 %v4995_v63, %s4586_s21 }
 0x203   : > { %2586 = vrot.lane.b32.xlu1 %v4967_v48, %s4587_s22 }
 0x205   : > { %2162 = vrot.lane.b32.xlu0 %v4983_v37, %s4584_s19 }
 0x207   : > { %2436 = vrot.lane.b32.xlu1 %v4952_v25, %s4586_s21 }
 0x209   : > { %2304 = vrot.lane.b32.xlu0 %v4983_v37, %s4585_s20 }
 0x20b   : > { %2582 = vrot.lane.b32.xlu1 %v4958_v47, %s4587_s22 }
 0x20d   : > { %2584 = vrot.lane.b32.xlu0 %v4989_v62, %s4587_s22  ;;  %v1487_v50 = vpop.permute.xlu1 %1486 }
 0x20f   : > { %2432 = vrot.lane.b32.xlu1 %v4947_v5, %s4586_s21 }
 0x211   : > { %2434 = vrot.lane.b32.xlu0 %v4964_v59, %s4586_s21  ;;  %v5115_v61 = vpop.permute.xlu1 %1722 }
 0x213   : > { %2578 = vrot.lane.b32.xlu1 %v4952_v25, %s4587_s22 }
 0x215   : > { %2446 = vrot.lane.b32.xlu0 %v4983_v37, %s4586_s21  ;;  %v5121_v4 = vpop.permute.xlu1 %1864 }
 0x217   : > { %v1489_v6 = vpop.permute.xlu0 %1488  ;;  %2574 = vrot.lane.b32.xlu1 %v4947_v5, %s4587_s22 }
 0x218   : > { %v1502_v36 = vsel %vm310_vm1, %v1487_v50, %v1489_v6  ;;  %v4393_v50 = vld [vmem:[%s6109_s3 + $0x50] sm:$0xff] }
 0x219   : > { %2588 = vrot.lane.b32.xlu0 %v4983_v37, %s4587_s22  ;;  %v5130_v42 = vpop.permute.xlu1 %2006 }
 0x21b   : > { %v5132_v52 = vpop.permute.xlu0 %1724  ;;  %2732 = vperm.xlu1 %4529, %v2714_v7  }
 0x21c   : > { %v1738_v62 = vsel %vm536_vm3, %v5115_v61, %v5132_v52 }
 0x21d   : > { %2580 = vrot.lane.b32.xlu0 %v4995_v63, %s4587_s22  ;;  %v1491_v8 = vpop.permute.xlu1 %1490 }
 0x21f   : > { %v5139_v9 = vpop.permute.xlu0 %1866  ;;  %2722 = vperm.xlu1 %4529, %v2712_v55  }
 0x221   : > { %2576 = vrot.lane.b32.xlu0 %v4964_v59, %s4587_s22  ;;  %v5143_v1 = vpop.permute.xlu1 %1726 }
 0x223   : > { %v5148_v54 = vpop.permute.xlu0 %2008 }
 0x225   : > { %2727 = vperm.xlu0 %4528, %v2713_v10   ;;  %v5150_v57 = vpop.permute.xlu1 %1868  ;;  %v4399_v10 = vld [vmem:[%s6109_s3 + $0x60] sm:$0xff] }
 0x227   : > { %v1493_v13 = vpop.permute.xlu0 %1492 }
 0x228   : > { %v1503_v22 = vsel %vm310_vm1, %v1491_v8, %v1493_v13 }
 0x229   : > { %2717 = vperm.xlu0 %4528, %v2711_v12   ;;  %v5155_v14 = vpop.permute.xlu1 %2010 }
 0x22b   : > { %v1729_v5 = vpop.permute.xlu0 %1728 }
 0x22c   : > { %v1739_v60 = vsel %vm536_vm3, %v5143_v1, %v1729_v5  ;;  %v4394_v1 = vld [vmem:[%s6109_s3 + $0x58] sm:$0xff] }
 0x22d   : > { %v1495_v15 = vpop.permute.xlu1 %1494 }
 0x22f   : > { %v5157_v17 = vpop.permute.xlu0 %1870 }
 0x230   : > { %v1881_v55 = vsel %vm663_vm4, %v5150_v57, %v5157_v17  ;;  %v1880_v57 = vsel %vm663_vm4, %v5121_v4, %v5139_v9  ;;  %v4400_v4 = vld [vmem:[%s6109_s3 + $0x68] sm:$0xff] }
 0x231   : > { %v1731_v18 = vpop.permute.xlu1 %1730 }
 0x233   : > { %v5159_v56 = vpop.permute.xlu0 %2012 }
 0x235   : > { %v5161_v19 = vpop.permute.xlu1 %1872 }
 0x237   : > { %v1497_v21 = vpop.permute.xlu0 %1496 }
 0x238   : > { %v1504_v35 = vsel %vm310_vm1, %v1495_v15, %v1497_v21  ;;  %v2023_v15 = vsel %vm790_vm5, %v5155_v14, %v5159_v56  ;;  %v2022_v14 = vsel %vm790_vm5, %v5130_v42, %v5148_v54  ;;  %v4408_v42 = vld [vmem:[%s6109_s3 + $0x88] sm:$0xff] }
 0x239   : > { %v5163_v27 = vpop.permute.xlu1 %2014 }
 0x23b   : > { %v1733_v11 = vpop.permute.xlu0 %1732 }
 0x23c   : > { %v1740_v59 = vsel %vm536_vm3, %v1731_v18, %v1733_v11  ;;  %v4401_v18 = vld [vmem:[%s6109_s3 + $0x70] sm:$0xff] }
 0x23d   : > { %v5165_v28 = vpop.permute.xlu1 %2156 }
 0x23f   : > { %v5167_v29 = vpop.permute.xlu0 %1874 }
 0x241   : > { %v1499_v31 = vpop.permute.xlu1 %1498 }
 0x243   : > { %v5169_v58 = vpop.permute.xlu0 %2016 }
 0x245   : > { %v5171_v16 = vpop.permute.xlu1 %2152 }
 0x247   : > { %v5173_v30 = vpop.permute.xlu0 %2158 }
 0x249   : > { %v1735_v25 = vpop.permute.xlu1 %1734 }
 0x24b   : > { %v1501_v20 = vpop.permute.xlu0 %1500 }
 0x24c   : > { %1551 = vmatprep.subr.mxu1 %v1501_v20  ;;  %v1505_v33 = vsel %vm310_vm1, %v1499_v31, %v1501_v20  ;;  %v4410_v20 = vld [vmem:[%s6109_s3 + $0x98] sm:$0xff] }
 0x24d   : > { %1552 = vmatpush1.msra.mxu1 %v1505_v33  ;;  %v1877_v23 = vpop.permute.xlu1 %1876  ;;  %v4415_v33 = vld [vmem:[%s6109_s3 + $0xa0] sm:$0xff] }
 0x24e   : > { %1553 = vmatprep.subr.mxu1 %v1497_v21  ;;  %v4402_v21 = vld [vmem:[%s6109_s3 + $0x78] sm:$0xff] }
 0x24f   : > { %v5177_v43 = vpop.permute.xlu0 %2154  ;;  %1554 = vmatpush1.msra.mxu1 %v1504_v35 }
 0x250   : > { %1555 = vmatprep.subr.mxu1 %v1493_v13  ;;  %v2024_v13 = vsel %vm790_vm5, %v5163_v27, %v5169_v58 }
 0x251   : > { %1556 = vmatpush1.msra.mxu1 %v1503_v22  ;;  %v2019_v44 = vpop.permute.xlu1 %2018  ;;  %v4416_v22 = vld [vmem:[%s6109_s3 + $0xa8] sm:$0xff] }
 0x252   : > { %1557 = vmatprep.subr.mxu1 %v1489_v6  ;;  %v1882_v6 = vsel %vm663_vm4, %v5161_v19, %v5167_v29 }
 0x253   : > { %v5184_v24 = vpop.permute.xlu0 %2300  ;;  %1558 = vmatpush1.msra.mxu1 %v1502_v36 }
 0x254   : > { %4383 = vmatmul.mubr.msk.f32.vlgmr.msra.gmra.mxu1 %vm1514_vm10, %v4379_v34  ;;  %v4423_v34 = vld [vmem:[%s6109_s3 + $0xc0] sm:$0xff] }
 0x255   : > { %1597 = vmatprep.mubr.f32.mxu1 %v6114_v0  ;;  %v5191_v39 = vpop.permute.xlu1 %2160 }
 0x257   : > { %v5193_v47 = vpop.permute.xlu0 %2150 }
 0x258   : > { %4384 = vmatmul.mubr.msk.f32.gmra.mxu1 %vm1514_vm10, %v4380_v32 }
 0x259   : > { %1603 = vmatprep.mubr.f32.mxu1 %v6114_v0  ;;  %v5200_v49 = vpop.permute.xlu1 %2302 }
 0x25b   : > { %v1737_v26 = vpop.permute.xlu0 %1736 }
 0x25c   : > { %4385 = vmatmul.mubr.msk.f32.gmra.mxu1 %vm1514_vm10, %v4381_v38  ;;  %1786 = vmatprep.subr.mxu1 %v1737_v26  ;;  %v1741_v45 = vsel %vm536_vm3, %v1735_v25, %v1737_v26  ;;  %v4418_v26 = vld [vmem:[%s6109_s3 + $0xb8] sm:$0xff] }
 0x25d   : > { %1787 = vmatpush1.msra.mxu1 %v1741_v45  ;;  %1609 = vmatprep.mubr.f32.mxu1 %v6114_v0  ;;  %v5208_v51 = vpop.permute.xlu1 %2298 }
 0x25e   : > { %1788 = vmatprep.subr.mxu1 %v1733_v11  ;;  %v2166_v11 = vsel %vm917_vm6, %v5165_v28, %v5173_v30  ;;  %v2165_v28 = vsel %vm917_vm6, %v5171_v16, %v5177_v43  ;;  %v2308_v16 = vsel %vm1044_vm7, %v5208_v51, %v5184_v24 }
 0x25f   : > { %v5211_v48 = vpop.permute.xlu0 %2296  ;;  %1789 = vmatpush1.msra.mxu1 %v1740_v59 }
 0x260   : > { %4386 = vmatmul.mubr.msk.f32.gmra.mxu1 %vm1514_vm10, %v4382_v41  ;;  %1790 = vmatprep.subr.mxu1 %v1729_v5  ;;  %v4425_v41 = vld [vmem:[%s6109_s3 + $0xd0] sm:$0xff] }
 0x261   : > { %1791 = vmatpush1.msra.mxu1 %v1739_v60  ;;  %1826 = vmatprep.mubr.f32.mxu1 %v6114_v0  ;;  %v5220_v37 = vpop.permute.xlu1 %2148 }
 0x262   : > { %1792 = vmatprep.subr.mxu1 %v5132_v52  ;;  %v2164_v25 = vsel %vm917_vm6, %v5220_v37, %v5193_v47  ;;  %v4431_v37 = vld [vmem:[%s6109_s3 + $0xe0] sm:$0xff] }
 0x263   : > { %v5226_v63 = vpop.permute.xlu0 %2292  ;;  %1793 = vmatpush1.msra.mxu1 %v1738_v62 }
 0x264   : > { %4395 = vmatmul.mubr.msk.f32.vlgmr.msra.gmra.mxu1 %vm1514_vm10, %v4391_v46  ;;  %v4426_v46 = vld [vmem:[%s6109_s3 + $0xd8] sm:$0xff] }
 0x265   : > { %1832 = vmatprep.mubr.f32.mxu1 %v6114_v0  ;;  %v5233_v53 = vpop.permute.xlu1 %2294 }
 0x267   : > { %v1879_v2 = vpop.permute.xlu0 %1878 }
 0x268   : > { %4396 = vmatmul.mubr.msk.f32.gmra.mxu1 %vm1514_vm10, %v4392_v40  ;;  %1928 = vmatprep.subr.mxu0 %v1879_v2  ;;  %v1883_v3 = vsel %vm663_vm4, %v1877_v23, %v1879_v2  ;;  %v4432_v2 = vld [vmem:[%s6109_s3 + $0xe8] sm:$0xff] }
 0x269   : > { %1929 = vmatpush1.msra.mxu0 %v1883_v3  ;;  %1838 = vmatprep.mubr.f32.mxu1 %v6114_v0  ;;  %v5241_v61 = vpop.permute.xlu1 %2290 }
 0x26a   : > { %1930 = vmatprep.subr.mxu0 %v5167_v29  ;;  %v4409_v29 = vld [vmem:[%s6109_s3 + $0x90] sm:$0xff] }
 0x26b   : > { %v2021_v7 = vpop.permute.xlu0 %2020  ;;  %1931 = vmatpush1.msra.mxu0 %v1882_v6  ;;  %v4440_v6 = vld [vmem:[%s6109_s3 + $0x108] sm:$0xff] }
 0x26c   : > { %4397 = vmatmul.mubr.msk.f32.gmra.mxu1 %vm1514_vm10, %v4393_v50  ;;  %1932 = vmatprep.subr.mxu0 %v5157_v17  ;;  %v2025_v52 = vsel %vm790_vm5, %v2019_v44, %v2021_v7  ;;  %v4407_v17 = vld [vmem:[%s6109_s3 + $0x80] sm:$0xff]  ;;  %v2306_v44 = vsel %vm1044_vm7, %v5241_v61, %v5226_v63  ;;  %v4433_v61 = vld [vmem:[%s6109_s3 + $0xf0] sm:$0xff] }
 0x26d   : > { %2070 = vmatprep.subr.mxu1 %v2021_v7  ;;  %1933 = vmatpush1.msra.mxu0 %v1881_v55  ;;  %v5253_v8 = vpop.permute.xlu1 %2444  ;;  %v4439_v50 = vld [vmem:[%s6109_s3 + $0x100] sm:$0xff]  ;;  %v4434_v7 = vld [vmem:[%s6109_s3 + $0xf8] sm:$0xff] }
 0x26e   : > { %2071 = vmatpush1.msra.mxu1 %v2025_v52  ;;  %1934 = vmatprep.subr.mxu0 %v5139_v9  ;;  %v4441_v52 = vld [vmem:[%s6109_s3 + $0x110] sm:$0xff]  ;;  %v4442_v55 = vld [vmem:[%s6109_s3 + $0x118] sm:$0xff] }
 0x26f   : > { %2072 = vmatprep.subr.mxu1 %v5169_v58  ;;  %v5263_v12 = vpop.permute.xlu0 %2442  ;;  %1844 = vmatprep.mubr.f32.mxu1 %v6114_v0 }
 0x270   : > { %1935 = vmatpush1.msra.mxu0 %v1880_v57  ;;  %2073 = vmatpush1.msra.mxu1 %v2024_v13 }
 0x271   : > { %4398 = vmatmul.mubr.msk.f32.gmra.mxu1 %vm1514_vm10, %v4394_v1  ;;  %4403 = vmatmul.mubr.msk.f32.vlgmr.msra.gmra.mxu0 %vm1514_vm10, %v4399_v10  ;;  %v5274_v5 = vpop.permute.xlu1 %2440 }
 0x272   : > { %2074 = vmatprep.subr.mxu1 %v5159_v56  ;;  %1974 = vmatprep.mubr.f32.mxu0 %v6114_v0 }
 0x273   : > { %2075 = vmatpush1.msra.mxu1 %v2023_v15  ;;  %v5284_v9 = vpop.permute.xlu0 %2438  ;;  %2110 = vmatprep.mubr.f32.mxu1 %v6114_v0 }
 0x274   : > { %2076 = vmatprep.subr.mxu1 %v5148_v54 }
 0x275   : > { %2077 = vmatpush1.msra.mxu1 %v2022_v14  ;;  %4404 = vmatmul.mubr.msk.f32.gmra.mxu0 %vm1514_vm10, %v4400_v4  ;;  %v5300_v56 = vpop.permute.xlu1 %2586 }
 0x276   : > { %4411 = vmatmul.mubr.msk.f32.vlgmr.msra.gmra.mxu1 %vm1514_vm10, %v4407_v17  ;;  %1980 = vmatprep.mubr.f32.mxu0 %v6114_v0 }
 0x277   : > { %v2163_v19 = vpop.permute.xlu0 %2162  ;;  %2116 = vmatprep.mubr.f32.mxu1 %v6114_v0 }
 0x278   : > { %2212 = vmatprep.subr.mxu0 %v2163_v19  ;;  %v2167_v54 = vsel %vm917_vm6, %v5191_v39, %v2163_v19 }
 0x279   : > { %4405 = vmatmul.mubr.msk.f32.gmra.mxu0 %vm1514_vm10, %v4401_v18  ;;  %v2437_v58 = vpop.permute.xlu1 %2436 }
 0x27a   : > { %4412 = vmatmul.mubr.msk.f32.gmra.mxu1 %vm1514_vm10, %v4408_v42  ;;  %2213 = vmatpush1.msra.mxu0 %v2167_v54  ;;  %v2449_v59 = vsel %vm1171_vm8, %v2437_v58, %v5284_v9 }
 0x27b   : > { %2214 = vmatprep.subr.mxu0 %v5173_v30  ;;  %v2305_v27 = vpop.permute.xlu0 %2304  ;;  %1986 = vmatprep.mubr.f32.mxu0 %v6114_v0 }
 0x27c   : > { %2122 = vmatprep.mubr.f32.mxu1 %v6114_v0  ;;  %2215 = vmatpush1.msra.mxu0 %v2166_v11  ;;  %v2309_v31 = vsel %vm1044_vm7, %v5200_v49, %v2305_v27  ;;  %v2450_v49 = vsel %vm1171_vm8, %v5274_v5, %v5263_v12 }
 0x27d   : > { %4406 = vmatmul.mubr.msk.f32.gmra.mxu0 %vm1514_vm10, %v4402_v21  ;;  %2216 = vmatprep.subr.mxu0 %v5177_v43  ;;  %v2583_v23 = vpop.permute.xlu1 %2582  ;;  %v2307_v43 = vsel %vm1044_vm7, %v5233_v53, %v5211_v48 }
 0x27e   : > { %4413 = vmatmul.mubr.msk.f32.gmra.mxu1 %vm1514_vm10, %v4409_v29  ;;  %2354 = vmatprep.subr.mxu1 %v2305_v27 }
 0x27f   : > { %2355 = vmatpush1.msra.mxu1 %v2309_v31  ;;  %2217 = vmatpush1.msra.mxu0 %v2165_v28  ;;  %v2585_v30 = vpop.permute.xlu0 %2584 }
 0x280   : > { %2218 = vmatprep.subr.mxu0 %v5193_v47  ;;  %2356 = vmatprep.subr.mxu1 %v5184_v24  ;;  %v4417_v24 = vld [vmem:[%s6109_s3 + $0xb0] sm:$0xff]  ;;  %v4424_v47 = vld [vmem:[%s6109_s3 + $0xc8] sm:$0xff]  ;;  %v2592_v62 = vsel %vm1298_vm9, %v2583_v23, %v2585_v30 }
 0x281   : > { %2128 = vmatprep.mubr.f32.mxu1 %v6114_v0  ;;  %2219 = vmatpush1.msra.mxu0 %v2164_v25  ;;  %v2433_v32 = vpop.permute.xlu1 %2432 }
 0x282   : > { %2252 = vmatprep.mubr.f32.mxu0 %v6114_v0  ;;  %2357 = vmatpush1.msra.mxu1 %v2308_v16 }
 0x283   : > { %4414 = vmatmul.mubr.msk.f32.gmra.mxu1 %vm1514_vm10, %v4410_v20  ;;  %4419 = vmatmul.mubr.msk.f32.vlgmr.msra.gmra.mxu0 %vm1514_vm10, %v4415_v33  ;;  %v2435_v35 = vpop.permute.xlu0 %2434 }
 0x284   : > { %2358 = vmatprep.subr.mxu1 %v5211_v48  ;;  %2258 = vmatprep.mubr.f32.mxu0 %v6114_v0  ;;  %v2448_v60 = vsel %vm1171_vm8, %v2433_v32, %v2435_v35 }
 0x285   : > { %2359 = vmatpush1.msra.mxu1 %v2307_v43  ;;  %2394 = vmatprep.mubr.f32.mxu1 %v6114_v0  ;;  %v2579_v51 = vpop.permute.xlu1 %2578 }
 0x286   : > { %2360 = vmatprep.subr.mxu1 %v5226_v63 }
 0x287   : > { %2361 = vmatpush1.msra.mxu1 %v2306_v44  ;;  %4420 = vmatmul.mubr.msk.f32.gmra.mxu0 %vm1514_vm10, %v4416_v22  ;;  %v2447_v36 = vpop.permute.xlu0 %2446 }
 0x288   : > { %4427 = vmatmul.mubr.msk.f32.vlgmr.msra.gmra.mxu1 %vm1514_vm10, %v4423_v34  ;;  %2264 = vmatprep.mubr.f32.mxu0 %v6114_v0  ;;  %v2451_v39 = vsel %vm1171_vm8, %v5253_v8, %v2447_v36  ;;  %v1694_v8 = vpop.f32.mrf.mxu0 }
 0x289   : > { %2400 = vmatprep.mubr.f32.mxu1 %v6114_v0  ;;  %2496 = vmatprep.subr.mxu0 %v2447_v36  ;;  %v2575_v53 = vpop.permute.xlu1 %2574 }
 0x28a   : > { %2497 = vmatpush1.msra.mxu0 %v2451_v39 }
 0x28b   : > { %4421 = vmatmul.mubr.msk.f32.gmra.mxu0 %vm1514_vm10, %v4417_v24  ;;  %2498 = vmatprep.subr.mxu0 %v5263_v12  ;;  %v2589_v38 = vpop.permute.xlu0 %2588  ;;  %v1696_v12 = vpop.f32.mrf.mxu0 }
 0x28c   : > { %4428 = vmatmul.mubr.msk.f32.gmra.mxu1 %vm1514_vm10, %v4424_v47  ;;  %2270 = vmatprep.mubr.f32.mxu0 %v6114_v0  ;;  %v2593_v45 = vsel %vm1298_vm9, %v5300_v56, %v2589_v38 }
 0x28d   : > { %2406 = vmatprep.mubr.f32.mxu1 %v6114_v0  ;;  %2499 = vmatpush1.msra.mxu0 %v2450_v49  ;;  %v1700_v5 = vpop.f32.mrf.mxu0 }
 0x28e   : > { %2500 = vmatprep.subr.mxu0 %v5284_v9  ;;  %2638 = vmatprep.subr.mxu1 %v2589_v38 }
 0x28f   : > { %4422 = vmatmul.mubr.msk.f32.gmra.mxu0 %vm1514_vm10, %v4418_v26  ;;  %2639 = vmatpush1.msra.mxu1 %v2593_v45  ;;  %v2581_v48 = vpop.permute.xlu0 %2580  ;;  %v1702_v9 = vpop.f32.mrf.mxu0 }
 0x290   : > { %4429 = vmatmul.mubr.msk.f32.gmra.mxu1 %vm1514_vm10, %v4425_v41  ;;  %2501 = vmatpush1.msra.mxu0 %v2449_v59  ;;  %v2591_v63 = vsel %vm1298_vm9, %v2579_v51, %v2581_v48 }
 0x291   : > { %2502 = vmatprep.subr.mxu0 %v2435_v35  ;;  %2640 = vmatprep.subr.mxu1 %v2585_v30  ;;  %v1706_v18 = vpop.f32.mrf.mxu0 }
 0x292   : > { %2412 = vmatprep.mubr.f32.mxu1 %v6114_v0  ;;  %2503 = vmatpush1.msra.mxu0 %v2448_v60 }
 0x293   : > { %2536 = vmatprep.mubr.f32.mxu0 %v6114_v0  ;;  %2641 = vmatpush1.msra.mxu1 %v2592_v62  ;;  %v2577_v40 = vpop.permute.xlu0 %2576  ;;  %v1708_v42 = vpop.f32.mrf.mxu0 }
 0x294   : > { %4430 = vmatmul.mubr.msk.f32.gmra.mxu1 %vm1514_vm10, %v4426_v46  ;;  %4435 = vmatmul.mubr.msk.f32.vlgmr.msra.gmra.mxu0 %vm1514_vm10, %v4431_v37  ;;  %v2590_v3 = vsel %vm1298_vm9, %v2575_v53, %v2577_v40 }
 0x295   : > { %2642 = vmatprep.subr.mxu1 %v2581_v48  ;;  %2542 = vmatprep.mubr.f32.mxu0 %v6114_v0  ;;  %v1712_v27 = vpop.f32.mrf.mxu0 }
 0x296   : > { %2643 = vmatpush1.msra.mxu1 %v2591_v63  ;;  %2678 = vmatprep.mubr.f32.mxu1 %v6114_v0 }
 0x297   : > { %2644 = vmatprep.subr.mxu1 %v2577_v40  ;;  %v5454_v31 = vpop.f32.mrf.mxu0 }
 0x298   : > { %4436 = vmatmul.mubr.msk.f32.gmra.mxu0 %vm1514_vm10, %v4432_v2  ;;  %2645 = vmatpush1.msra.mxu1 %v2590_v3 }
 0x299   : > { %4443 = vmatmul.mubr.msk.f32.vlgmr.msra.gmra.mxu1 %vm1514_vm10, %v4439_v50  ;;  %2548 = vmatprep.mubr.f32.mxu0 %v6114_v0 }
 0x29a   : > { %2684 = vmatprep.mubr.f32.mxu1 %v6114_v0 }
 0x29c   : > { %4437 = vmatmul.mubr.msk.f32.gmra.mxu0 %vm1514_vm10, %v4433_v61 }
 0x29d   : > { %4444 = vmatmul.mubr.msk.f32.gmra.mxu1 %vm1514_vm10, %v4440_v6  ;;  %2554 = vmatprep.mubr.f32.mxu0 %v6114_v0 }
 0x29e   : > { %2690 = vmatprep.mubr.f32.mxu1 %v6114_v0 }
 0x2a0   : > { %4438 = vmatmul.mubr.msk.f32.gmra.mxu0 %vm1514_vm10, %v4434_v7 }
 0x2a1   : > { %4445 = vmatmul.mubr.msk.f32.gmra.mxu1 %vm1514_vm10, %v4441_v52  ;;  %2889 = vmatprep.mubr.f32.mxu0 %v6114_v0 }
 0x2a2   : > { %2696 = vmatprep.mubr.f32.mxu1 %v6114_v0 }
 0x2a5   : > { %4446 = vmatmul.mubr.msk.f32.gmra.mxu1 %vm1514_vm10, %v4442_v55 }
 0x2a6   : > { %2990 = vmatprep.mubr.f32.mxu1 %v6114_v0 }
 0x314   : > { %v1593_v1 = vpop.f32.mrf.mxu1 }
 0x315   : > { %v1695_v48 = vadd.f32 %v1694_v8, %v1593_v1 }
 0x316   : > { %v1595_v10 = vpop.f32.mrf.mxu1 }
 0x317   : > { %v1697_v37 = vadd.f32 %v1696_v12, %v1595_v10 }
 0x318   : > { %v1599_v57 = vpop.f32.mrf.mxu1 }
 0x319   : > { %v1701_v53 = vadd.f32 %v1700_v5, %v1599_v57 }
 0x31a   : > { %v1601_v13 = vpop.f32.mrf.mxu1 }
 0x31b   : > { %v1703_v6 = vadd.f32 %v1702_v9, %v1601_v13 }
 0x31c   : > { %v1605_v15 = vpop.f32.mrf.mxu1 }
 0x31d   : > { %v1707_v8 = vadd.f32 %v1706_v18, %v1605_v15 }
 0x31e   : > { %v5448_v4 = vpop.f32.mrf.mxu1 }
 0x31f   : > { %v1709_v57 = vadd.f32 %v1708_v42, %v5448_v4 }
 0x320   : > { %v5450_v17 = vpop.f32.mrf.mxu1 }
 0x322   : > { %v5452_v14 = vpop.f32.mrf.mxu1 }
 0x323   : > { %v1715_v4 = vadd.f32 %v5454_v31, %v5452_v14 }
 0x324   : > { %v1828_v56 = vpop.f32.mrf.mxu1 }
 0x325   : > { %v1851_v62 = vadd.f32 %v1828_v56, %v1695_v48  ;;  %v5478_v48 = vpop.permute.xlu0 %2727 }
 0x326   : > { %v1830_v19 = vpop.f32.mrf.mxu1 }
 0x327   : > { %v1852_v2 = vadd.f32 %v1830_v19, %v1697_v37 }
 0x328   : > { %v1834_v54 = vpop.f32.mrf.mxu1 }
 0x329   : > { %v1853_v7 = vadd.f32 %v1834_v54, %v1701_v53 }
 0x32a   : > { %v1836_v21 = vpop.f32.mrf.mxu1 }
 0x32b   : > { %v1854_v1 = vadd.f32 %v1836_v21, %v1703_v6 }
 0x32c   : > { %v1840_v11 = vpop.f32.mrf.mxu1 }
 0x32d   : > { %v1855_v5 = vadd.f32 %v1840_v11, %v1707_v8 }
 0x32e   : > { %v1842_v29 = vpop.f32.mrf.mxu1 }
 0x32f   : > { %v1856_v15 = vadd.f32 %v1842_v29, %v1709_v57 }
 0x331   : > { %v5456_v58 = vpop.f32.mrf.mxu1  ;;  %v1970_v28 = vpop.f32.mrf.mxu0 }
 0x332   : > { %v1993_v3 = vadd.f32 %v1970_v28, %v1851_v62  ;;  %v5482_v62 = vpop.permute.xlu1 %2732 }
 0x333   : > { %v5458_v30 = vpop.f32.mrf.mxu1  ;;  %v1972_v25 = vpop.f32.mrf.mxu0 }
 0x334   : > { %v1994_v52 = vadd.f32 %v1972_v25, %v1852_v2  ;;  %v1713_v25 = vadd.f32 %v1712_v27, %v5450_v17 }
 0x335   : > { %v1976_v20 = vpop.f32.mrf.mxu0 }
 0x336   : > { %v2112_v33 = vpop.f32.mrf.mxu1  ;;  %v1857_v42 = vadd.f32 %v5456_v58, %v1713_v25 }
 0x337   : > { %v1978_v16 = vpop.f32.mrf.mxu0  ;;  %v2135_v55 = vadd.f32 %v2112_v33, %v1993_v3 }
 0x338   : > { %v2114_v23 = vpop.f32.mrf.mxu1  ;;  %v1996_v19 = vadd.f32 %v1978_v16, %v1854_v1 }
 0x339   : > { %v1982_v35 = vpop.f32.mrf.mxu0 }
 0x33a   : > { %v2118_v43 = vpop.f32.mrf.mxu1  ;;  %v1997_v18 = vadd.f32 %v1982_v35, %v1855_v5 }
 0x33b   : > { %v1984_v22 = vpop.f32.mrf.mxu0 }
 0x33c   : > { %v2120_v34 = vpop.f32.mrf.mxu1  ;;  %v1998_v11 = vadd.f32 %v1984_v22, %v1856_v15 }
 0x33d   : > { %v5460_v44 = vpop.f32.mrf.mxu0 }
 0x33e   : > { %v2124_v36 = vpop.f32.mrf.mxu1 }
 0x33f   : > { %v5462_v24 = vpop.f32.mrf.mxu0  ;;  %v2139_v16 = vadd.f32 %v2124_v36, %v1997_v18 }
 0x340   : > { %v5464_v32 = vpop.f32.mrf.mxu1 }
 0x343   : > { %v5466_v39 = vpop.f32.mrf.mxu1  ;;  %v2254_v47 = vpop.f32.mrf.mxu0 }
 0x344   : > { %v2277_v10 = vadd.f32 %v2254_v47, %v2135_v55 }
 0x345   : > { %v5468_v38 = vpop.f32.mrf.mxu1  ;;  %v2256_v49 = vpop.f32.mrf.mxu0 }
 0x346   : > { %6117 = vst [vmem:[#allocation7_spill] sm:$0xff] %v5468_v38  ;;  %v1995_v38 = vadd.f32 %v1976_v20, %v1853_v7  ;;  %v2138_v20 = vadd.f32 %v2120_v34, %v1996_v19  ;;  %v2718_v34 = vpop.permute.xlu0 %2717 }
 0x347   : > { %v2260_v26 = vpop.f32.mrf.mxu0 }
 0x348   : > { %v2396_v45 = vpop.f32.mrf.mxu1  ;;  %v2137_v28 = vadd.f32 %v2118_v43, %v1995_v38 }
 0x349   : > { %v2262_v41 = vpop.f32.mrf.mxu0  ;;  %v2419_v9 = vadd.f32 %v2396_v45, %v2277_v10  ;;  %v2140_v45 = vadd.f32 %v5464_v32, %v1998_v11 }
 0x34a   : > { %v2398_v51 = vpop.f32.mrf.mxu1  ;;  %v2279_v33 = vadd.f32 %v2260_v26, %v2137_v28  ;;  %v2280_v38 = vadd.f32 %v2262_v41, %v2138_v20  ;;  %v1999_v26 = vadd.f32 %v5460_v44, %v1857_v42 }
 0x34b   : > { %v2266_v59 = vpop.f32.mrf.mxu0 }
 0x34c   : > { %v2402_v60 = vpop.f32.mrf.mxu1 }
 0x34d   : > { %v5470_v46 = vpop.f32.mrf.mxu0  ;;  %v2421_v17 = vadd.f32 %v2402_v60, %v2279_v33  ;;  %v2141_v60 = vadd.f32 %v5466_v39, %v1999_v26  ;;  %v2762_v26 = vld [vmem:[#allocation4 + $0x10] sm:$0xff] }
 0x34e   : > { %6118 = vst [vmem:[#allocation8_spill] sm:$0xff] %v5470_v46  ;;  %v2404_v63 = vpop.f32.mrf.mxu1  ;;  %v2136_v46 = vadd.f32 %v2114_v23, %v1994_v52  ;;  %v2723_v52 = vpop.permute.xlu1 %2722 }
 0x34f   : > { %v5472_v40 = vpop.f32.mrf.mxu0  ;;  %v2422_v14 = vadd.f32 %v2404_v63, %v2280_v38  ;;  %v6120_v63 = vld [vmem:[#allocation7_spill] sm:$0xff] }
 0x350   : > { %v2408_v50 = vpop.f32.mrf.mxu1  ;;  %v2278_v13 = vadd.f32 %v2256_v49, %v2136_v46  ;;  %v1858_v49 = vadd.f32 %v5458_v30, %v1715_v4  ;;  %v2283_v8 = vadd.f32 %v5472_v40, %v2141_v60 }
 0x351   : > { %v5474_v61 = vpop.f32.mrf.mxu0 }
 0x352   : > { %v2410_v0 = vpop.f32.mrf.mxu1  ;;  %v2420_v23 = vadd.f32 %v2398_v51, %v2278_v13  ;;  %v2281_v51 = vadd.f32 %v2266_v59, %v2139_v16  ;;  %v2000_v41 = vadd.f32 %v5462_v24, %v1858_v49  ;;  %v2761_v49 = vld [vmem:[#allocation4 + $0x8] sm:$0xff] }
 0x354   : > { %v5476_v12 = vpop.f32.mrf.mxu1  ;;  %v2538_v56 = vpop.f32.mrf.mxu0  ;;  %v2423_v3 = vadd.f32 %v2408_v50, %v2281_v51  ;;  %v2142_v55 = vadd.f32 %v6120_v63, %v2000_v41  ;;  %v4011_v41 = vld [vmem:[%s6112_s6 + $0x10] sm:$0xff] }
 0x355   : > { %v2561_v47 = vadd.f32 %v2538_v56, %v2419_v9  ;;  %v6119_v53 = vld [vmem:[#allocation8_spill] sm:$0xff]  ;;  %v2425_v19 = vadd.f32 %v5476_v12, %v2283_v8 }
 0x356   : > { %v2540_v54 = vpop.f32.mrf.mxu0  ;;  %v2416_v21 = vpop.f32.mrf.mxu1  ;;  %v2282_v2 = vadd.f32 %v6119_v53, %v2140_v45  ;;  %v2284_v5 = vadd.f32 %v5474_v61, %v2142_v55  ;;  %v2763_v45 = vld [vmem:[#allocation4 + $0x18] sm:$0xff] }
 0x357   : > { %v2562_v27 = vadd.f32 %v2540_v54, %v2420_v23 }
 0x358   : > { %v2544_v37 = vpop.f32.mrf.mxu0  ;;  %v2424_v1 = vadd.f32 %v2410_v0, %v2282_v2  ;;  %v2426_v54 = vadd.f32 %v2416_v21, %v2284_v5 }
 0x359   : > { %v2680_v43 = vpop.f32.mrf.mxu1  ;;  %v2563_v31 = vadd.f32 %v2544_v37, %v2421_v17 }
 0x35a   : > { %v2546_v29 = vpop.f32.mrf.mxu0  ;;  %v2703_v35 = vadd.f32 %v2680_v43, %v2561_v47 }
 0x35b   : > { %v2682_v46 = vpop.f32.mrf.mxu1  ;;  %v2564_v30 = vadd.f32 %v2546_v29, %v2422_v14 }
 0x35c   : > { %v2735_v58 = vadd.f32 %v2718_v34, %v2703_v35  ;;  %v2550_v22 = vpop.f32.mrf.mxu0  ;;  %v2704_v36 = vadd.f32 %v2682_v46, %v2562_v27  ;;  %v2760_v35 = vld [vmem:[#allocation4] sm:$0xff] }
 0x35d   : > { %v2686_v6 = vpop.f32.mrf.mxu1  ;;  %v2565_v10 = vadd.f32 %v2550_v22, %v2423_v3  ;;  %v4010_v3 = vld [vmem:[%s6112_s6 + $0x8] sm:$0xff] }
 0x35e   : > { %v5493_v7 = vmax.f32 %v2735_v58, 0.0  ;;  %v2736_v44 = vadd.f32 %v2718_v34, %v2704_v36  ;;  %v2552_v32 = vpop.f32.mrf.mxu0  ;;  %v2705_v59 = vadd.f32 %v2686_v6, %v2563_v31  ;;  %v6121_v34 = vmov 0.0   ;;  %v4009_v58 = vld [vmem:[%s6112_s6] sm:$0xff] }
 0x35f   : > { %v2688_v24 = vpop.f32.mrf.mxu1  ;;  %v2566_v13 = vadd.f32 %v2552_v32, %v2424_v1 }
 0x360   : > { %v2744_v39 = vmax.f32 %v2736_v44, 0.0  ;;  %v2737_v56 = vadd.f32 %v2723_v52, %v2705_v59  ;;  %v2556_v57 = vpop.f32.mrf.mxu0  ;;  %v2706_v50 = vadd.f32 %v2688_v24, %v2564_v30  ;;  %2785 = vrot.lane.b32.xlu1 %v5493_v7, %s4580_s15 }
 0x361   : > { %v2692_v28 = vpop.f32.mrf.mxu1  ;;  %v2567_v18 = vadd.f32 %v2556_v57, %v2425_v19 }
 0x362   : > { %2753 = vst.msk [vmem:[#allocation3 + $0x8] sm:$0xff] %vm2752_vm11, %v2744_v39  ;;  %v5502_v40 = vmax.f32 %v2737_v56, 0.0  ;;  %v2738_v0 = vadd.f32 %v2723_v52, %v2706_v50  ;;  %v2707_v9 = vadd.f32 %v2692_v28, %v2565_v10  ;;  %v2558_v25 = vpop.f32.mrf.mxu0 }
 0x363   : > { %v2694_v15 = vpop.f32.mrf.mxu1  ;;  %v2568_v12 = vadd.f32 %v2558_v25, %v2426_v54 }
 0x364   : > { %v2746_v20 = vmax.f32 %v2738_v0, 0.0  ;;  %v2739_v33 = vadd.f32 %v5478_v48, %v2707_v9  ;;  %v2708_v23 = vadd.f32 %v2694_v15, %v2566_v13  ;;  %3020 = vrot.lane.b32.xlu1 %v5493_v7, %s4581_s16 }
 0x365   : > { %v2698_v61 = vpop.f32.mrf.mxu1 }
 0x366   : > { %2755 = vst.msk [vmem:[#allocation3 + $0x18] sm:$0xff] %vm2752_vm11, %v2746_v20  ;;  %v5508_v47 = vmax.f32 %v2739_v33, 0.0  ;;  %v2740_v37 = vadd.f32 %v5478_v48, %v2708_v23  ;;  %v2709_v4 = vadd.f32 %v2698_v61, %v2567_v18  ;;  %v2773_v18 = vld [vmem:[#allocation4 + $0x20] sm:$0xff]  ;;  %v2774_v61 = vld [vmem:[#allocation4 + $0x28] sm:$0xff] }
 0x367   : > { %v2700_v21 = vpop.f32.mrf.mxu1 }
 0x368   : > { %v2748_v42 = vmax.f32 %v2740_v37, 0.0  ;;  %v2741_v11 = vadd.f32 %v5482_v62, %v2709_v4  ;;  %v2710_v16 = vadd.f32 %v2700_v21, %v2568_v12  ;;  %3162 = vrot.lane.b32.xlu1 %v5493_v7, %s4582_s17  ;;  %v2775_v37 = vld [vmem:[#allocation4 + $0x30] sm:$0xff] }
 0x369   : > { %v5514_v43 = vld [vmem:[#allocation3 + $0x8] sm:$0xff] }
 0x36a   : > { %2757 = vst.msk [vmem:[#allocation3 + $0x28] sm:$0xff] %vm2752_vm11, %v2748_v42  ;;  %v5517_v38 = vmax.f32 %v2741_v11, 0.0  ;;  %v2742_v17 = vadd.f32 %v5482_v62, %v2710_v16  ;;  %2787 = vrot.lane.b32.xlu0 %v5514_v43, %s4580_s15  ;;  %v2776_v11 = vld [vmem:[#allocation4 + $0x38] sm:$0xff] }
 0x36c   : > { %v2750_v48 = vmax.f32 %v2742_v17, 0.0  ;;  %3304 = vrot.lane.b32.xlu1 %v5493_v7, %s4583_s18 }
 0x36d   : > { %v5545_v29 = vld [vmem:[#allocation3 + $0x18] sm:$0xff] }
 0x36e   : > { %2759 = vst.msk [vmem:[#allocation3 + $0x38] sm:$0xff] %vm2752_vm11, %v2750_v48  ;;  %3022 = vrot.lane.b32.xlu0 %v5514_v43, %s4581_s16  ;;  %v3016_v48 = vld [vmem:[#allocation4 + $0x40] sm:$0xff] }
 0x370   : > { %2789 = vrot.lane.b32.xlu1 %v5502_v40, %s4580_s15 }
 0x371   : > { %v5539_v27 = vld [vmem:[#allocation3 + $0x28] sm:$0xff] }
 0x372   : > { %3164 = vrot.lane.b32.xlu0 %v5514_v43, %s4582_s17 }
 0x374   : > { %3024 = vrot.lane.b32.xlu1 %v5502_v40, %s4581_s16 }
 0x375   : > { %v5533_v62 = vld [vmem:[#allocation3 + $0x38] sm:$0xff] }
 0x376   : > { %2950 = vmatprep.subr.mxu1 %v5533_v62  ;;  %3306 = vrot.lane.b32.xlu0 %v5514_v43, %s4583_s18 }
 0x377   : > { %2951 = vmatpush1.msra.mxu1 %v5517_v38 }
 0x378   : > { %2952 = vmatprep.subr.mxu1 %v5539_v27  ;;  %3166 = vrot.lane.b32.xlu1 %v5502_v40, %s4582_s17 }
 0x379   : > { %2953 = vmatpush1.msra.mxu1 %v5508_v47 }
 0x37a   : > { %2954 = vmatprep.subr.mxu1 %v5545_v29  ;;  %2791 = vrot.lane.b32.xlu0 %v5545_v29, %s4580_s15 }
 0x37b   : > { %2955 = vmatpush1.msra.mxu1 %v5502_v40 }
 0x37c   : > { %2956 = vmatprep.subr.mxu1 %v5514_v43  ;;  %3308 = vrot.lane.b32.xlu1 %v5502_v40, %s4583_s18 }
 0x37d   : > { %2957 = vmatpush1.msra.mxu1 %v5493_v7 }
 0x37e   : > { %3026 = vrot.lane.b32.xlu0 %v5545_v29, %s4581_s16  ;;  %4451 = vmatmul.mubr.msk.f32.vlgmr.msra.gmra.mxu1 %vm1514_vm10, %v2760_v35  ;;  %v3017_v35 = vld [vmem:[#allocation4 + $0x48] sm:$0xff] }
 0x37f   : > { %2996 = vmatprep.mubr.f32.mxu1 %v6121_v34 }
 0x380   : > { %2793 = vrot.lane.b32.xlu1 %v5508_v47, %s4580_s15 }
 0x382   : > { %3168 = vrot.lane.b32.xlu0 %v5545_v29, %s4582_s17  ;;  %4452 = vmatmul.mubr.msk.f32.gmra.mxu1 %vm1514_vm10, %v2761_v49 }
 0x383   : > { %3002 = vmatprep.mubr.f32.mxu1 %v6121_v34 }
 0x384   : > { %3028 = vrot.lane.b32.xlu1 %v5508_v47, %s4581_s16 }
 0x386   : > { %3310 = vrot.lane.b32.xlu0 %v5545_v29, %s4583_s18  ;;  %4453 = vmatmul.mubr.msk.f32.gmra.mxu1 %vm1514_vm10, %v2762_v26 }
 0x387   : > { %3008 = vmatprep.mubr.f32.mxu1 %v6121_v34 }
 0x388   : > { %3170 = vrot.lane.b32.xlu1 %v5508_v47, %s4582_s17 }
 0x38a   : > { %2795 = vrot.lane.b32.xlu0 %v5539_v27, %s4580_s15  ;;  %4454 = vmatmul.mubr.msk.f32.gmra.mxu1 %vm1514_vm10, %v2763_v45 }
 0x38b   : > { %3266 = vmatprep.mubr.f32.mxu1 %v6121_v34 }
 0x38c   : > { %3312 = vrot.lane.b32.xlu1 %v5508_v47, %s4583_s18 }
 0x38e   : > { %3030 = vrot.lane.b32.xlu0 %v5539_v27, %s4581_s16 }
 0x390   : > { %3454 = vrot.lane.b32.xlu1 %v5508_v47, %s4584_s19 }
 0x392   : > { %3172 = vrot.lane.b32.xlu0 %v5539_v27, %s4582_s17 }
 0x394   : > { %2797 = vrot.lane.b32.xlu1 %v5517_v38, %s4580_s15 }
 0x396   : > { %3314 = vrot.lane.b32.xlu0 %v5539_v27, %s4583_s18 }
 0x398   : > { %3450 = vrot.lane.b32.xlu1 %v5502_v40, %s4584_s19 }
 0x39a   : > { %3456 = vrot.lane.b32.xlu0 %v5539_v27, %s4584_s19 }
 0x39c   : > { %3032 = vrot.lane.b32.xlu1 %v5517_v38, %s4581_s16 }
 0x39e   : > { %2799 = vrot.lane.b32.xlu0 %v5533_v62, %s4580_s15 }
 0x3a0   : > { %3174 = vrot.lane.b32.xlu1 %v5517_v38, %s4582_s17 }
 0x3a2   : > { %3452 = vrot.lane.b32.xlu0 %v5545_v29, %s4584_s19 }
 0x3a4   : > { %3316 = vrot.lane.b32.xlu1 %v5517_v38, %s4583_s18 }
 0x3a6   : > { %3598 = vrot.lane.b32.xlu0 %v5539_v27, %s4585_s20 }
 0x3a8   : > { %3458 = vrot.lane.b32.xlu1 %v5517_v38, %s4584_s19 }
 0x3aa   : > { %3448 = vrot.lane.b32.xlu0 %v5514_v43, %s4584_s19 }
 0x3ac   : > { %3600 = vrot.lane.b32.xlu1 %v5517_v38, %s4585_s20 }
 0x3ae   : > { %3034 = vrot.lane.b32.xlu0 %v5533_v62, %s4581_s16 }
 0x3b0   : > { %3596 = vrot.lane.b32.xlu1 %v5508_v47, %s4585_s20 }
 0x3b2   : > { %3594 = vrot.lane.b32.xlu0 %v5545_v29, %s4585_s20 }
 0x3b4   : > { %3446 = vrot.lane.b32.xlu1 %v5493_v7, %s4584_s19 }
 0x3b6   : > { %3590 = vrot.lane.b32.xlu0 %v5514_v43, %s4585_s20 }
 0x3b8   : > { %3592 = vrot.lane.b32.xlu1 %v5502_v40, %s4585_s20 }
 0x3ba   : > { %3176 = vrot.lane.b32.xlu0 %v5533_v62, %s4582_s17 }
 0x3bc   : > { %3588 = vrot.lane.b32.xlu1 %v5493_v7, %s4585_s20 }
 0x3be   : > { %3318 = vrot.lane.b32.xlu0 %v5533_v62, %s4583_s18 }
 0x3c0   : > { %3742 = vrot.lane.b32.xlu1 %v5517_v38, %s4586_s21 }
 0x3c2   : > { %3740 = vrot.lane.b32.xlu0 %v5539_v27, %s4586_s21 }
 0x3c4   : > { %3738 = vrot.lane.b32.xlu1 %v5508_v47, %s4586_s21 }
 0x3c6   : > { %3736 = vrot.lane.b32.xlu0 %v5545_v29, %s4586_s21 }
 0x3c8   : > { %3884 = vrot.lane.b32.xlu1 %v5517_v38, %s4587_s22 }
 0x3ca   : > { %3460 = vrot.lane.b32.xlu0 %v5533_v62, %s4584_s19 }
 0x3cc   : > { %3734 = vrot.lane.b32.xlu1 %v5502_v40, %s4586_s21 }
 0x3ce   : > { %3602 = vrot.lane.b32.xlu0 %v5533_v62, %s4585_s20 }
 0x3d0   : > { %3880 = vrot.lane.b32.xlu1 %v5508_v47, %s4587_s22 }
 0x3d2   : > { %3882 = vrot.lane.b32.xlu0 %v5539_v27, %s4587_s22  ;;  %v2786_v51 = vpop.permute.xlu1 %2785 }
 0x3d4   : > { %3730 = vrot.lane.b32.xlu1 %v5493_v7, %s4586_s21 }
 0x3d6   : > { %3732 = vrot.lane.b32.xlu0 %v5514_v43, %s4586_s21  ;;  %v5653_v46 = vpop.permute.xlu1 %3020 }
 0x3d8   : > { %3876 = vrot.lane.b32.xlu1 %v5502_v40, %s4587_s22 }
 0x3da   : > { %3744 = vrot.lane.b32.xlu0 %v5533_v62, %s4586_s21  ;;  %v5659_v14 = vpop.permute.xlu1 %3162 }
 0x3dc   : > { %v2788_v31 = vpop.permute.xlu0 %2787  ;;  %3872 = vrot.lane.b32.xlu1 %v5493_v7, %s4587_s22  ;;  %v4012_v7 = vld [vmem:[%s6112_s6 + $0x18] sm:$0xff] }
 0x3dd   : > { %v2801_v33 = vsel %vm310_vm1, %v2786_v51, %v2788_v31  ;;  %v3018_v51 = vld [vmem:[#allocation4 + $0x50] sm:$0xff] }
 0x3de   : > { %3886 = vrot.lane.b32.xlu0 %v5533_v62, %s4587_s22  ;;  %v5668_v22 = vpop.permute.xlu1 %3304 }
 0x3e0   : > { %v5670_v36 = vpop.permute.xlu0 %3022  ;;  %4015 = vperm.xlu1 %4529, %v4009_v58  }
 0x3e1   : > { %v3036_v27 = vsel %vm536_vm3, %v5653_v46, %v5670_v36 }
 0x3e2   : > { %3878 = vrot.lane.b32.xlu0 %v5545_v29, %s4587_s22  ;;  %v2790_v60 = vpop.permute.xlu1 %2789 }
 0x3e4   : > { %v5677_v53 = vpop.permute.xlu0 %3164  ;;  %4025 = vperm.xlu1 %4529, %v4011_v41  }
 0x3e6   : > { %3874 = vrot.lane.b32.xlu0 %v5514_v43, %s4587_s22  ;;  %v5681_v2 = vpop.permute.xlu1 %3024  ;;  %s4486_s22 = sshll.u32 %s6123_s25, 5 }
 0x3e7   : > { %s5945_s25 = scalar_lea.vmem %s6113_s7, %s4486_s22 }
 0x3e8   : > { %v5686_v6 = vpop.permute.xlu0 %3306 }
 0x3ea   : > { %4020 = vperm.xlu0 %4528, %v4010_v3   ;;  %v5688_v30 = vpop.permute.xlu1 %3166  ;;  %v3158_v3 = vld [vmem:[#allocation4 + $0x60] sm:$0xff] }
 0x3ec   : > { %v2792_v44 = vpop.permute.xlu0 %2791 }
 0x3ed   : > { %v2802_v15 = vsel %vm310_vm1, %v2790_v60, %v2792_v44 }
 0x3ee   : > { %4030 = vperm.xlu0 %4528, %v4012_v7   ;;  %v5693_v32 = vpop.permute.xlu1 %3308 }
 0x3f0   : > { %v3027_v59 = vpop.permute.xlu0 %3026 }
 0x3f1   : > { %v3037_v17 = vsel %vm536_vm3, %v5681_v2, %v3027_v59  ;;  %v3019_v2 = vld [vmem:[#allocation4 + $0x58] sm:$0xff] }
 0x3f2   : > { %v2794_v52 = vpop.permute.xlu1 %2793 }
 0x3f4   : > { %v5695_v63 = vpop.permute.xlu0 %3168 }
 0x3f6   : > { %v3029_v55 = vpop.permute.xlu1 %3028 }
 0x3f8   : > { %v5697_v8 = vpop.permute.xlu0 %3310 }
 0x3fa   : > { %v5699_v1 = vpop.permute.xlu1 %3170 }
 0x3fc   : > { %v2796_v24 = vpop.permute.xlu0 %2795 }
 0x3fd   : > { %v2803_v54 = vsel %vm310_vm1, %v2794_v52, %v2796_v24  ;;  %v3321_v52 = vsel %vm790_vm5, %v5693_v32, %v5697_v8  ;;  %v3160_v32 = vld [vmem:[#allocation4 + $0x70] sm:$0xff] }
 0x3fe   : > { %v5701_v10 = vpop.permute.xlu1 %3312 }
 0x400   : > { %v3031_v39 = vpop.permute.xlu0 %3030 }
 0x401   : > { %v3038_v43 = vsel %vm536_vm3, %v3029_v55, %v3031_v39 }
 0x402   : > { %v5703_v56 = vpop.permute.xlu1 %3454 }
 0x404   : > { %v5705_v57 = vpop.permute.xlu0 %3172 }
 0x406   : > { %v2798_v50 = vpop.permute.xlu1 %2797 }
 0x408   : > { %v5707_v5 = vpop.permute.xlu0 %3314 }
 0x409   : > { %v3322_v7 = vsel %vm790_vm5, %v5701_v10, %v5707_v5 }
 0x40a   : > { %v5709_v19 = vpop.permute.xlu1 %3450 }
 0x40c   : > { %v5711_v28 = vpop.permute.xlu0 %3456 }
 0x40e   : > { %v3033_v13 = vpop.permute.xlu1 %3032 }
 0x410   : > { %v2800_v40 = vpop.permute.xlu0 %2799 }
 0x411   : > { %v2804_v0 = vsel %vm310_vm1, %v2798_v50, %v2800_v40  ;;  %2849 = vmatprep.subr.mxu0 %v2800_v40  ;;  %v3303_v40 = vld [vmem:[#allocation4 + $0x98] sm:$0xff]  ;;  %vm4138_vm1 = vcmask 490896  }
 0x412   : > { %2850 = vmatpush1.msra.mxu0 %v2804_v0  ;;  %v3175_v9 = vpop.permute.xlu1 %3174  ;;  %v3442_v0 = vld [vmem:[#allocation4 + $0xa0] sm:$0xff] }
 0x413   : > { %2851 = vmatprep.subr.mxu0 %v2796_v24  ;;  %v3301_v24 = vld [vmem:[#allocation4 + $0x88] sm:$0xff] }
 0x414   : > { %v5715_v25 = vpop.permute.xlu0 %3452  ;;  %2852 = vmatpush1.msra.mxu0 %v2803_v54 }
 0x415   : > { %2853 = vmatprep.subr.mxu0 %v2792_v44  ;;  %v3178_v44 = vsel %vm663_vm4, %v5659_v14, %v5677_v53  ;;  %v3300_v14 = vld [vmem:[#allocation4 + $0x80] sm:$0xff] }
 0x416   : > { %2854 = vmatpush1.msra.mxu0 %v2802_v15  ;;  %v3317_v20 = vpop.permute.xlu1 %3316  ;;  %v3443_v15 = vld [vmem:[#allocation4 + $0xa8] sm:$0xff] }
 0x417   : > { %2855 = vmatprep.subr.mxu0 %v2788_v31  ;;  %v3180_v31 = vsel %vm663_vm4, %v5699_v1, %v5705_v57 }
 0x418   : > { %v5719_v23 = vpop.permute.xlu0 %3598  ;;  %2856 = vmatpush1.msra.mxu0 %v2801_v33 }
 0x419   : > { %4447 = vmatmul.mubr.msk.f32.vlgmr.msra.gmra.mxu0 %vm1514_vm10, %v2773_v18  ;;  %v3584_v18 = vld [vmem:[#allocation4 + $0xc0] sm:$0xff] }
 0x41a   : > { %2895 = vmatprep.mubr.f32.mxu0 %v6121_v34  ;;  %v5723_v12 = vpop.permute.xlu1 %3458 }
 0x41c   : > { %v5725_v47 = vpop.permute.xlu0 %3448 }
 0x41d   : > { %4448 = vmatmul.mubr.msk.f32.gmra.mxu0 %vm1514_vm10, %v2774_v61  ;;  %v3444_v61 = vld [vmem:[#allocation4 + $0xb0] sm:$0xff] }
 0x41e   : > { %2901 = vmatprep.mubr.f32.mxu0 %v6121_v34  ;;  %v5729_v4 = vpop.permute.xlu1 %3600 }
 0x420   : > { %v3035_v21 = vpop.permute.xlu0 %3034 }
 0x421   : > { %v3039_v42 = vsel %vm536_vm3, %v3033_v13, %v3035_v21  ;;  %4449 = vmatmul.mubr.msk.f32.gmra.mxu0 %vm1514_vm10, %v2775_v37  ;;  %3084 = vmatprep.subr.mxu0 %v3035_v21  ;;  %vm4172_vm3 = vcmask 654896  }
 0x422   : > { %3085 = vmatpush1.msra.mxu0 %v3039_v42  ;;  %2907 = vmatprep.mubr.f32.mxu0 %v6121_v34  ;;  %v5734_v16 = vpop.permute.xlu1 %3596  ;;  %v3445_v42 = vld [vmem:[#allocation4 + $0xb8] sm:$0xff] }
 0x423   : > { %3086 = vmatprep.subr.mxu0 %v3031_v39 }
 0x424   : > { %v5737_v38 = vpop.permute.xlu0 %3594  ;;  %3087 = vmatpush1.msra.mxu0 %v3038_v43 }
 0x425   : > { %4450 = vmatmul.mubr.msk.f32.gmra.mxu0 %vm1514_vm10, %v2776_v11  ;;  %3088 = vmatprep.subr.mxu0 %v3027_v59  ;;  %v3586_v11 = vld [vmem:[#allocation4 + $0xd0] sm:$0xff] }
 0x426   : > { %3089 = vmatpush1.msra.mxu0 %v3037_v17  ;;  %3124 = vmatprep.mubr.f32.mxu0 %v6121_v34  ;;  %v5743_v62 = vpop.permute.xlu1 %3446 }
 0x427   : > { %3090 = vmatprep.subr.mxu0 %v5670_v36  ;;  %v3179_v36 = vsel %vm663_vm4, %v5688_v30, %v5695_v63  ;;  %v3462_v13 = vsel %vm917_vm6, %v5743_v62, %v5725_v47  ;;  %v3726_v62 = vld [vmem:[#allocation4 + $0xe0] sm:$0xff] }
 0x428   : > { %v5749_v29 = vpop.permute.xlu0 %3590  ;;  %3091 = vmatpush1.msra.mxu0 %v3036_v27 }
 0x429   : > { %4455 = vmatmul.mubr.msk.f32.vlgmr.msra.gmra.mxu0 %vm1514_vm10, %v3016_v48  ;;  %v3587_v48 = vld [vmem:[#allocation4 + $0xd8] sm:$0xff] }
 0x42a   : > { %3130 = vmatprep.mubr.f32.mxu0 %v6121_v34  ;;  %v5753_v49 = vpop.permute.xlu1 %3592 }
 0x42c   : > { %v3177_v26 = vpop.permute.xlu0 %3176 }
 0x42d   : > { %v3181_v45 = vsel %vm663_vm4, %v3175_v9, %v3177_v26  ;;  %4456 = vmatmul.mubr.msk.f32.gmra.mxu0 %vm1514_vm10, %v3017_v35  ;;  %3226 = vmatprep.subr.mxu1 %v3177_v26  ;;  %vm4193_vm4 = vcmask 736896  }
 0x42e   : > { %3227 = vmatpush1.msra.mxu1 %v3181_v45  ;;  %3136 = vmatprep.mubr.f32.mxu0 %v6121_v34  ;;  %v5758_v46 = vpop.permute.xlu1 %3588  ;;  %v3727_v45 = vld [vmem:[#allocation4 + $0xe8] sm:$0xff] }
 0x42f   : > { %3228 = vmatprep.subr.mxu1 %v5705_v57  ;;  %v3302_v57 = vld [vmem:[#allocation4 + $0x90] sm:$0xff] }
 0x430   : > { %v3319_v58 = vpop.permute.xlu0 %3318  ;;  %3229 = vmatpush1.msra.mxu1 %v3180_v31  ;;  %v3869_v31 = vld [vmem:[#allocation4 + $0x108] sm:$0xff] }
 0x431   : > { %v3323_v41 = vsel %vm790_vm5, %v3317_v20, %v3319_v58  ;;  %4457 = vmatmul.mubr.msk.f32.gmra.mxu0 %vm1514_vm10, %v3018_v51  ;;  %3230 = vmatprep.subr.mxu1 %v5695_v63  ;;  %v3159_v63 = vld [vmem:[#allocation4 + $0x68] sm:$0xff]  ;;  %v3604_v20 = vsel %vm1044_vm7, %v5758_v46, %v5749_v29  ;;  %v3868_v51 = vld [vmem:[#allocation4 + $0x100] sm:$0xff]  ;;  %v3728_v46 = vld [vmem:[#allocation4 + $0xf0] sm:$0xff] }
 0x432   : > { %3368 = vmatprep.subr.mxu0 %v3319_v58  ;;  %3231 = vmatpush1.msra.mxu1 %v3179_v36  ;;  %v5770_v60 = vpop.permute.xlu1 %3742  ;;  %v3729_v58 = vld [vmem:[#allocation4 + $0xf8] sm:$0xff]  ;;  %v3870_v36 = vld [vmem:[#allocation4 + $0x110] sm:$0xff] }
 0x433   : > { %3369 = vmatpush1.msra.mxu0 %v3323_v41  ;;  %3232 = vmatprep.subr.mxu1 %v5677_v53  ;;  %v3320_v53 = vsel %vm790_vm5, %v5668_v22, %v5686_v6  ;;  %v3161_v22 = vld [vmem:[#allocation4 + $0x78] sm:$0xff]  ;;  %vm4210_vm5 = vcmask 818896  }
 0x434   : > { %3370 = vmatprep.subr.mxu0 %v5707_v5  ;;  %v5777_v30 = vpop.permute.xlu0 %3740  ;;  %3142 = vmatprep.mubr.f32.mxu0 %v6121_v34  ;;  %v3871_v41 = vld [vmem:[#allocation4 + $0x118] sm:$0xff] }
 0x435   : > { %3233 = vmatpush1.msra.mxu1 %v3178_v44  ;;  %3371 = vmatpush1.msra.mxu0 %v3322_v7 }
 0x436   : > { %4458 = vmatmul.mubr.msk.f32.gmra.mxu0 %vm1514_vm10, %v3019_v2  ;;  %4459 = vmatmul.mubr.msk.f32.vlgmr.msra.gmra.mxu1 %vm1514_vm10, %v3158_v3  ;;  %v5785_v59 = vpop.permute.xlu1 %3738 }
 0x437   : > { %3372 = vmatprep.subr.mxu0 %v5697_v8  ;;  %3272 = vmatprep.mubr.f32.mxu1 %v6121_v34 }
 0x438   : > { %3373 = vmatpush1.msra.mxu0 %v3321_v52  ;;  %v5792_v55 = vpop.permute.xlu0 %3736  ;;  %3408 = vmatprep.mubr.f32.mxu0 %v6121_v34 }
 0x439   : > { %3374 = vmatprep.subr.mxu0 %v5686_v6  ;;  %v3464_v6 = vsel %vm917_vm6, %v5703_v56, %v5711_v28  ;;  %v3463_v56 = vsel %vm917_vm6, %v5709_v19, %v5715_v25  ;;  %v3606_v19 = vsel %vm1044_vm7, %v5734_v16, %v5719_v23 }
 0x43a   : > { %3375 = vmatpush1.msra.mxu0 %v3320_v53  ;;  %4460 = vmatmul.mubr.msk.f32.gmra.mxu1 %vm1514_vm10, %v3159_v63  ;;  %v5802_v8 = vpop.permute.xlu1 %3884 }
 0x43b   : > { %4463 = vmatmul.mubr.msk.f32.vlgmr.msra.gmra.mxu0 %vm1514_vm10, %v3300_v14  ;;  %3278 = vmatprep.mubr.f32.mxu1 %v6121_v34 }
 0x43c   : > { %v3461_v1 = vpop.permute.xlu0 %3460  ;;  %3414 = vmatprep.mubr.f32.mxu0 %v6121_v34 }
 0x43d   : > { %v3465_v10 = vsel %vm917_vm6, %v5723_v12, %v3461_v1  ;;  %3510 = vmatprep.subr.mxu1 %v3461_v1 }
 0x43e   : > { %4461 = vmatmul.mubr.msk.f32.gmra.mxu1 %vm1514_vm10, %v3160_v32  ;;  %v3735_v5 = vpop.permute.xlu1 %3734 }
 0x43f   : > { %4464 = vmatmul.mubr.msk.f32.gmra.mxu0 %vm1514_vm10, %v3301_v24  ;;  %3511 = vmatpush1.msra.mxu1 %v3465_v10  ;;  %v3747_v43 = vsel %vm1171_vm8, %v3735_v5, %v5792_v55 }
 0x440   : > { %3512 = vmatprep.subr.mxu1 %v5711_v28  ;;  %v3603_v39 = vpop.permute.xlu0 %3602  ;;  %3284 = vmatprep.mubr.f32.mxu1 %v6121_v34 }
 0x441   : > { %v3607_v50 = vsel %vm1044_vm7, %v5729_v4, %v3603_v39  ;;  %3420 = vmatprep.mubr.f32.mxu0 %v6121_v34  ;;  %3513 = vmatpush1.msra.mxu1 %v3464_v6  ;;  %v3748_v4 = vsel %vm1171_vm8, %v5785_v59, %v5777_v30 }
 0x442   : > { %4462 = vmatmul.mubr.msk.f32.gmra.mxu1 %vm1514_vm10, %v3161_v22  ;;  %3514 = vmatprep.subr.mxu1 %v5715_v25  ;;  %v3881_v9 = vpop.permute.xlu1 %3880  ;;  %v3605_v25 = vsel %vm1044_vm7, %v5753_v49, %v5737_v38 }
 0x443   : > { %4465 = vmatmul.mubr.msk.f32.gmra.mxu0 %vm1514_vm10, %v3302_v57  ;;  %3652 = vmatprep.subr.mxu0 %v3603_v39 }
 0x444   : > { %3653 = vmatpush1.msra.mxu0 %v3607_v50  ;;  %3515 = vmatpush1.msra.mxu1 %v3463_v56  ;;  %v3883_v28 = vpop.permute.xlu0 %3882 }
 0x445   : > { %3516 = vmatprep.subr.mxu1 %v5725_v47  ;;  %3654 = vmatprep.subr.mxu0 %v5719_v23  ;;  %v3585_v47 = vld [vmem:[#allocation4 + $0xc8] sm:$0xff]  ;;  %v3890_v27 = vsel %vm1298_vm9, %v3881_v9, %v3883_v28 }
 0x446   : > { %3426 = vmatprep.mubr.f32.mxu0 %v6121_v34  ;;  %3517 = vmatpush1.msra.mxu1 %v3462_v13  ;;  %v3731_v12 = vpop.permute.xlu1 %3730 }
 0x447   : > { %3550 = vmatprep.mubr.f32.mxu1 %v6121_v34  ;;  %3655 = vmatpush1.msra.mxu0 %v3606_v19 }
 0x448   : > { %4466 = vmatmul.mubr.msk.f32.gmra.mxu0 %vm1514_vm10, %v3303_v40  ;;  %4467 = vmatmul.mubr.msk.f32.vlgmr.msra.gmra.mxu1 %vm1514_vm10, %v3442_v0  ;;  %v3733_v54 = vpop.permute.xlu0 %3732 }
 0x449   : > { %3656 = vmatprep.subr.mxu0 %v5737_v38  ;;  %3556 = vmatprep.mubr.f32.mxu1 %v6121_v34  ;;  %v3746_v17 = vsel %vm1171_vm8, %v3731_v12, %v3733_v54 }
 0x44a   : > { %3657 = vmatpush1.msra.mxu0 %v3605_v25  ;;  %3692 = vmatprep.mubr.f32.mxu0 %v6121_v34  ;;  %v3877_v16 = vpop.permute.xlu1 %3876 }
 0x44b   : > { %3658 = vmatprep.subr.mxu0 %v5749_v29 }
 0x44c   : > { %3659 = vmatpush1.msra.mxu0 %v3604_v20  ;;  %4468 = vmatmul.mubr.msk.f32.gmra.mxu1 %vm1514_vm10, %v3443_v15  ;;  %v3745_v33 = vpop.permute.xlu0 %3744 }
 0x44d   : > { %4471 = vmatmul.mubr.msk.f32.vlgmr.msra.gmra.mxu0 %vm1514_vm10, %v3584_v18  ;;  %v3749_v23 = vsel %vm1171_vm8, %v5770_v60, %v3745_v33  ;;  %3562 = vmatprep.mubr.f32.mxu1 %v6121_v34  ;;  %v2992_v60 = vpop.f32.mrf.mxu1 }
 0x44e   : > { %3698 = vmatprep.mubr.f32.mxu0 %v6121_v34  ;;  %3794 = vmatprep.subr.mxu1 %v3745_v33  ;;  %v3873_v49 = vpop.permute.xlu1 %3872 }
 0x44f   : > { %3795 = vmatpush1.msra.mxu1 %v3749_v23  ;;  %v5888_v2 = vpop.f32.mrf.mxu1 }
 0x450   : > { %4469 = vmatmul.mubr.msk.f32.gmra.mxu1 %vm1514_vm10, %v3444_v61  ;;  %3796 = vmatprep.subr.mxu1 %v5777_v30  ;;  %v3887_v37 = vpop.permute.xlu0 %3886 }
 0x451   : > { %4472 = vmatmul.mubr.msk.f32.gmra.mxu0 %vm1514_vm10, %v3585_v47  ;;  %v3891_v21 = vsel %vm1298_vm9, %v5802_v8, %v3887_v37  ;;  %3568 = vmatprep.mubr.f32.mxu1 %v6121_v34  ;;  %v2998_v3 = vpop.f32.mrf.mxu1 }
 0x452   : > { %3704 = vmatprep.mubr.f32.mxu0 %v6121_v34  ;;  %3797 = vmatpush1.msra.mxu1 %v3748_v4 }
 0x453   : > { %3798 = vmatprep.subr.mxu1 %v5792_v55  ;;  %3936 = vmatprep.subr.mxu0 %v3887_v37  ;;  %v5890_v7 = vpop.f32.mrf.mxu1 }
 0x454   : > { %4470 = vmatmul.mubr.msk.f32.gmra.mxu1 %vm1514_vm10, %v3445_v42  ;;  %3937 = vmatpush1.msra.mxu0 %v3891_v21  ;;  %v3879_v38 = vpop.permute.xlu0 %3878 }
 0x455   : > { %4473 = vmatmul.mubr.msk.f32.gmra.mxu0 %vm1514_vm10, %v3586_v11  ;;  %3799 = vmatpush1.msra.mxu1 %v3747_v43  ;;  %v3889_v29 = vsel %vm1298_vm9, %v3877_v16, %v3879_v38  ;;  %v5892_v44 = vpop.f32.mrf.mxu1 }
 0x456   : > { %3800 = vmatprep.subr.mxu1 %v3733_v54  ;;  %3938 = vmatprep.subr.mxu0 %v3883_v28 }
 0x457   : > { %3710 = vmatprep.mubr.f32.mxu0 %v6121_v34  ;;  %3801 = vmatpush1.msra.mxu1 %v3746_v17  ;;  %v3006_v63 = vpop.f32.mrf.mxu1 }
 0x458   : > { %3834 = vmatprep.mubr.f32.mxu1 %v6121_v34  ;;  %3939 = vmatpush1.msra.mxu0 %v3890_v27  ;;  %v3875_v35 = vpop.permute.xlu0 %3874 }
 0x459   : > { %4474 = vmatmul.mubr.msk.f32.gmra.mxu0 %vm1514_vm10, %v3587_v48  ;;  %4475 = vmatmul.mubr.msk.f32.vlgmr.msra.gmra.mxu1 %vm1514_vm10, %v3726_v62  ;;  %v3888_v26 = vsel %vm1298_vm9, %v3873_v49, %v3875_v35 }
 0x45a   : > { %3940 = vmatprep.subr.mxu0 %v3879_v38  ;;  %3840 = vmatprep.mubr.f32.mxu1 %v6121_v34 }
 0x45b   : > { %3941 = vmatpush1.msra.mxu0 %v3889_v29  ;;  %3976 = vmatprep.mubr.f32.mxu0 %v6121_v34 }
 0x45c   : > { %3942 = vmatprep.subr.mxu0 %v3875_v35 }
 0x45d   : > { %4476 = vmatmul.mubr.msk.f32.gmra.mxu1 %vm1514_vm10, %v3727_v45  ;;  %3943 = vmatpush1.msra.mxu0 %v3888_v26 }
 0x45e   : > { %4479 = vmatmul.mubr.msk.f32.vlgmr.msra.gmra.mxu0 %vm1514_vm10, %v3868_v51  ;;  %3846 = vmatprep.mubr.f32.mxu1 %v6121_v34 }
 0x45f   : > { %3982 = vmatprep.mubr.f32.mxu0 %v6121_v34 }
 0x461   : > { %4477 = vmatmul.mubr.msk.f32.gmra.mxu1 %vm1514_vm10, %v3728_v46 }
 0x462   : > { %4480 = vmatmul.mubr.msk.f32.gmra.mxu0 %vm1514_vm10, %v3869_v31  ;;  %3852 = vmatprep.mubr.f32.mxu1 %v6121_v34 }
 0x463   : > { %3988 = vmatprep.mubr.f32.mxu0 %v6121_v34 }
 0x465   : > { %4478 = vmatmul.mubr.msk.f32.gmra.mxu1 %vm1514_vm10, %v3729_v58 }
 0x466   : > { %4481 = vmatmul.mubr.msk.f32.gmra.mxu0 %vm1514_vm10, %v3870_v36 }
 0x467   : > { %3994 = vmatprep.mubr.f32.mxu0 %v6121_v34  ;;  %v5898_v34 = vpop.f32.mrf.mxu1 }
 0x469   : > { %v3012_v8 = vpop.f32.mrf.mxu1 }
 0x46a   : > { %4482 = vmatmul.mubr.msk.f32.gmra.mxu0 %vm1514_vm10, %v3871_v41 }
 0x4d9   : > { %v2891_v30 = vpop.f32.mrf.mxu0 }
 0x4da   : > { %v2993_v49 = vadd.f32 %v2992_v60, %v2891_v30 }
 0x4db   : > { %v5894_v59 = vpop.f32.mrf.mxu0 }
 0x4dd   : > { %v2897_v52 = vpop.f32.mrf.mxu0 }
 0x4de   : > { %v2999_v36 = vadd.f32 %v2998_v3, %v2897_v52 }
 0x4df   : > { %v5896_v55 = vpop.f32.mrf.mxu0 }
 0x4e1   : > { %v2903_v14 = vpop.f32.mrf.mxu0 }
 0x4e3   : > { %v2905_v53 = vpop.f32.mrf.mxu0 }
 0x4e4   : > { %v3007_v50 = vadd.f32 %v3006_v63, %v2905_v53 }
 0x4e5   : > { %v5900_v32 = vpop.f32.mrf.mxu0 }
 0x4e7   : > { %v2911_v1 = vpop.f32.mrf.mxu0 }
 0x4e8   : > { %v3013_v24 = vadd.f32 %v3012_v8, %v2911_v1 }
 0x4e9   : > { %v3126_v10 = vpop.f32.mrf.mxu0 }
 0x4ea   : > { %v3149_v51 = vadd.f32 %v3126_v10, %v2993_v49 }
 0x4eb   : > { %v5902_v22 = vpop.f32.mrf.mxu0 }
 0x4ed   : > { %v3132_v6 = vpop.f32.mrf.mxu0 }
 0x4ee   : > { %v3151_v8 = vadd.f32 %v3132_v6, %v2999_v36  ;;  %v3011_v6 = vadd.f32 %v5898_v34, %v5900_v32 }
 0x4ef   : > { %v5904_v39 = vpop.f32.mrf.mxu0 }
 0x4f1   : > { %v3138_v57 = vpop.f32.mrf.mxu0 }
 0x4f3   : > { %v3140_v5 = vpop.f32.mrf.mxu0 }
 0x4f4   : > { %v3154_v56 = vadd.f32 %v3140_v5, %v3007_v50 }
 0x4f6   : > { %v5906_v28 = vpop.f32.mrf.mxu0  ;;  %v3268_v13 = vpop.f32.mrf.mxu1 }
 0x4f7   : > { %v3291_v41 = vadd.f32 %v3268_v13, %v3149_v51 }
 0x4f8   : > { %v3146_v40 = vpop.f32.mrf.mxu0  ;;  %v5908_v0 = vpop.f32.mrf.mxu1 }
 0x4f9   : > { %v3156_v19 = vadd.f32 %v3146_v40, %v3013_v24 }
 0x4fa   : > { %v3274_v9 = vpop.f32.mrf.mxu1 }
 0x4fb   : > { %v3410_v54 = vpop.f32.mrf.mxu0  ;;  %v3293_v60 = vadd.f32 %v3274_v9, %v3151_v8  ;;  %v3155_v9 = vadd.f32 %v5906_v28, %v3011_v6 }
 0x4fc   : > { %v5910_v25 = vpop.f32.mrf.mxu1  ;;  %v3433_v1 = vadd.f32 %v3410_v54, %v3291_v41 }
 0x4fd   : > { %v5912_v15 = vpop.f32.mrf.mxu0 }
 0x4fe   : > { %v3280_v18 = vpop.f32.mrf.mxu1 }
 0x4ff   : > { %v3416_v20 = vpop.f32.mrf.mxu0 }
 0x500   : > { %v3282_v33 = vpop.f32.mrf.mxu1 }
 0x501   : > { %v3296_v23 = vadd.f32 %v3282_v33, %v3154_v56  ;;  %v5914_v61 = vpop.f32.mrf.mxu0  ;;  %v3005_v56 = vadd.f32 %v5892_v44, %v2903_v14  ;;  %v3435_v33 = vadd.f32 %v3416_v20, %v3293_v60 }
 0x502   : > { %v3286_v12 = vpop.f32.mrf.mxu1 }
 0x503   : > { %v3422_v47 = vpop.f32.mrf.mxu0 }
 0x504   : > { %v3288_v37 = vpop.f32.mrf.mxu1 }
 0x505   : > { %v3298_v4 = vadd.f32 %v3288_v37, %v3156_v19  ;;  %v3424_v21 = vpop.f32.mrf.mxu0  ;;  %v3153_v19 = vadd.f32 %v3138_v57, %v3005_v56 }
 0x506   : > { %v3438_v42 = vadd.f32 %v3424_v21, %v3296_v23 }
 0x507   : > { %v3295_v54 = vadd.f32 %v3280_v18, %v3153_v19 }
 0x508   : > { %v3428_v11 = vpop.f32.mrf.mxu0  ;;  %v3552_v16 = vpop.f32.mrf.mxu1 }
 0x509   : > { %v3575_v30 = vadd.f32 %v3552_v16, %v3433_v1  ;;  %v3437_v21 = vadd.f32 %v3422_v47, %v3295_v54  ;;  %v5937_v16 = vpop.permute.xlu1 %4015 }
 0x50a   : > { %v3430_v43 = vpop.f32.mrf.mxu0  ;;  %v5916_v38 = vpop.f32.mrf.mxu1 }
 0x50b   : > { %v3440_v17 = vadd.f32 %v3430_v43, %v3298_v4 }
 0x50c   : > { %v3558_v48 = vpop.f32.mrf.mxu1 }
 0x50d   : > { %v3694_v62 = vpop.f32.mrf.mxu0  ;;  %v3577_v37 = vadd.f32 %v3558_v48, %v3435_v33  ;;  %v5952_v1 = vpop.permute.xlu1 %4025 }
 0x50e   : > { %v5918_v27 = vpop.f32.mrf.mxu1  ;;  %v3717_v23 = vadd.f32 %v3694_v62, %v3575_v30 }
 0x50f   : > { %v5920_v29 = vpop.f32.mrf.mxu0 }
 0x510   : > { %v3564_v35 = vpop.f32.mrf.mxu1 }
 0x511   : > { %v3700_v26 = vpop.f32.mrf.mxu0  ;;  %v3579_v62 = vadd.f32 %v3564_v35, %v3437_v21 }
 0x512   : > { %v3566_v45 = vpop.f32.mrf.mxu1  ;;  %v3719_v57 = vadd.f32 %v3700_v26, %v3577_v37 }
 0x513   : > { %v3580_v46 = vadd.f32 %v3566_v45, %v3438_v42  ;;  %v5922_v31 = vpop.f32.mrf.mxu0 }
 0x514   : > { %v3570_v58 = vpop.f32.mrf.mxu1 }
 0x515   : > { %v3706_v63 = vpop.f32.mrf.mxu0 }
 0x516   : > { %v3572_v53 = vpop.f32.mrf.mxu1  ;;  %v3721_v48 = vadd.f32 %v3706_v63, %v3579_v62 }
 0x517   : > { %v3582_v24 = vadd.f32 %v3572_v53, %v3440_v17  ;;  %v3708_v50 = vpop.f32.mrf.mxu0  ;;  %v3297_v17 = vadd.f32 %v3286_v12, %v3155_v9  ;;  %v4021_v12 = vpop.permute.xlu0 %4020 }
 0x518   : > { %v5924_v5 = vadd.f32 %v3708_v50, %v3580_v46 }
 0x519   : > { %v3712_v10 = vpop.f32.mrf.mxu0  ;;  %v3836_v40 = vpop.f32.mrf.mxu1  ;;  %v3439_v47 = vadd.f32 %v3428_v11, %v3297_v17 }
 0x51a   : > { %v3859_v4 = vadd.f32 %v3836_v40, %v3717_v23 }
 0x51b   : > { %v3714_v3 = vpop.f32.mrf.mxu0  ;;  %v5927_v52 = vpop.f32.mrf.mxu1  ;;  %v3581_v51 = vadd.f32 %v3570_v58, %v3439_v47  ;;  %v2995_v58 = vadd.f32 %v5888_v2, %v5894_v59  ;;  %v3001_v2 = vadd.f32 %v5890_v7, %v5896_v55 }
 0x51c   : > { %v5929_v13 = vadd.f32 %v3714_v3, %v3582_v24  ;;  %v5966_v19 = vpop.permute.xlu0 %4030 }
 0x51d   : > { %v3842_v44 = vpop.f32.mrf.mxu1  ;;  %v3723_v8 = vadd.f32 %v3712_v10, %v3581_v51  ;;  %v3150_v30 = vadd.f32 %v5902_v22, %v2995_v58  ;;  %v3152_v22 = vadd.f32 %v5904_v39, %v3001_v2 }
 0x51e   : > { %v3978_v14 = vpop.f32.mrf.mxu0  ;;  %v3861_v34 = vadd.f32 %v3842_v44, %v3719_v57 }
 0x51f   : > { %v5935_v20 = vpop.f32.mrf.mxu1  ;;  %v4001_v42 = vadd.f32 %v3978_v14, %v3859_v4  ;;  %v3292_v59 = vadd.f32 %v5908_v0, %v3150_v30  ;;  %v3294_v6 = vadd.f32 %v5910_v25, %v3152_v22 }
 0x520   : > { %v5939_v43 = vpop.f32.mrf.mxu0 }
 0x521   : > { %v4033_v32 = vadd.f32 %v5937_v16, %v4001_v42  ;;  %v3848_v18 = vpop.f32.mrf.mxu1  ;;  %v3434_v23 = vadd.f32 %v5912_v15, %v3292_v59  ;;  %v3436_v55 = vadd.f32 %v5914_v61, %v3294_v6 }
 0x522   : > { %v3984_v28 = vpop.f32.mrf.mxu0  ;;  %v3863_v46 = vadd.f32 %v3848_v18, %v3721_v48 }
 0x523   : > { %v4041_v49 = vmax.f32 %v4033_v32, 0.0  ;;  %v5947_v26 = vpop.f32.mrf.mxu1  ;;  %v4003_v45 = vadd.f32 %v3984_v28, %v3861_v34  ;;  %v3576_v7 = vadd.f32 %v5916_v38, %v3434_v23  ;;  %v3578_v39 = vadd.f32 %v5918_v27, %v3436_v55 }
 0x524   : > { %v3986_v35 = vpop.f32.mrf.mxu0  ;;  %v3864_v37 = vadd.f32 %v5947_v26, %v5924_v5 }
 0x525   : > { %v4035_v36 = vadd.f32 %v4021_v12, %v4003_v45  ;;  %4058 = vrot.lane.b32.xlu1 %v4041_v49, %s4589_s10  ;;  %4050 = vst.msk [vmem:[%s5945_s25] sm:$0xff] %vm4049_vm12, %v4041_v49  ;;  %v3854_v41 = vpop.f32.mrf.mxu1  ;;  %v3718_v0 = vadd.f32 %v5920_v29, %v3576_v7  ;;  %v3720_v25 = vadd.f32 %v5922_v31, %v3578_v39 }
 0x526   : > { %v3990_v53 = vpop.f32.mrf.mxu0  ;;  %v3865_v50 = vadd.f32 %v3854_v41, %v3723_v8 }
 0x527   : > { %v4043_v11 = vmax.f32 %v4035_v36, 0.0  ;;  %v4005_v63 = vadd.f32 %v3990_v53, %v3863_v46  ;;  %v3860_v15 = vadd.f32 %v5927_v52, %v3718_v0  ;;  %v3862_v54 = vadd.f32 %v5935_v20, %v3720_v25  ;;  %v3856_v4 = vpop.f32.mrf.mxu1 }
 0x528   : > { %v5954_v24 = vpop.f32.mrf.mxu0  ;;  %v3866_v9 = vadd.f32 %v3856_v4, %v5929_v13 }
 0x529   : > { %v4037_v56 = vadd.f32 %v5952_v1, %v4005_v63  ;;  %4060 = vrot.lane.b32.xlu0 %v4043_v11, %s4589_s10  ;;  %4075 = vrot.lane.b32.xlu1 %v4041_v49, %s4590_s11  ;;  %4051 = vst.msk [vmem:[%s5945_s25 + $0x8] sm:$0xff] %vm4049_vm12, %v4043_v11  ;;  %v4002_v38 = vadd.f32 %v5939_v43, %v3860_v15 }
 0x52a   : > { %v3996_v60 = vpop.f32.mrf.mxu0  ;;  %v4004_v27 = vadd.f32 %v3986_v35, %v3862_v54  ;;  %v4006_v44 = vadd.f32 %v5954_v24, %v3864_v37 }
 0x52b   : > { %v5964_v10 = vmax.f32 %v4037_v56, 0.0  ;;  %v4007_v40 = vadd.f32 %v3996_v60, %v3865_v50  ;;  %v4034_v61 = vadd.f32 %v5937_v16, %v4002_v38 }
 0x52c   : > { %v4036_v52 = vadd.f32 %v4021_v12, %v4004_v27  ;;  %v3998_v14 = vpop.f32.mrf.mxu0  ;;  %v4038_v21 = vadd.f32 %v5952_v1, %v4006_v44 }
 0x52d   : > { %v4039_v33 = vadd.f32 %v5966_v19, %v4007_v40  ;;  %4077 = vrot.lane.b32.xlu0 %v4043_v11, %s4590_s11  ;;  %4092 = vrot.lane.b32.xlu1 %v4041_v49, %s4584_s19  ;;  %4052 = vst.msk [vmem:[%s5945_s25 + $0x10] sm:$0xff] %vm4049_vm12, %v5964_v10  ;;  %v4042_v29 = vmax.f32 %v4034_v61, 0.0  ;;  %v4008_v5 = vadd.f32 %v3998_v14, %v3866_v9 }
 0x52e   : > { %v4044_v31 = vmax.f32 %v4036_v52, 0.0  ;;  %v4046_v57 = vmax.f32 %v4038_v21, 0.0 }
 0x52f   : > { %v4047_v3 = vmax.f32 %v4039_v33, 0.0  ;;  %v4040_v20 = vadd.f32 %v5966_v19, %v4008_v5 }
 0x531   : > { %4094 = vrot.lane.b32.xlu0 %v4043_v11, %s4584_s19  ;;  %4109 = vrot.lane.b32.xlu1 %v4041_v49, %s4591_s12  ;;  %4053 = vst.msk [vmem:[%s5945_s25 + $0x18] sm:$0xff] %vm4049_vm12, %v4047_v3  ;;  %v4048_v13 = vmax.f32 %v4040_v20, 0.0 }
 0x535   : > { %4111 = vrot.lane.b32.xlu0 %v4043_v11, %s4591_s12  ;;  %4126 = vrot.lane.b32.xlu1 %v4041_v49, %s4592_s13 }
 0x539   : > { %4128 = vrot.lane.b32.xlu0 %v4043_v11, %s4592_s13  ;;  %4143 = vrot.lane.b32.xlu1 %v4041_v49, %s4593_s14 }
 0x53d   : > { %4145 = vrot.lane.b32.xlu0 %v4043_v11, %s4593_s14  ;;  %4160 = vrot.lane.b32.xlu1 %v4041_v49, %s4594_s23 }
 0x541   : > { %4162 = vrot.lane.b32.xlu0 %v4043_v11, %s4594_s23  ;;  %4181 = vrot.lane.b32.xlu1 %v4042_v29, %s4595_s26 }
 0x545   : > { %4183 = vrot.lane.b32.xlu0 %v4044_v31, %s4595_s26  ;;  %4198 = vrot.lane.b32.xlu1 %v4042_v29, %s4596_s27 }
 0x549   : > { %4200 = vrot.lane.b32.xlu0 %v4044_v31, %s4596_s27  ;;  %4062 = vrot.lane.b32.xlu1 %v5964_v10, %s4589_s10 }
 0x54d   : > { %4064 = vrot.lane.b32.xlu0 %v4047_v3, %s4589_s10  ;;  %4079 = vrot.lane.b32.xlu1 %v5964_v10, %s4590_s11 }
 0x551   : > { %4081 = vrot.lane.b32.xlu0 %v4047_v3, %s4590_s11  ;;  %4096 = vrot.lane.b32.xlu1 %v5964_v10, %s4584_s19 }
 0x555   : > { %4098 = vrot.lane.b32.xlu0 %v4047_v3, %s4584_s19  ;;  %4113 = vrot.lane.b32.xlu1 %v5964_v10, %s4591_s12 }
 0x559   : > { %4115 = vrot.lane.b32.xlu0 %v4047_v3, %s4591_s12  ;;  %4130 = vrot.lane.b32.xlu1 %v5964_v10, %s4592_s13 }
 0x55d   : > { %4132 = vrot.lane.b32.xlu0 %v4047_v3, %s4592_s13  ;;  %4147 = vrot.lane.b32.xlu1 %v5964_v10, %s4593_s14 }
 0x561   : > { %4149 = vrot.lane.b32.xlu0 %v4047_v3, %s4593_s14  ;;  %4164 = vrot.lane.b32.xlu1 %v5964_v10, %s4594_s23 }
 0x565   : > { %4166 = vrot.lane.b32.xlu0 %v4047_v3, %s4594_s23  ;;  %4185 = vrot.lane.b32.xlu1 %v4046_v57, %s4595_s26 }
 0x569   : > { %4187 = vrot.lane.b32.xlu0 %v4048_v13, %s4595_s26  ;;  %4202 = vrot.lane.b32.xlu1 %v4046_v57, %s4596_s27 }
 0x56d   : > { %4204 = vrot.lane.b32.xlu0 %v4048_v13, %s4596_s27 }
 0x597   : > { %v4059_v42 = vpop.permute.xlu1 %4058 }
 0x598   : > { %4071 = vst.msk [vmem:[%s5945_s25] sm:$0xff] %vm4070_vm13, %v4059_v42 }
 0x59b   : > { %v4061_v16 = vpop.permute.xlu0 %4060  ;;  %v4076_v43 = vpop.permute.xlu1 %4075 }
 0x59c   : > { %4072 = vst.msk [vmem:[%s5945_s25 + $0x8] sm:$0xff] %vm4070_vm13, %v4061_v16 }
 0x59d   : > { %4088 = vst.msk [vmem:[%s5945_s25] sm:$0xff] %vm4087_vm14, %v4076_v43 }
 0x59f   : > { %v4078_v17 = vpop.permute.xlu0 %4077  ;;  %v4093_v62 = vpop.permute.xlu1 %4092 }
 0x5a0   : > { %4089 = vst.msk [vmem:[%s5945_s25 + $0x8] sm:$0xff] %vm4087_vm14, %v4078_v17 }
 0x5a1   : > { %4105 = vst.msk [vmem:[%s5945_s25] sm:$0xff] %vm4104_vm15, %v4093_v62 }
 0x5a3   : > { %v4095_v34 = vpop.permute.xlu0 %4094  ;;  %v4110_v32 = vpop.permute.xlu1 %4109 }
 0x5a4   : > { %4106 = vst.msk [vmem:[%s5945_s25 + $0x8] sm:$0xff] %vm4104_vm15, %v4095_v34 }
 0x5a5   : > { %4122 = vst.msk [vmem:[%s5945_s25] sm:$0xff] %vm4121_vm0, %v4110_v32 }
 0x5a7   : > { %v4112_v18 = vpop.permute.xlu0 %4111  ;;  %v4127_v28 = vpop.permute.xlu1 %4126 }
 0x5a8   : > { %4123 = vst.msk [vmem:[%s5945_s25 + $0x8] sm:$0xff] %vm4121_vm0, %v4112_v18 }
 0x5a9   : > { %4139 = vst.msk [vmem:[%s5945_s25] sm:$0xff] %vm4138_vm1, %v4127_v28 }
 0x5ab   : > { %v4129_v47 = vpop.permute.xlu0 %4128  ;;  %v4144_v48 = vpop.permute.xlu1 %4143 }
 0x5ac   : > { %4140 = vst.msk [vmem:[%s5945_s25 + $0x8] sm:$0xff] %vm4138_vm1, %v4129_v47 }
 0x5ad   : > { %4156 = vst.msk [vmem:[%s5945_s25] sm:$0xff] %vm4155_vm2, %v4144_v48 }
 0x5af   : > { %v4146_v49 = vpop.permute.xlu0 %4145  ;;  %v4161_v26 = vpop.permute.xlu1 %4160 }
 0x5b0   : > { %4157 = vst.msk [vmem:[%s5945_s25 + $0x8] sm:$0xff] %vm4155_vm2, %v4146_v49 }
 0x5b1   : > { %4173 = vst.msk [vmem:[%s5945_s25] sm:$0xff] %vm4172_vm3, %v4161_v26 }
 0x5b3   : > { %v4163_v45 = vpop.permute.xlu0 %4162  ;;  %v4182_v12 = vpop.permute.xlu1 %4181 }
 0x5b4   : > { %4174 = vst.msk [vmem:[%s5945_s25 + $0x8] sm:$0xff] %vm4172_vm3, %v4163_v45 }
 0x5b5   : > { %4194 = vst.msk [vmem:[%s5945_s25] sm:$0xff] %vm4193_vm4, %v4182_v12 }
 0x5b7   : > { %v4184_v35 = vpop.permute.xlu0 %4183  ;;  %v4199_v51 = vpop.permute.xlu1 %4198 }
 0x5b8   : > { %4195 = vst.msk [vmem:[%s5945_s25 + $0x8] sm:$0xff] %vm4193_vm4, %v4184_v35 }
 0x5b9   : > { %4211 = vst.msk [vmem:[%s5945_s25] sm:$0xff] %vm4210_vm5, %v4199_v51 }
 0x5bb   : > { %v4201_v46 = vpop.permute.xlu0 %4200  ;;  %v4063_v36 = vpop.permute.xlu1 %4062 }
 0x5bc   : > { %4212 = vst.msk [vmem:[%s5945_s25 + $0x8] sm:$0xff] %vm4210_vm5, %v4201_v46 }
 0x5bd   : > { %4073 = vst.msk [vmem:[%s5945_s25 + $0x10] sm:$0xff] %vm4070_vm13, %v4063_v36 }
 0x5bf   : > { %v4065_v41 = vpop.permute.xlu0 %4064  ;;  %v4080_v53 = vpop.permute.xlu1 %4079 }
 0x5c0   : > { %4074 = vst.msk [vmem:[%s5945_s25 + $0x18] sm:$0xff] %vm4070_vm13, %v4065_v41 }
 0x5c1   : > { %4090 = vst.msk [vmem:[%s5945_s25 + $0x10] sm:$0xff] %vm4087_vm14, %v4080_v53 }
 0x5c3   : > { %v4082_v8 = vpop.permute.xlu0 %4081  ;;  %v4097_v11 = vpop.permute.xlu1 %4096 }
 0x5c4   : > { %4091 = vst.msk [vmem:[%s5945_s25 + $0x18] sm:$0xff] %vm4087_vm14, %v4082_v8 }
 0x5c5   : > { %4107 = vst.msk [vmem:[%s5945_s25 + $0x10] sm:$0xff] %vm4104_vm15, %v4097_v11 }
 0x5c7   : > { %v4099_v63 = vpop.permute.xlu0 %4098  ;;  %v4114_v1 = vpop.permute.xlu1 %4113 }
 0x5c8   : > { %4108 = vst.msk [vmem:[%s5945_s25 + $0x18] sm:$0xff] %vm4104_vm15, %v4099_v63 }
 0x5c9   : > { %4124 = vst.msk [vmem:[%s5945_s25 + $0x10] sm:$0xff] %vm4121_vm0, %v4114_v1 }
 0x5cb   : > { %v4116_v24 = vpop.permute.xlu0 %4115  ;;  %v4131_v58 = vpop.permute.xlu1 %4130 }
 0x5cc   : > { %4125 = vst.msk [vmem:[%s5945_s25 + $0x18] sm:$0xff] %vm4121_vm0, %v4116_v24 }
 0x5cd   : > { %4141 = vst.msk [vmem:[%s5945_s25 + $0x10] sm:$0xff] %vm4138_vm1, %v4131_v58 }
 0x5cf   : > { %v4133_v50 = vpop.permute.xlu0 %4132  ;;  %v4148_v56 = vpop.permute.xlu1 %4147 }
 0x5d0   : > { %4142 = vst.msk [vmem:[%s5945_s25 + $0x18] sm:$0xff] %vm4138_vm1, %v4133_v50 }
 0x5d1   : > { %4158 = vst.msk [vmem:[%s5945_s25 + $0x10] sm:$0xff] %vm4155_vm2, %v4148_v56 }
 0x5d3   : > { %v4150_v60 = vpop.permute.xlu0 %4149  ;;  %v4165_v30 = vpop.permute.xlu1 %4164 }
 0x5d4   : > { %4159 = vst.msk [vmem:[%s5945_s25 + $0x18] sm:$0xff] %vm4155_vm2, %v4150_v60 }
 0x5d5   : > { %4175 = vst.msk [vmem:[%s5945_s25 + $0x10] sm:$0xff] %vm4172_vm3, %v4165_v30 }
 0x5d7   : > { %v4167_v10 = vpop.permute.xlu0 %4166  ;;  %v4186_v40 = vpop.permute.xlu1 %4185 }
 0x5d8   : > { %4176 = vst.msk [vmem:[%s5945_s25 + $0x18] sm:$0xff] %vm4172_vm3, %v4167_v10 }
 0x5d9   : > { %4196 = vst.msk [vmem:[%s5945_s25 + $0x10] sm:$0xff] %vm4193_vm4, %v4186_v40 }
 0x5db   : > { %v4188_v19 = vpop.permute.xlu0 %4187  ;;  %v4203_v2 = vpop.permute.xlu1 %4202 }
 0x5dc   : > { %4197 = vst.msk [vmem:[%s5945_s25 + $0x18] sm:$0xff] %vm4193_vm4, %v4188_v19 }
 0x5dd   : > { %4213 = vst.msk [vmem:[%s5945_s25 + $0x10] sm:$0xff] %vm4210_vm5, %v4203_v2 }
 0x5df   : > { %v4205_v59 = vpop.permute.xlu0 %4204 }
 0x5e0   : > { %4214 = vst.msk [vmem:[%s5945_s25 + $0x18] sm:$0xff] %vm4210_vm5, %v4205_v59 }
 0x5e1 PF: > { %s18_s24 = sadd.s32 1, %s4574_s24  }
 0x5e2   : > { %p15_p1 = scmp.ge.s32.totalorder %s18_s24, 4  }
 0x5e4   :  { %17 = sbr.rel (!%p15_p1) target bundleno = 1 (0x1), region = 107 }
 0x5e9   :  { %4236 = vsyncpa [#allocation5], 1 }
 0x5ea   :  { %4238 = vsyncpa [#allocation5 + $0x1], 1 }

</bundles_post_ra>
